<compile_context>
chip_gen: v6e
topology: v6e:2x2x1
jax: 0.10.0
libtpu: 0.0.40
codegen_flags: <defaults>
</compile_context>

<pallas_src>
import functools
import math

import jax
import jax.numpy as jnp
from jax import lax
from jax.experimental import pallas as pl
from jax.experimental.pallas import tpu as pltpu


def _softplus(x):
    # torch.nn.Softplus default: log(1 + exp(x)), linear above threshold 20.
    return jnp.where(x > 20.0, x, jnp.log1p(jnp.exp(jnp.minimum(x, 20.0))))


def _normal_cdf(x):
    # Phi(x) = 0.5*(1 + erf(x/sqrt(2))).  erf via Abramowitz–Stegun 7.1.26
    # (|err| < 1.5e-7) so we only rely on exp/abs/mul-add inside the kernel.
    z = x * 0.7071067811865476
    az = jnp.abs(z)
    t = 1.0 / (1.0 + 0.3275911 * az)
    poly = t * (0.254829592 + t * (-0.284496736 + t * (1.421413741
            + t * (-1.453152027 + t * 1.061405429))))
    erf_abs = 1.0 - poly * jnp.exp(-az * az)
    erf = jnp.where(z >= 0.0, erf_abs, -erf_abs)
    return 0.5 * (1.0 + erf)


def _noisy_gate_kernel(top_k, n_tokens, tile_b,
                       x_ref, w_ref, noise_ref,
                       gates_ref, imp_ref, load_ref, cnt_ref):
    E = noise_ref.shape[-1]
    TB = tile_b

    x = x_ref[...]                                                     # (TB, D)
    # Single fused MXU matmul: [clean_logits | raw_noise] = x @ [w_gate|w_noise]
    logits2 = jnp.dot(x, w_ref[...], preferred_element_type=jnp.float32)  # (TB, 2E)
    clean = logits2[:, :E]
    raw_noise = logits2[:, E:]
    noise_std = _softplus(raw_noise) + 0.01
    noisy = clean + noise_ref[...] * noise_std                         # (TB, E)

    # Valid-row mask: rows >= n_tokens are zero-padding added by the wrapper.
    row_ids = tile_b * pl.program_id(0) + lax.broadcasted_iota(
        jnp.int32, (TB, 1), 0)
    valid = (row_ids < n_tokens).astype(jnp.float32)                   # (TB, 1)
    col_ids = lax.broadcasted_iota(jnp.int32, (1, E), 1)               # (1, E)

    # --- top-(k+1) VALUES: (k+1) masked max-reductions, no index argmin ---
    NEG = jnp.float32(-1e30)
    kp1 = min(top_k + 1, E)
    work = noisy
    vals = []
    for _ in range(kp1):
        m = jnp.max(work, axis=1, keepdims=True)                       # (TB, 1)
        vals.append(m)
        work = jnp.where(work >= m, NEG, work)
    v_max = vals[0]                     # largest noisy logit
    thr_out = vals[top_k - 1]           # k-th largest noisy logit

    # --- gates: masked softmax over the selected (top-k) logits ---
    sel = noisy >= thr_out                                             # (TB, E)
    num = jnp.where(sel, jnp.exp(noisy - v_max), 0.0)
    gates = num / jnp.sum(num, axis=1, keepdims=True)
    gates = gates * valid
    gates_ref[...] = gates

    # --- fused auxiliary-loss partial reductions (per tile) ---
    if top_k < E:
        thr_in = vals[top_k]            # (k+1)-th largest noisy logit
        is_in = noisy > thr_in
        inv_std = 1.0 / noise_std
        prob = jnp.where(is_in,
                         _normal_cdf((clean - thr_in) * inv_std),
                         _normal_cdf((clean - thr_out) * inv_std))
    else:
        prob = (gates > 0.0).astype(jnp.float32)        # _gates_to_load

    imp_ref[...] = jnp.sum(gates, axis=0, keepdims=True).reshape(1, 1, E)
    load_ref[...] = jnp.sum(prob * valid, axis=0, keepdims=True).reshape(1, 1, E)
    # shift count: number of selected (row, expert) pairs with expert != 0
    sel_nz = jnp.where(col_ids != 0, sel.astype(jnp.float32) * valid, 0.0)
    cnt = jnp.sum(jnp.sum(sel_nz, axis=0, keepdims=True), axis=1, keepdims=True)
    cnt_ref[...] = cnt.reshape(1, 1, 1)


def _cv_squared(x):
    eps = 1e-10
    if x.shape[0] == 1:
        return jnp.float32(0.0)
    # torch .var() is the unbiased estimator (ddof=1)
    return jnp.var(x, ddof=1) / (jnp.mean(x) ** 2 + eps)


def noisy_gate_forward(inp, w_gate, w_noise, noise, top_k, *, tile_b=128):
    """Returns (gates, loss, shift_ratio) — gates is the module's return value."""
    B, D = inp.shape
    E = w_gate.shape[1]

    # Tile size: multiple of 8 sublanes, capped at tile_b; pad B up if needed.
    TB = min(tile_b, ((B + 7) // 8) * 8)
    n_tiles = pl.cdiv(B, TB)
    Bp = n_tiles * TB
    if Bp != B:
        inp = jnp.pad(inp, ((0, Bp - B), (0, 0)))
        noise = jnp.pad(noise, ((0, Bp - B), (0, 0)))

    # Fused weight: one [D, 2E] matmul instead of two [D, E] matmuls.
    w_cat = jnp.concatenate([w_gate, w_noise], axis=1)

    kernel = functools.partial(_noisy_gate_kernel, top_k, B, TB)

    gates_p, imp_p, load_p, cnt_p = pl.pallas_call(
        kernel,
        grid=(n_tiles,),
        in_specs=[
            pl.BlockSpec((TB, D), lambda i: (i, 0)),        # tokens (tiled)
            pl.BlockSpec((D, 2 * E), lambda i: (0, 0)),     # weights (resident)
            pl.BlockSpec((TB, E), lambda i: (i, 0)),        # noise (tiled)
        ],
        out_specs=[
            pl.BlockSpec((TB, E), lambda i: (i, 0)),        # gates
            pl.BlockSpec((1, 1, E), lambda i: (i, 0, 0)),   # importance partial
            pl.BlockSpec((1, 1, E), lambda i: (i, 0, 0)),   # load partial
            pl.BlockSpec((1, 1, 1), lambda i: (i, 0, 0)),   # shift-count partial
        ],
        out_shape=(
            jax.ShapeDtypeStruct((Bp, E), jnp.float32),
            jax.ShapeDtypeStruct((n_tiles, 1, E), jnp.float32),
            jax.ShapeDtypeStruct((n_tiles, 1, E), jnp.float32),
            jax.ShapeDtypeStruct((n_tiles, 1, 1), jnp.float32),
        ),
        compiler_params=pltpu.CompilerParams(
            dimension_semantics=("parallel",)),
    )(inp, w_cat, noise)

    gates = gates_p[:B]

    # --- tiny cross-tile reductions + loss (plain-JAX glue) ---
    importance = imp_p.reshape(n_tiles, E).sum(axis=0)
    load = load_p.reshape(n_tiles, E).sum(axis=0)
    # TODO(synk): in PyTorch shift_ratio is a host `.item()` scalar side effect;
    # returned here as a device scalar instead.
    shift_ratio = cnt_p.sum() / B

    if top_k < E:
        load = load.at[0].multiply(6.0).at[1].multiply(4.0)
    importance = importance.at[0].multiply(6.0).at[1].multiply(4.0)

    loss = _cv_squared(importance) + _cv_squared(load)
    return gates, loss, shift_ratio


def _reference_forward(inp, w_gate, w_noise, noise, top_k):
    """Pure-JAX mirror of the PyTorch NoisyGate.forward (for verification)."""
    clean = inp @ w_gate
    raw = inp @ w_noise
    std = _softplus(raw) + 0.01
    noisy = clean + noise * std
    E = w_gate.shape[1]
    kp1 = min(top_k + 1, E)
    top_logits, top_indices = lax.top_k(noisy, kp1)
    top_k_logits = top_logits[:, :top_k]
    top_k_indices = top_indices[:, :top_k]
    top_k_gates = jax.nn.softmax(top_k_logits, axis=1)
    B = noisy.shape[0]
    gates = jnp.zeros_like(noisy).at[
        jnp.arange(B)[:, None], top_k_indices].set(top_k_gates)
    shift_ratio = jnp.sum(top_k_indices != 0) / top_k_indices.shape[0]
    if top_k < E:
        thr_in = top_logits[:, top_k:top_k + 1]
        thr_out = top_logits[:, top_k - 1:top_k]
        is_in = noisy > thr_in
        cdf = jax.scipy.stats.norm.cdf
        prob = jnp.where(is_in, cdf((clean - thr_in) / std),
                         cdf((clean - thr_out) / std))
        load = prob.sum(0)
        load = load.at[0].multiply(6.0).at[1].multiply(4.0)
    else:
        load = (gates > 0).sum(0).astype(jnp.float32)
    importance = gates.sum(0).at[0].multiply(6.0).at[1].multiply(4.0)
    loss = _cv_squared(importance) + _cv_squared(load)
    return gates, loss, shift_ratio


if __name__ == "__main__":
    # Module config (small, consistent with the reference): d_model=32,
    # num_expert=4, world_size=1 -> tot_expert=4, top_k=2.
    # B=256 with TB=128 exercises the tiled, "parallel" 2-step grid.
    d_model, num_expert, world_size, top_k = 32, 4, 1, 2
    tot_expert = num_expert * world_size
    B = 256

    key = jax.random.PRNGKey(0)
    k_x, k_g, k_n, k_eps = jax.random.split(key, 4)

    # kaiming_uniform_(a=sqrt(5)) on a (d_model, tot_expert) tensor:
    # fan_in = tot_expert, bound = 1/sqrt(fan_in)
    bound = 1.0 / math.sqrt(tot_expert)
    w_gate = jax.random.uniform(k_g, (d_model, tot_expert), jnp.float32, -bound, bound)
    w_noise = jax.random.uniform(k_n, (d_model, tot_expert), jnp.float32, -bound, bound)

    inp = jax.random.normal(k_x, (B, d_model), jnp.float32)
    # standard-normal noise (== torch.randn_like(clean_logits))
    noise = jax.random.normal(k_eps, (B, tot_expert), jnp.float32)

    gates, loss, shift_ratio = noisy_gate_forward(inp, w_gate, w_noise, noise, top_k)
    jax.block_until_ready((gates, loss, shift_ratio))

    # structural sanity checks
    assert gates.shape == (B, tot_expert)
    row_sums = jnp.sum(gates, axis=1)
    assert bool(jnp.all(jnp.abs(row_sums - 1.0) < 1e-5))
    assert bool(jnp.all(jnp.sum(gates > 0, axis=1) == top_k))

    # cross-check against a pure-JAX re-implementation of the PyTorch forward
    g_ref, loss_ref, sr_ref = _reference_forward(inp, w_gate, w_noise, noise, top_k)
    assert bool(jnp.allclose(gates, g_ref, atol=1e-3, rtol=1e-3))
    assert bool(jnp.allclose(loss, loss_ref, rtol=5e-3, atol=1e-5))
    assert bool(jnp.allclose(shift_ratio, sr_ref, atol=1e-6))

    print("KERNEL_OK")
</pallas_src>

<mosaic_0001>
module attributes {stable_mosaic.version = 11 : i64} {
  func.func @_noisy_gate_kernel(%arg0: i32, %arg1: memref<128x32xf32, #tpu.memory_space<vmem>>, %arg2: memref<32x8xf32, #tpu.memory_space<vmem>>, %arg3: memref<128x4xf32, #tpu.memory_space<vmem>>, %arg4: memref<128x4xf32, #tpu.memory_space<vmem>>, %arg5: memref<1x1x4xf32, #tpu.memory_space<vmem>>, %arg6: memref<1x1x4xf32, #tpu.memory_space<vmem>>, %arg7: memref<1x1x1xf32, #tpu.memory_space<vmem>>) attributes {dimension_semantics = [#tpu.dimension_semantics<parallel>], iteration_bounds = array<i64: 2>, scalar_prefetch = 0 : i64, scratch_operands = 0 : i64, tpu.core_type = #tpu.core_type<tc>, window_params = [{transform_indices = @transform_0, window_bounds = array<i64: 128, 32>}, {pipeline_mode = #tpu.pipeline_mode<synchronous>, transform_indices = @transform_1, window_bounds = array<i64: 32, 8>}, {transform_indices = @transform_2, window_bounds = array<i64: 128, 4>}, {transform_indices = @transform_3, window_bounds = array<i64: 128, 4>}, {transform_indices = @transform_4, window_bounds = array<i64: 1, 1, 4>}, {transform_indices = @transform_5, window_bounds = array<i64: 1, 1, 4>}, {transform_indices = @transform_6, window_bounds = array<i64: 1, 1, 1>}]} {
    %c0 = arith.constant 0 : index
    %c0_0 = arith.constant 0 : index
    %0 = vector.load %arg1[%c0, %c0_0] : memref<128x32xf32, #tpu.memory_space<vmem>>, vector<128x32xf32>
    %c0_1 = arith.constant 0 : index
    %c0_2 = arith.constant 0 : index
    %1 = vector.load %arg2[%c0_1, %c0_2] : memref<32x8xf32, #tpu.memory_space<vmem>>, vector<32x8xf32>
    %cst = arith.constant dense<0.000000e+00> : vector<128x8xf32>
    %2 = tpu.matmul %0, %1, %cst {dimension_numbers = #tpu.dot_dimension_numbers<[1], [0], [0], [1], [0, 0, 1, 1], [], []>} : vector<128x32xf32>, vector<32x8xf32>, vector<128x8xf32> -> vector<128x8xf32>
    %3 = vector.extract_strided_slice %2 {offsets = [0, 0], sizes = [128, 4], strides = [1, 1]} : vector<128x8xf32> to vector<128x4xf32>
    %4 = vector.extract_strided_slice %2 {offsets = [0, 4], sizes = [128, 4], strides = [1, 1]} : vector<128x8xf32> to vector<128x4xf32>
    %cst_3 = arith.constant 2.000000e+01 : f32
    %5 = vector.broadcast %cst_3 : f32 to vector<128x4xf32>
    %6 = arith.cmpf ogt, %4, %5 : vector<128x4xf32>
    %cst_4 = arith.constant 2.000000e+01 : f32
    %7 = vector.broadcast %cst_4 : f32 to vector<128x4xf32>
    %8 = arith.minimumf %4, %7 : vector<128x4xf32>
    %9 = math.exp %8 : vector<128x4xf32>
    %10 = math.log1p %9 : vector<128x4xf32>
    %11 = arith.select %6, %4, %10 : vector<128x4xi1>, vector<128x4xf32>
    %cst_5 = arith.constant 0.00999999977 : f32
    %12 = vector.broadcast %cst_5 : f32 to vector<128x4xf32>
    %13 = arith.addf %11, %12 : vector<128x4xf32>
    %c0_6 = arith.constant 0 : index
    %c0_7 = arith.constant 0 : index
    %14 = vector.load %arg3[%c0_6, %c0_7] : memref<128x4xf32, #tpu.memory_space<vmem>>, vector<128x4xf32>
    %15 = arith.mulf %14, %13 : vector<128x4xf32>
    %16 = arith.addf %3, %15 : vector<128x4xf32>
    %c128_i32 = arith.constant 128 : i32
    %17 = arith.muli %c128_i32, %arg0 : i32
    %18 = tpu.iota {dimensions = array<i32: 0>} : vector<128x1xi32>
    %19 = vector.broadcast %17 : i32 to vector<128x1xi32>
    %20 = arith.addi %19, %18 : vector<128x1xi32>
    %c256_i32 = arith.constant 256 : i32
    %21 = vector.broadcast %c256_i32 : i32 to vector<128x1xi32>
    %22 = arith.cmpi slt, %20, %21 : vector<128x1xi32>
    %23 = arith.extui %22 : vector<128x1xi1> to vector<128x1xi32>
    %24 = arith.sitofp %23 : vector<128x1xi32> to vector<128x1xf32>
    %25 = tpu.iota {dimensions = array<i32: 1>} : vector<1x4xi32>
    %cst_8 = arith.constant dense<0xFF800000> : vector<128xf32>
    %26 = vector.multi_reduction <maximumf>, %16, %cst_8 [1] : vector<128x4xf32> to vector<128xf32>
    %27 = vector.shape_cast %26 : vector<128xf32> to vector<128x1xf32>
    %28 = vector.broadcast %27 : vector<128x1xf32> to vector<128x4xf32>
    %29 = arith.cmpf oge, %16, %28 : vector<128x4xf32>
    %cst_9 = arith.constant -1.000000e+30 : f32
    %30 = vector.broadcast %cst_9 : f32 to vector<128x4xf32>
    %31 = arith.select %29, %30, %16 : vector<128x4xi1>, vector<128x4xf32>
    %cst_10 = arith.constant dense<0xFF800000> : vector<128xf32>
    %32 = vector.multi_reduction <maximumf>, %31, %cst_10 [1] : vector<128x4xf32> to vector<128xf32>
    %33 = vector.shape_cast %32 : vector<128xf32> to vector<128x1xf32>
    %34 = vector.broadcast %33 : vector<128x1xf32> to vector<128x4xf32>
    %35 = arith.cmpf oge, %31, %34 : vector<128x4xf32>
    %cst_11 = arith.constant -1.000000e+30 : f32
    %36 = vector.broadcast %cst_11 : f32 to vector<128x4xf32>
    %37 = arith.select %35, %36, %31 : vector<128x4xi1>, vector<128x4xf32>
    %cst_12 = arith.constant dense<0xFF800000> : vector<128xf32>
    %38 = vector.multi_reduction <maximumf>, %37, %cst_12 [1] : vector<128x4xf32> to vector<128xf32>
    %39 = vector.shape_cast %38 : vector<128xf32> to vector<128x1xf32>
    %40 = vector.broadcast %33 : vector<128x1xf32> to vector<128x4xf32>
    %41 = arith.cmpf oge, %16, %40 : vector<128x4xf32>
    %42 = vector.broadcast %27 : vector<128x1xf32> to vector<128x4xf32>
    %43 = arith.subf %16, %42 : vector<128x4xf32>
    %44 = math.exp %43 : vector<128x4xf32>
    %cst_13 = arith.constant 0.000000e+00 : f32
    %45 = vector.broadcast %cst_13 : f32 to vector<128x4xf32>
    %46 = arith.select %41, %44, %45 : vector<128x4xi1>, vector<128x4xf32>
    %cst_14 = arith.constant dense<0.000000e+00> : vector<128xf32>
    %47 = vector.multi_reduction <add>, %46, %cst_14 [1] : vector<128x4xf32> to vector<128xf32>
    %48 = vector.shape_cast %47 : vector<128xf32> to vector<128x1xf32>
    %49 = vector.broadcast %48 : vector<128x1xf32> to vector<128x4xf32>
    %50 = arith.divf %46, %49 : vector<128x4xf32>
    %51 = vector.broadcast %24 : vector<128x1xf32> to vector<128x4xf32>
    %52 = arith.mulf %50, %51 : vector<128x4xf32>
    %c0_15 = arith.constant 0 : index
    %c0_16 = arith.constant 0 : index
    %53 = vector.load %arg4[%c0_15, %c0_16] : memref<128x4xf32, #tpu.memory_space<vmem>>, vector<128x4xf32>
    tpu.vector_store %arg4[%c0_15, %c0_16], %52 {strides = array<i32>} : memref<128x4xf32, #tpu.memory_space<vmem>>, vector<128x4xf32>,
    %54 = vector.broadcast %39 : vector<128x1xf32> to vector<128x4xf32>
    %55 = arith.cmpf ogt, %16, %54 : vector<128x4xf32>
    %cst_17 = arith.constant 1.000000e+00 : f32
    %56 = vector.broadcast %cst_17 : f32 to vector<128x4xf32>
    %57 = arith.divf %56, %13 : vector<128x4xf32>
    %58 = vector.broadcast %39 : vector<128x1xf32> to vector<128x4xf32>
    %59 = arith.subf %3, %58 : vector<128x4xf32>
    %60 = arith.mulf %59, %57 : vector<128x4xf32>
    %cst_18 = arith.constant 0.707106769 : f32
    %61 = vector.broadcast %cst_18 : f32 to vector<128x4xf32>
    %62 = arith.mulf %60, %61 : vector<128x4xf32>
    %63 = math.absf %62 : vector<128x4xf32>
    %cst_19 = arith.constant 0.327591091 : f32
    %64 = vector.broadcast %cst_19 : f32 to vector<128x4xf32>
    %65 = arith.mulf %64, %63 : vector<128x4xf32>
    %cst_20 = arith.constant 1.000000e+00 : f32
    %66 = vector.broadcast %cst_20 : f32 to vector<128x4xf32>
    %67 = arith.addf %66, %65 : vector<128x4xf32>
    %cst_21 = arith.constant 1.000000e+00 : f32
    %68 = vector.broadcast %cst_21 : f32 to vector<128x4xf32>
    %69 = arith.divf %68, %67 : vector<128x4xf32>
    %cst_22 = arith.constant 1.06140542 : f32
    %70 = vector.broadcast %cst_22 : f32 to vector<128x4xf32>
    %71 = arith.mulf %69, %70 : vector<128x4xf32>
    %cst_23 = arith.constant -1.45315206 : f32
    %72 = vector.broadcast %cst_23 : f32 to vector<128x4xf32>
    %73 = arith.addf %72, %71 : vector<128x4xf32>
    %74 = arith.mulf %69, %73 : vector<128x4xf32>
    %cst_24 = arith.constant 1.42141378 : f32
    %75 = vector.broadcast %cst_24 : f32 to vector<128x4xf32>
    %76 = arith.addf %75, %74 : vector<128x4xf32>
    %77 = arith.mulf %69, %76 : vector<128x4xf32>
    %cst_25 = arith.constant -0.284496725 : f32
    %78 = vector.broadcast %cst_25 : f32 to vector<128x4xf32>
    %79 = arith.addf %78, %77 : vector<128x4xf32>
    %80 = arith.mulf %69, %79 : vector<128x4xf32>
    %cst_26 = arith.constant 0.254829586 : f32
    %81 = vector.broadcast %cst_26 : f32 to vector<128x4xf32>
    %82 = arith.addf %81, %80 : vector<128x4xf32>
    %83 = arith.mulf %69, %82 : vector<128x4xf32>
    %cst_27 = arith.constant 0.000000e+00 : f32
    %84 = vector.broadcast %cst_27 : f32 to vector<128x4xf32>
    %85 = arith.subf %84, %63 : vector<128x4xf32>
    %86 = arith.mulf %85, %63 : vector<128x4xf32>
    %87 = math.exp %86 : vector<128x4xf32>
    %88 = arith.mulf %83, %87 : vector<128x4xf32>
    %cst_28 = arith.constant 1.000000e+00 : f32
    %89 = vector.broadcast %cst_28 : f32 to vector<128x4xf32>
    %90 = arith.subf %89, %88 : vector<128x4xf32>
    %cst_29 = arith.constant 0.000000e+00 : f32
    %91 = vector.broadcast %cst_29 : f32 to vector<128x4xf32>
    %92 = arith.cmpf oge, %62, %91 : vector<128x4xf32>
    %cst_30 = arith.constant 0.000000e+00 : f32
    %93 = vector.broadcast %cst_30 : f32 to vector<128x4xf32>
    %94 = arith.subf %93, %90 : vector<128x4xf32>
    %95 = arith.select %92, %90, %94 : vector<128x4xi1>, vector<128x4xf32>
    %cst_31 = arith.constant 1.000000e+00 : f32
    %96 = vector.broadcast %cst_31 : f32 to vector<128x4xf32>
    %97 = arith.addf %96, %95 : vector<128x4xf32>
    %cst_32 = arith.constant 5.000000e-01 : f32
    %98 = vector.broadcast %cst_32 : f32 to vector<128x4xf32>
    %99 = arith.mulf %98, %97 : vector<128x4xf32>
    %100 = vector.broadcast %33 : vector<128x1xf32> to vector<128x4xf32>
    %101 = arith.subf %3, %100 : vector<128x4xf32>
    %102 = arith.mulf %101, %57 : vector<128x4xf32>
    %cst_33 = arith.constant 0.707106769 : f32
    %103 = vector.broadcast %cst_33 : f32 to vector<128x4xf32>
    %104 = arith.mulf %102, %103 : vector<128x4xf32>
    %105 = math.absf %104 : vector<128x4xf32>
    %cst_34 = arith.constant 0.327591091 : f32
    %106 = vector.broadcast %cst_34 : f32 to vector<128x4xf32>
    %107 = arith.mulf %106, %105 : vector<128x4xf32>
    %cst_35 = arith.constant 1.000000e+00 : f32
    %108 = vector.broadcast %cst_35 : f32 to vector<128x4xf32>
    %109 = arith.addf %108, %107 : vector<128x4xf32>
    %cst_36 = arith.constant 1.000000e+00 : f32
    %110 = vector.broadcast %cst_36 : f32 to vector<128x4xf32>
    %111 = arith.divf %110, %109 : vector<128x4xf32>
    %cst_37 = arith.constant 1.06140542 : f32
    %112 = vector.broadcast %cst_37 : f32 to vector<128x4xf32>
    %113 = arith.mulf %111, %112 : vector<128x4xf32>
    %cst_38 = arith.constant -1.45315206 : f32
    %114 = vector.broadcast %cst_38 : f32 to vector<128x4xf32>
    %115 = arith.addf %114, %113 : vector<128x4xf32>
    %116 = arith.mulf %111, %115 : vector<128x4xf32>
    %cst_39 = arith.constant 1.42141378 : f32
    %117 = vector.broadcast %cst_39 : f32 to vector<128x4xf32>
    %118 = arith.addf %117, %116 : vector<128x4xf32>
    %119 = arith.mulf %111, %118 : vector<128x4xf32>
    %cst_40 = arith.constant -0.284496725 : f32
    %120 = vector.broadcast %cst_40 : f32 to vector<128x4xf32>
    %121 = arith.addf %120, %119 : vector<128x4xf32>
    %122 = arith.mulf %111, %121 : vector<128x4xf32>
    %cst_41 = arith.constant 0.254829586 : f32
    %123 = vector.broadcast %cst_41 : f32 to vector<128x4xf32>
    %124 = arith.addf %123, %122 : vector<128x4xf32>
    %125 = arith.mulf %111, %124 : vector<128x4xf32>
    %cst_42 = arith.constant 0.000000e+00 : f32
    %126 = vector.broadcast %cst_42 : f32 to vector<128x4xf32>
    %127 = arith.subf %126, %105 : vector<128x4xf32>
    %128 = arith.mulf %127, %105 : vector<128x4xf32>
    %129 = math.exp %128 : vector<128x4xf32>
    %130 = arith.mulf %125, %129 : vector<128x4xf32>
    %cst_43 = arith.constant 1.000000e+00 : f32
    %131 = vector.broadcast %cst_43 : f32 to vector<128x4xf32>
    %132 = arith.subf %131, %130 : vector<128x4xf32>
    %cst_44 = arith.constant 0.000000e+00 : f32
    %133 = vector.broadcast %cst_44 : f32 to vector<128x4xf32>
    %134 = arith.cmpf oge, %104, %133 : vector<128x4xf32>
    %cst_45 = arith.constant 0.000000e+00 : f32
    %135 = vector.broadcast %cst_45 : f32 to vector<128x4xf32>
    %136 = arith.subf %135, %132 : vector<128x4xf32>
    %137 = arith.select %134, %132, %136 : vector<128x4xi1>, vector<128x4xf32>
    %cst_46 = arith.constant 1.000000e+00 : f32
    %138 = vector.broadcast %cst_46 : f32 to vector<128x4xf32>
    %139 = arith.addf %138, %137 : vector<128x4xf32>
    %cst_47 = arith.constant 5.000000e-01 : f32
    %140 = vector.broadcast %cst_47 : f32 to vector<128x4xf32>
    %141 = arith.mulf %140, %139 : vector<128x4xf32>
    %142 = arith.select %55, %99, %141 : vector<128x4xi1>, vector<128x4xf32>
    %cst_48 = arith.constant dense<0.000000e+00> : vector<4xf32>
    %143 = vector.multi_reduction <add>, %52, %cst_48 [0] : vector<128x4xf32> to vector<4xf32>
    %144 = vector.shape_cast %143 : vector<4xf32> to vector<1x4xf32>
    %145 = vector.shape_cast %144 : vector<1x4xf32> to vector<1x1x4xf32>
    %c0_49 = arith.constant 0 : index
    %c0_50 = arith.constant 0 : index
    %c0_51 = arith.constant 0 : index
    %146 = vector.load %arg5[%c0_49, %c0_50, %c0_51] : memref<1x1x4xf32, #tpu.memory_space<vmem>>, vector<1x1x4xf32>
    tpu.vector_store %arg5[%c0_49, %c0_50, %c0_51], %145 {strides = array<i32>} : memref<1x1x4xf32, #tpu.memory_space<vmem>>, vector<1x1x4xf32>,
    %147 = vector.broadcast %24 : vector<128x1xf32> to vector<128x4xf32>
    %148 = arith.mulf %142, %147 : vector<128x4xf32>
    %cst_52 = arith.constant dense<0.000000e+00> : vector<4xf32>
    %149 = vector.multi_reduction <add>, %148, %cst_52 [0] : vector<128x4xf32> to vector<4xf32>
    %150 = vector.shape_cast %149 : vector<4xf32> to vector<1x4xf32>
    %151 = vector.shape_cast %150 : vector<1x4xf32> to vector<1x1x4xf32>
    %c0_53 = arith.constant 0 : index
    %c0_54 = arith.constant 0 : index
    %c0_55 = arith.constant 0 : index
    %152 = vector.load %arg6[%c0_53, %c0_54, %c0_55] : memref<1x1x4xf32, #tpu.memory_space<vmem>>, vector<1x1x4xf32>
    tpu.vector_store %arg6[%c0_53, %c0_54, %c0_55], %151 {strides = array<i32>} : memref<1x1x4xf32, #tpu.memory_space<vmem>>, vector<1x1x4xf32>,
    %c0_i32 = arith.constant 0 : i32
    %153 = vector.broadcast %c0_i32 : i32 to vector<1x4xi32>
    %154 = arith.cmpi ne, %25, %153 : vector<1x4xi32>
    %155 = arith.extui %41 : vector<128x4xi1> to vector<128x4xi32>
    %156 = arith.sitofp %155 : vector<128x4xi32> to vector<128x4xf32>
    %157 = vector.broadcast %24 : vector<128x1xf32> to vector<128x4xf32>
    %158 = arith.mulf %156, %157 : vector<128x4xf32>
    %cst_56 = arith.constant 0.000000e+00 : f32
    %159 = vector.shape_cast %154 : vector<1x4xi1> to vector<1x4xi1>
    %160 = vector.broadcast %159 : vector<1x4xi1> to vector<128x4xi1>
    %161 = vector.broadcast %cst_56 : f32 to vector<128x4xf32>
    %162 = arith.select %160, %158, %161 : vector<128x4xi1>, vector<128x4xf32>
    %cst_57 = arith.constant dense<0.000000e+00> : vector<4xf32>
    %163 = vector.multi_reduction <add>, %162, %cst_57 [0] : vector<128x4xf32> to vector<4xf32>
    %164 = vector.shape_cast %163 : vector<4xf32> to vector<1x4xf32>
    %cst_58 = arith.constant dense<0.000000e+00> : vector<1xf32>
    %165 = vector.multi_reduction <add>, %164, %cst_58 [1] : vector<1x4xf32> to vector<1xf32>
    %166 = vector.shape_cast %165 : vector<1xf32> to vector<1x1xf32>
    %167 = vector.shape_cast %166 : vector<1x1xf32> to vector<1x1x1xf32>
    %c0_59 = arith.constant 0 : index
    %c0_60 = arith.constant 0 : index
    %c0_61 = arith.constant 0 : index
    %168 = vector.load %arg7[%c0_59, %c0_60, %c0_61] : memref<1x1x1xf32, #tpu.memory_space<vmem>>, vector<1x1x1xf32>
    tpu.vector_store %arg7[%c0_59, %c0_60, %c0_61], %167 {strides = array<i32>} : memref<1x1x1xf32, #tpu.memory_space<vmem>>, vector<1x1x1xf32>,
    return
  }
  func.func @transform_0(%arg0: i32) -> (i32, i32) {
    %c0_i32 = arith.constant 0 : i32
    %c0_i32_0 = arith.constant 0 : i32
    return %arg0, %c0_i32 : i32, i32
  }
  func.func @transform_1(%arg0: i32) -> (i32, i32) {
    %c0_i32 = arith.constant 0 : i32
    %c0_i32_0 = arith.constant 0 : i32
    %c0_i32_1 = arith.constant 0 : i32
    return %c0_i32, %c0_i32_0 : i32, i32
  }
  func.func @transform_2(%arg0: i32) -> (i32, i32) {
    %c0_i32 = arith.constant 0 : i32
    %c0_i32_0 = arith.constant 0 : i32
    return %arg0, %c0_i32 : i32, i32
  }
  func.func @transform_3(%arg0: i32) -> (i32, i32) {
    %c0_i32 = arith.constant 0 : i32
    %c0_i32_0 = arith.constant 0 : i32
    return %arg0, %c0_i32 : i32, i32
  }
  func.func @transform_4(%arg0: i32) -> (i32, i32, i32) {
    %c0_i32 = arith.constant 0 : i32
    %c0_i32_0 = arith.constant 0 : i32
    %c0_i32_1 = arith.constant 0 : i32
    return %arg0, %c0_i32, %c0_i32_0 : i32, i32, i32
  }
  func.func @transform_5(%arg0: i32) -> (i32, i32, i32) {
    %c0_i32 = arith.constant 0 : i32
    %c0_i32_0 = arith.constant 0 : i32
    %c0_i32_1 = arith.constant 0 : i32
    return %arg0, %c0_i32, %c0_i32_0 : i32, i32, i32
  }
  func.func @transform_6(%arg0: i32) -> (i32, i32, i32) {
    %c0_i32 = arith.constant 0 : i32
    %c0_i32_0 = arith.constant 0 : i32
    %c0_i32_1 = arith.constant 0 : i32
    return %arg0, %c0_i32, %c0_i32_0 : i32, i32, i32
  }
}

</mosaic_0001>

<bundles_post_ra>
// kernel: tpu_custom_call.1
= control target key start
LH: loop header
LB: loop body
LE: loop exit
PB: predicated region body
PF: predicated region fallthrough
CT: control target
= control target key end

     0   :  { %12 = vsyncpa [#allocation3], 0  ;;  %s5702_s0 = inlined_call_operand.vmem [shape: f32[256,32], index: 0, kind: input, shape index: {}]   ;;  %s5703_s1 = inlined_call_operand.vmem [shape: f32[32,8], index: 1, kind: input, shape index: {}]   ;;  %s5704_s2 = inlined_call_operand.vmem [shape: f32[256,4], index: 2, kind: input, shape index: {}]   ;;  %s5705_s3 = inlined_call_operand.vmem [shape: f32[256,4], index: 3, kind: output, shape index: {0}]   ;;  %s5706_s4 = inlined_call_operand.hbm [shape: f32[2,1,4], index: 4, kind: output, shape index: {1}]   ;;  %s5707_s5 = inlined_call_operand.hbm [shape: f32[2,1,4], index: 5, kind: output, shape index: {2}]   ;;  %s5708_s6 = inlined_call_operand.vmem [shape: f32[2,1,1], index: 6, kind: output, shape index: {3}]  }
   0x1   :  { %14 = vsyncpa [#allocation3 + $0x1], 0 }
   0x2   :  { %15 = vsyncpa [#allocation5], 0 }
   0x3   :  { %17 = vsyncpa [#allocation5 + $0x1], 0  ;;  %s3354_s21 = smov 0   ;;  %s3356_s22 = smov 0  }
   0x4   :  { %s3358_s23 = smov 0   ;;  %s3360_s24 = smov 0  }
   0x5 LB: > { %s3375_s25 = sadd.s32 4294967295, %s3313_s24   ;;  %s2766_s26 = sadd.s32 4294967294, %s3313_s24   ;;  %s3313_s24 = sphi %s3360_s24, %s6162_s24   ;;  %s3309_s23 = sphi %s3358_s23, %s6161_s23   ;;  %s3305_s22 = sphi %s3356_s22, %s6160_s22   ;;  %s3301_s21 = sphi %s3354_s21, %s6159_s21  }
   0x6   : > { %s3379_s27 = sadd.s32 1, %s3313_s24   ;;  %s129_s28 = sadd.s32 1, %s3309_s23 }
   0x7   : > { %s126_s29 = ssub.s32 %s3313_s24, %s3379_s27  ;;  %p139_p0 = scmp.ne.s32.totalorder %s3309_s23, %s3305_s22 }
   0x8   : > { %p127_p1 = scmp.eq.s32.totalorder %s126_s29, 0  ;;  %p140_p2 = scmp.eq.s32.totalorder %s3375_s25, 1 }
   0x9   : > { %p145_p3 = scmp.ne.s32.totalorder %s3305_s22, %s3301_s21  ;;  %p146_p4 = scmp.eq.s32.totalorder %s2766_s26, 1 }
   0xa   : > { %s3390_s30 = scalar_select %p127_p1, %s3309_s23, %s129_s28  }
   0xb   : > { %p3392_p5 = por %p140_p2, %p139_p0  ;;  %p3396_p6 = por %p146_p4, %p145_p3 }
   0xc   : > { %p2769_p7 = scmp.ge.s32.totalorder %s3313_s24, 1  ;;  %p237_p8 = scmp.lt.s32.totalorder %s3313_s24, 3 }
   0xe   : > { %p238_p9 = pnand %p2769_p7, %p237_p8 }
  0x10   : > { %241 = sbr.rel (%p238_p9) target bundleno = 1050 (0x41a), region = 32 }
  0x15   : > { %v323_v0 = vld [vmem:[%s5703_s1 + $0x18] sm:$0xff]  ;;  %v322_v1 = vld [vmem:[%s5703_s1 + $0x10] sm:$0xff]  ;;  %s3409_s13 = sshll.u32 %s3375_s25, 4  ;;  %v321_v2 = vld [vmem:[%s5703_s1 + $0x8] sm:$0xff]  ;;  %vm324_vm0 = vcmask 261120   ;;  %s3315_s29 = smov 124  }
  0x16   : > { %2849 = vmatprep.subr.mxu0 %v323_v0  ;;  %2881 = vmatprep.subr.mxu1 %v323_v0  ;;  %p284_p10 = scmp.lt.s32.totalorder %s3409_s13, 31  ;;  %v320_v3 = vld [vmem:[%s5703_s1] sm:$0xff]  ;;  %s2792_s12 = sshll.u32 %s3375_s25, 7 }
  0x17   : > { %2850 = vmatpush3.msra.mxu0 %v323_v0  ;;  %2885 = vmatpush3.msra.mxu1 %v323_v0  ;;  %p301_p11 = scmp.lt.s32.totalorder %s3375_s25, 1  ;;  %s5640_s9 = scalar_lea.hbm %s5707_s5, %s3409_s13 }
  0x18   : > { %2851 = vmatprep.subr.mxu0 %v322_v1  ;;  %2882 = vmatprep.subr.mxu1 %v322_v1  ;;  %s285_s16 = scalar_select %p284_p10, %s3409_s13, 31 }
  0x19   : > { %2852 = vmatpush3.msra.mxu0 %v322_v1  ;;  %2886 = vmatpush3.msra.mxu1 %v322_v1  ;;  %s6164_s25 = smov (!%p301_p11, %s3375_s25), 1 }
  0x1a   : > { %2853 = vmatprep.subr.mxu0 %v321_v2  ;;  %2883 = vmatprep.subr.mxu1 %v321_v2  ;;  %s3419_s19 = sshll.u32 %s285_s16, 3 }
  0x1b   : > { %2854 = vmatpush3.msra.mxu0 %v321_v2  ;;  %2887 = vmatpush3.msra.mxu1 %v321_v2  ;;  %s3425_s28 = scalar_lea.vmem %s5702_s0, %s3419_s19  ;;  %s3765_s11 = scalar_lea.vmem %s5704_s2, %s3419_s19 }
  0x1c   : > { %2855 = vmatprep.subr.mxu0 %v320_v3  ;;  %2884 = vmatprep.subr.mxu1 %v320_v3  ;;  %v304_v4 = vld [vmem:[%s3425_s28] sm:$0xff]  ;;  %v305_v6 = vld [vmem:[%s3425_s28 + $0x8] sm:$0xff]  ;;  %v306_v8 = vld [vmem:[%s3425_s28 + $0x10] sm:$0xff]  ;;  %s5245_s16 = scalar_lea.vmem %s5705_s3, %s3419_s19  ;;  %s303_s19 = scalar_lea.vmem %s5708_s6, %s6164_s25 }
  0x1d   : > { %v312_v5 = vld [vmem:[%s3425_s28 + $0x40] sm:$0xff]  ;;  %2856 = vmatpush3.msra.mxu0 %v320_v3  ;;  %2888 = vmatpush3.msra.mxu1 %v320_v3  ;;  %v313_v7 = vld [vmem:[%s3425_s28 + $0x48] sm:$0xff]  ;;  %v314_v9 = vld [vmem:[%s3425_s28 + $0x50] sm:$0xff]  ;;  %s5631_s25 = sand.u32 1, %s3305_s22  }
  0x1e   : > { %2857 = vmatprep.mubr.msk.f32.mxu0 %vm324_vm0, %v304_v4  ;;  %2869 = vmatprep.mubr.msk.f32.mxu1 %vm324_vm0, %v312_v5  ;;  %v307_v10 = vld [vmem:[%s3425_s28 + $0x18] sm:$0xff]  ;;  %v308_v12 = vld [vmem:[%s3425_s28 + $0x20] sm:$0xff]  ;;  %v309_v14 = vld [vmem:[%s3425_s28 + $0x28] sm:$0xff]  ;;  %s277_s20 = scalar_lea.vmem [#allocation4], %s5631_s25  ;;  %s2592_s10 = scalar_lea.sflag [#allocation5], %s5631_s25 }
  0x1f   : > { %2858 = vmatmul.mubr.msk.f32.vlgmr.msra.gmra.mxu0 %vm324_vm0, %v305_v6  ;;  %2870 = vmatmul.mubr.msk.f32.vlgmr.msra.gmra.mxu1 %vm324_vm0, %v313_v7  ;;  %v315_v11 = vld [vmem:[%s3425_s28 + $0x58] sm:$0xff]  ;;  %v316_v13 = vld [vmem:[%s3425_s28 + $0x60] sm:$0xff]  ;;  %v317_v15 = vld [vmem:[%s3425_s28 + $0x68] sm:$0xff]  ;;  %s2624_s26 = sshll.u32 %s277_s20, 4  ;;  %s5642_s26 = int_to_ptr.vmem [resolvable:$true] %s2624_s26 }
  0x20   : > { %2860 = vmatprep.mubr.msk.f32.mxu0 %vm324_vm0, %v306_v8  ;;  %2872 = vmatprep.mubr.msk.f32.mxu1 %vm324_vm0, %v314_v9  ;;  %v310_v16 = vld [vmem:[%s3425_s28 + $0x30] sm:$0xff]  ;;  %v311_v18 = vld [vmem:[%s3425_s28 + $0x38] sm:$0xff] }
  0x21   : > { %v318_v17 = vld [vmem:[%s3425_s28 + $0x70] sm:$0xff]  ;;  %v319_v19 = vld [vmem:[%s3425_s28 + $0x78] sm:$0xff] }
  0x23   : > { %2861 = vmatmul.mubr.msk.f32.gmra.mxu0 %vm324_vm0, %v307_v10  ;;  %2873 = vmatmul.mubr.msk.f32.gmra.mxu1 %vm324_vm0, %v315_v11 }
  0x24   : > { %2863 = vmatprep.mubr.msk.f32.mxu0 %vm324_vm0, %v308_v12  ;;  %2875 = vmatprep.mubr.msk.f32.mxu1 %vm324_vm0, %v316_v13 }
  0x27   : > { %2864 = vmatmul.mubr.msk.f32.gmra.mxu0 %vm324_vm0, %v309_v14  ;;  %2876 = vmatmul.mubr.msk.f32.gmra.mxu1 %vm324_vm0, %v317_v15 }
  0x28   : > { %2866 = vmatprep.mubr.msk.f32.mxu0 %vm324_vm0, %v310_v16  ;;  %2878 = vmatprep.mubr.msk.f32.mxu1 %vm324_vm0, %v318_v17 }
  0x2b   : > { %2867 = vmatmul.mubr.msk.f32.gmra.mxu0 %vm324_vm0, %v311_v18  ;;  %2879 = vmatmul.mubr.msk.f32.gmra.mxu1 %vm324_vm0, %v319_v19 }
  0xdf   : > { %v3459_v20 = vpop.f32.mrf.mxu0  ;;  %v3461_v21 = vpop.f32.mrf.mxu1 }
  0xe0   : > { %5874 = vst [vmem:[#allocation8_spill] sm:$0xff] %v3459_v20  ;;  %5875 = vst [vmem:[#allocation9_spill] sm:$0xff] %v3461_v21  ;;  %v535_v22 = vmin.f32 %v3459_v20, 20.0  ;;  %v543_v23 = vmin.f32 %v3461_v21, 20.0  ;;  %vm519_vm2 = vcmp.gt.f32.partialorder %v3459_v20, 20.0  ;;  %vm527_vm3 = vcmp.gt.f32.partialorder %v3461_v21, 20.0 }
  0xe1   : > { %v3465_v24 = vpop.f32.mrf.mxu0  ;;  %v3467_v25 = vpop.f32.mrf.mxu1 }
  0xe2   : > { %5876 = vst [vmem:[#allocation10_spill] sm:$0xff] %v3465_v24  ;;  %5877 = vst [vmem:[#allocation11_spill] sm:$0xff] %v3467_v25  ;;  %v552_v26 = vmul.f32 1.442695, %v535_v22  ;;  %v568_v27 = vmul.f32 1.442695, %v543_v23 }
  0xe3   : > { %v534_v28 = vmin.f32 %v3465_v24, 20.0  ;;  %v542_v29 = vmin.f32 %v3467_v25, 20.0  ;;  %v3471_v30 = vpop.f32.mrf.mxu0  ;;  %v3473_v31 = vpop.f32.mrf.mxu1  ;;  %vm518_vm5 = vcmp.gt.f32.partialorder %v3465_v24, 20.0  ;;  %vm526_vm9 = vcmp.gt.f32.partialorder %v3467_v25, 20.0 }
  0xe4   : > { %5878 = vst [vmem:[#allocation12_spill] sm:$0xff] %v3471_v30  ;;  %5879 = vst [vmem:[#allocation13_spill] sm:$0xff] %v3473_v31  ;;  %2935 = vpow2.f32 %v552_v26  ;;  %v537_v34 = vmin.f32 %v3471_v30, 20.0  ;;  %v545_v35 = vmin.f32 %v3473_v31, 20.0  ;;  %vm521_vm7 = vcmp.gt.f32.partialorder %v3471_v30, 20.0 }
  0xe5   : > { %v550_v32 = vmul.f32 1.442695, %v534_v28  ;;  %v566_v33 = vmul.f32 1.442695, %v542_v29  ;;  %2937 = vpow2.f32 %v568_v27  ;;  %v3477_v36 = vpop.f32.mrf.mxu0  ;;  %v3479_v37 = vpop.f32.mrf.mxu1  ;;  %vm529_vm12 = vcmp.gt.f32.partialorder %v3473_v31, 20.0 }
  0xe6   : > { %5880 = vst [vmem:[#allocation14_spill] sm:$0xff] %v3477_v36  ;;  %5881 = vst [vmem:[#allocation15_spill] sm:$0xff] %v3479_v37  ;;  %v556_v38 = vmul.f32 1.442695, %v537_v34  ;;  %v536_v39 = vmin.f32 %v3477_v36, 20.0  ;;  %v544_v40 = vmin.f32 %v3479_v37, 20.0 }
  0xe7   : > { %2939 = vpow2.f32 %v550_v32  ;;  %v572_v41 = vmul.f32 1.442695, %v545_v35  ;;  %v3483_v42 = vpop.f32.mrf.mxu0  ;;  %v3485_v43 = vpop.f32.mrf.mxu1  ;;  %vm528_vm14 = vcmp.gt.f32.partialorder %v3479_v37, 20.0  ;;  %vm520_vm0 = vcmp.gt.f32.partialorder %v3477_v36, 20.0 }
  0xe8   : > { %2941 = vpow2.f32 %v566_v33  ;;  %5882 = vst [vmem:[#allocation16_spill] sm:$0xff] %v3483_v42  ;;  %5883 = vst [vmem:[#allocation17_spill] sm:$0xff] %v3485_v43  ;;  %v570_v44 = vmul.f32 1.442695, %v544_v40  ;;  %v539_v45 = vmin.f32 %v3483_v42, 20.0  ;;  %v547_v47 = vmin.f32 %v3485_v43, 20.0 }
  0xe9   : > { %2943 = vpow2.f32 %v556_v38  ;;  %v554_v46 = vmul.f32 1.442695, %v536_v39  ;;  %v3489_v48 = vpop.f32.mrf.mxu0  ;;  %v3491_v49 = vpop.f32.mrf.mxu1 }
  0xea   : > { %5884 = vst [vmem:[#allocation18_spill] sm:$0xff] %v3489_v48  ;;  %5885 = vst [vmem:[#allocation19_spill] sm:$0xff] %v3491_v49  ;;  %2945 = vpow2.f32 %v572_v41  ;;  %v560_v50 = vmul.f32 1.442695, %v539_v45  ;;  %v538_v51 = vmin.f32 %v3489_v48, 20.0  ;;  %v546_v52 = vmin.f32 %v3491_v49, 20.0 }
  0xeb   : > { %2947 = vpow2.f32 %v570_v44  ;;  %v576_v53 = vmul.f32 1.442695, %v547_v47  ;;  %v3495_v54 = vpop.f32.mrf.mxu0  ;;  %v3497_v55 = vpop.f32.mrf.mxu1 }
  0xec   : > { %5886 = vst [vmem:[#allocation20_spill] sm:$0xff] %v3495_v54  ;;  %5887 = vst [vmem:[#allocation21_spill] sm:$0xff] %v3497_v55  ;;  %v558_v56 = vmul.f32 1.442695, %v538_v51  ;;  %v541_v57 = vmin.f32 %v3495_v54, 20.0  ;;  %2949 = vpow2.f32 %v554_v46  ;;  %v549_v60 = vmin.f32 %v3497_v55, 20.0 }
  0xed   : > { %v574_v58 = vmul.f32 1.442695, %v546_v52  ;;  %v3500_v59 = vpop.f32.mrf.mxu0  ;;  %2951 = vpow2.f32 %v560_v50  ;;  %v3503_v62 = vpop.f32.mrf.mxu1 }
  0xee   : > { %5888 = vst [vmem:[#allocation22_spill] sm:$0xff] %v3500_v59  ;;  %v564_v61 = vmul.f32 1.442695, %v541_v57  ;;  %5889 = vst [vmem:[#allocation23_spill] sm:$0xff] %v3503_v62  ;;  %2953 = vpow2.f32 %v576_v53  ;;  %v540_v63 = vmin.f32 %v3500_v59, 20.0  ;;  %v548_v2 = vmin.f32 %v3503_v62, 20.0 }
  0xef   : > { %v580_v0 = vmul.f32 1.442695, %v549_v60  ;;  %2955 = vpow2.f32 %v558_v56 }
  0xf0   : > { %2957 = vpow2.f32 %v574_v58  ;;  %v562_v6 = vmul.f32 1.442695, %v540_v63  ;;  %v578_v11 = vmul.f32 1.442695, %v548_v2 }
  0xf1   : > { %v2936_v1 = vpop.eup %2935  ;;  %2959 = vpow2.f32 %v564_v61 }
  0xf2   : > { %v2938_v3 = vpop.eup %2937  ;;  %v591_v4 = vadd.f32 1.0, %v2936_v1  ;;  %2961 = vpow2.f32 %v580_v0  ;;  %v594_v12 = vmul.f32 -0.5, %v2936_v1  ;;  %v597_v16 = vand.u32 2147483647, %v2936_v1 }
  0xf3   : > { %v663_v7 = vadd.f32 1.0, %v2938_v3  ;;  %v666_v15 = vmul.f32 -0.5, %v2938_v3  ;;  %v669_v23 = vand.u32 2147483647, %v2938_v3 }
  0xf4   : > { %v2940_v5 = vpop.eup %2939  ;;  %2963 = vlog2.f32 %v591_v4  ;;  %v595_v26 = vadd.f32 1.0, %v594_v12  ;;  %vm3521_vm1 = vcmp.lt.f32.partialorder %v597_v16, 0.0004427343 }
  0xf5   : > { %v3507_v8 = vpop.eup %2941  ;;  %v582_v9 = vadd.f32 1.0, %v2940_v5  ;;  %2965 = vlog2.f32 %v663_v7  ;;  %v585_v18 = vmul.f32 -0.5, %v2940_v5  ;;  %v667_v34 = vadd.f32 1.0, %v666_v15 }
  0xf6   : > { %v2944_v10 = vpop.eup %2943  ;;  %v654_v22 = vadd.f32 1.0, %v3507_v8  ;;  %v657_v28 = vmul.f32 -0.5, %v3507_v8  ;;  %v588_v38 = vand.u32 2147483647, %v2940_v5  ;;  %vm3532_vm4 = vcmp.lt.f32.partialorder %v669_v23, 0.0004427343 }
  0xf7   : > { %2967 = vlog2.f32 %v582_v9  ;;  %v609_v13 = vadd.f32 1.0, %v2944_v10  ;;  %v3509_v14 = vpop.eup %2945  ;;  %v612_v19 = vmul.f32 -0.5, %v2944_v10  ;;  %v586_v41 = vadd.f32 1.0, %v585_v18 }
  0xf8   : > { %2969 = vpow2.f32 %v562_v6  ;;  %v3511_v17 = vpop.eup %2947  ;;  %v681_v29 = vadd.f32 1.0, %v3509_v14  ;;  %v684_v32 = vmul.f32 -0.5, %v3509_v14  ;;  %v615_v45 = vand.u32 2147483647, %v2944_v10 }
  0xf9   : > { %2971 = vlog2.f32 %v609_v13  ;;  %v3514_v27 = vpop.eup %2949  ;;  %v672_v39 = vadd.f32 1.0, %v3511_v17  ;;  %v613_v44 = vadd.f32 1.0, %v612_v19  ;;  %v675_v50 = vmul.f32 -0.5, %v3511_v17 }
  0xfa   : > { %2973 = vpow2.f32 %v578_v11  ;;  %v3519_v33 = vpop.eup %2951  ;;  %v600_v51 = vadd.f32 1.0, %v3514_v27  ;;  %v596_v53 = vmul.f32 %v2936_v1, %v595_v26  ;;  %v658_v56 = vadd.f32 1.0, %v657_v28 }
  0xfb   : > { %2975 = vlog2.f32 %v654_v22  ;;  %v3526_v40 = vpop.eup %2953  ;;  %v660_v57 = vand.u32 2147483647, %v3507_v8  ;;  %v685_v58 = vadd.f32 1.0, %v684_v32  ;;  %v668_v61 = vmul.f32 %v2938_v3, %v667_v34 }
  0xfc   : > { %2977 = vlog2.f32 %v681_v29  ;;  %v3529_v46 = vpop.eup %2955  ;;  %v687_v63 = vand.u32 2147483647, %v3509_v14  ;;  %v627_v0 = vadd.f32 1.0, %v3519_v33  ;;  %v587_v4 = vmul.f32 %v2940_v5, %v586_v41 }
  0xfd   : > { %2979 = vlog2.f32 %v672_v39  ;;  %v3538_v52 = vpop.eup %2957  ;;  %vm3548_vm6 = vcmp.lt.f32.partialorder %v588_v38, 0.0004427343  ;;  %v614_v1 = vmul.f32 %v2944_v10, %v613_v44  ;;  %vm3553_vm8 = vcmp.lt.f32.partialorder %v615_v45, 0.0004427343 }
  0xfe   : > { %v3542_v60 = vpop.eup %2959  ;;  %2981 = vlog2.f32 %v600_v51  ;;  %v676_v9 = vadd.f32 1.0, %v675_v50  ;;  %v678_v11 = vand.u32 2147483647, %v3511_v17  ;;  %v618_v12 = vadd.f32 1.0, %v3529_v46 }
  0xff   : > { %v3546_v2 = vpop.eup %2961  ;;  %2983 = vlog2.f32 %v627_v0  ;;  %v659_v15 = vmul.f32 %v3507_v8, %v658_v56  ;;  %vm3561_vm10 = vcmp.lt.f32.partialorder %v660_v57, 0.0004427343  ;;  %v686_v10 = vmul.f32 %v3509_v14, %v685_v58 }
 0x100   : > { %vm3566_vm11 = vcmp.lt.f32.partialorder %v687_v63, 0.0004427343  ;;  %v603_v23 = vmul.f32 -0.5, %v3514_v27  ;;  %v606_v26 = vand.u32 2147483647, %v3514_v27  ;;  %2985 = vlog2.f32 %v618_v12 }
 0x101   : > { %v2964_v3 = vpop.eup %2963  ;;  %v630_v14 = vmul.f32 -0.5, %v3519_v33  ;;  %v699_v32 = vadd.f32 1.0, %v3526_v40  ;;  %v677_v41 = vmul.f32 %v3511_v17, %v676_v9  ;;  %vm3585_vm13 = vcmp.lt.f32.partialorder %v678_v11, 0.0004427343 }
 0x102   : > { %v2966_v13 = vpop.eup %2965  ;;  %v593_v5 = vmul.f32 0.6931472, %v2964_v3  ;;  %v604_v57 = vadd.f32 1.0, %v603_v23  ;;  %v621_v0 = vmul.f32 -0.5, %v3529_v46  ;;  %vm3614_vm15 = vcmp.lt.f32.partialorder %v606_v26, 0.0004427343 }
 0x103   : > { %v665_v19 = vmul.f32 0.6931472, %v2966_v13  ;;  %2987 = vlog2.f32 %v699_v32  ;;  %v631_v63 = vadd.f32 1.0, %v630_v14  ;;  %v633_v9 = vand.u32 2147483647, %v3519_v33 }
 0x104   : > { %v2968_v18 = vpop.eup %2967  ;;  %v599_v8 = vsel %vm3521_vm1, %v596_v53, %v593_v5  ;;  %v605_v23 = vmul.f32 %v3514_v27, %v604_v57  ;;  %v690_v26 = vadd.f32 1.0, %v3538_v52  ;;  %v624_v14 = vand.u32 2147483647, %v3529_v46 }
 0x105   : > { %v3572_v28 = vpop.eup %2969  ;;  %v584_v29 = vmul.f32 0.6931472, %v2968_v18  ;;  %v671_v38 = vsel %vm3532_vm4, %v668_v61, %v665_v19  ;;  %v727_v39 = vsel %vm519_vm2, %v3459_v20, %v599_v8  ;;  %v632_v16 = vmul.f32 %v3519_v33, %v631_v63 }
 0x106   : > { %v2972_v34 = vpop.eup %2971  ;;  %v735_v45 = vsel %vm527_vm3, %v3461_v21, %v671_v38  ;;  %v3594_v50 = vadd.f32 0.01, %v727_v39  ;;  %2989 = vlog2.f32 %v690_v26  ;;  %vm3647_vm1 = vcmp.lt.f32.partialorder %v633_v9, 0.0004427343 }
 0x107   : > { %v3589_v44 = vpop.eup %2973  ;;  %v590_v47 = vsel %vm3548_vm6, %v587_v4, %v584_v29  ;;  %v611_v51 = vmul.f32 0.6931472, %v2972_v34  ;;  %v3599_v17 = vadd.f32 0.01, %v735_v45  ;;  %vm3661_vm2 = vcmp.lt.f32.partialorder %v624_v14, 0.0004427343 }
 0x108   : > { %v2976_v53 = vpop.eup %2975  ;;  %v726_v56 = vsel %vm518_vm5, %v3465_v24, %v590_v47  ;;  %792 = vrot.lane.b32.xlu0 %v3594_v50, %s3315_s29  ;;  %v645_v57 = vadd.f32 1.0, %v3542_v60  ;;  %vm523_vm3 = vcmp.gt.f32.partialorder %v3483_v42, 20.0  ;;  %vm522_vm4 = vcmp.gt.f32.partialorder %v3489_v48, 20.0 }
 0x109   : > { %v617_v58 = vsel %vm3553_vm8, %v614_v1, %v611_v51  ;;  %v656_v61 = vmul.f32 0.6931472, %v2976_v53  ;;  %v2978_v4 = vpop.eup %2977  ;;  %808 = vrot.lane.b32.xlu1 %v3599_v17, %s3315_s29  ;;  %v702_v1 = vmul.f32 -0.5, %v3526_v40  ;;  %v3620_v11 = vadd.f32 0.01, %v726_v56 }
 0x10a   : > { %v729_v6 = vsel %vm521_vm7, %v3471_v30, %v617_v58  ;;  %v2980_v7 = vpop.eup %2979  ;;  %v683_v5 = vmul.f32 0.6931472, %v2978_v4  ;;  %v705_v56 = vand.u32 2147483647, %v3526_v40  ;;  %2991 = vlog2.f32 %v645_v57 }
 0x10b   : > { %v3622_v12 = vadd.f32 0.01, %v729_v6  ;;  %v662_v13 = vsel %vm3561_vm10, %v659_v15, %v656_v61  ;;  %v674_v19 = vmul.f32 0.6931472, %v2980_v7  ;;  %v2982_v8 = vpop.eup %2981  ;;  %v622_v15 = vadd.f32 1.0, %v621_v0 }
 0x10c   : > { %v734_v18 = vsel %vm526_vm9, %v3467_v25, %v662_v13  ;;  %790 = vrot.lane.b32.xlu0 %v3620_v11, %s3315_s29  ;;  %v689_v29 = vsel %vm3566_vm11, %v686_v10, %v683_v5  ;;  %v602_v34 = vmul.f32 0.6931472, %v2982_v8  ;;  %v2984_v38 = vpop.eup %2983  ;;  %v703_v10 = vadd.f32 1.0, %v702_v1 }
 0x10d   : > { %796 = vrot.lane.b32.xlu1 %v3622_v12, %s3315_s29  ;;  %v737_v27 = vsel %vm529_vm12, %v3473_v31, %v689_v29  ;;  %v680_v32 = vsel %vm3585_vm13, %v677_v41, %v674_v19  ;;  %v3644_v22 = vadd.f32 0.01, %v734_v18  ;;  %v629_v35 = vmul.f32 0.6931472, %v2984_v38  ;;  %v2986_v47 = vpop.eup %2985 }
 0x10e   : > { %v3651_v39 = vadd.f32 0.01, %v737_v27  ;;  %v736_v45 = vsel %vm528_vm14, %v3479_v37, %v680_v32  ;;  %v608_v41 = vsel %vm3614_vm15, %v605_v23, %v602_v34  ;;  %v620_v61 = vmul.f32 0.6931472, %v2986_v47 }
 0x10f   : > { %v728_v51 = vsel %vm520_vm0, %v3477_v36, %v608_v41  ;;  %v635_v58 = vsel %vm3647_vm1, %v632_v16, %v629_v35  ;;  %v623_v63 = vmul.f32 %v3529_v46, %v622_v15  ;;  %v693_v0 = vmul.f32 -0.5, %v3538_v52 }
 0x110   : > { %806 = vrot.lane.b32.xlu0 %v3644_v22, %s3315_s29  ;;  %v3673_v4 = vadd.f32 0.01, %v736_v45  ;;  %v3676_v6 = vadd.f32 0.01, %v728_v51  ;;  %v704_v9 = vmul.f32 %v3526_v40, %v703_v10  ;;  %v2988_v1 = vpop.eup %2987  ;;  %v731_v46 = vsel %vm523_vm3, %v3483_v42, %v635_v58 }
 0x111   : > { %812 = vrot.lane.b32.xlu1 %v3651_v39, %s3315_s29  ;;  %v626_v3 = vsel %vm3661_vm2, %v623_v63, %v620_v61  ;;  %vm706_vm5 = vcmp.lt.f32.partialorder %v705_v56, 0.0004427343  ;;  %v636_v13 = vadd.f32 1.0, %v3572_v28  ;;  %v701_v5 = vmul.f32 0.6931472, %v2988_v1 }
 0x112   : > { %v730_v7 = vsel %vm522_vm4, %v3489_v48, %v626_v3  ;;  %v694_v18 = vadd.f32 1.0, %v693_v0  ;;  %v696_v40 = vand.u32 2147483647, %v3538_v52  ;;  %v648_v23 = vmul.f32 -0.5, %v3542_v60 }
 0x113   : > { %v3689_v19 = vadd.f32 0.01, %v730_v7  ;;  %2993 = vlog2.f32 %v636_v13  ;;  %v3693_v26 = vadd.f32 0.01, %v731_v46  ;;  %vm531_vm6 = vcmp.gt.f32.partialorder %v3485_v43, 20.0  ;;  %v2990_v27 = vpop.eup %2989 }
 0x114   : > { %810 = vrot.lane.b32.xlu0 %v3673_v4, %s3315_s29  ;;  %v707_v8 = vsel %vm706_vm5, %v704_v9, %v701_v5  ;;  %v717_v29 = vadd.f32 1.0, %v3546_v2  ;;  %v695_v15 = vmul.f32 %v3538_v52, %v694_v18  ;;  %v708_v14 = vadd.f32 1.0, %v3589_v44 }
 0x115   : > { %794 = vrot.lane.b32.xlu1 %v3676_v6, %s3315_s29  ;;  %v739_v16 = vsel %vm531_vm6, %v3485_v43, %v707_v8  ;;  %vm697_vm7 = vcmp.lt.f32.partialorder %v696_v40, 0.0004427343  ;;  %v649_v32 = vadd.f32 1.0, %v648_v23  ;;  %v639_v34 = vmul.f32 -0.5, %v3572_v28 }
 0x116   : > { %2995 = vlog2.f32 %v717_v29  ;;  %v3705_v38 = vadd.f32 0.01, %v739_v16  ;;  %v692_v33 = vmul.f32 0.6931472, %v2990_v27  ;;  %v651_v10 = vand.u32 2147483647, %v3542_v60 }
 0x117   : > { %2997 = vlog2.f32 %v708_v14  ;;  %vm530_vm8 = vcmp.gt.f32.partialorder %v3491_v49, 20.0  ;;  %v720_v45 = vmul.f32 -0.5, %v3546_v2  ;;  %v650_v35 = vmul.f32 %v3542_v60, %v649_v32  ;;  %v2992_v51 = vpop.eup %2991 }
 0x118   : > { %798 = vrot.lane.b32.xlu0 %v3689_v19, %s3315_s29  ;;  %v698_v52 = vsel %vm697_vm7, %v695_v15, %v692_v33  ;;  %v640_v47 = vadd.f32 1.0, %v639_v34  ;;  %vm652_vm9 = vcmp.lt.f32.partialorder %v651_v10, 0.0004427343  ;;  %v642_v56 = vand.u32 2147483647, %v3572_v28  ;;  %v767_v10 = vld [vmem:[%s3765_s11 + $0x48] sm:$0xff] }
 0x119   : > { %800 = vrot.lane.b32.xlu1 %v3693_v26, %s3315_s29  ;;  %v738_v41 = vsel %vm530_vm8, %v3491_v49, %v698_v52  ;;  %v647_v57 = vmul.f32 0.6931472, %v2992_v51  ;;  %v711_v58 = vmul.f32 -0.5, %v3589_v44  ;;  %v721_v61 = vadd.f32 1.0, %v720_v45 }
 0x11a   : > { %v3714_v53 = vadd.f32 0.01, %v738_v41  ;;  %vm525_vm10 = vcmp.gt.f32.partialorder %v3495_v54, 20.0  ;;  %v641_v0 = vmul.f32 %v3572_v28, %v640_v47  ;;  %v723_v60 = vand.u32 2147483647, %v3546_v2  ;;  %v758_v47 = vld [vmem:[%s3765_s11] sm:$0xff] }
 0x11b   : > { %v653_v63 = vsel %vm652_vm9, %v650_v35, %v647_v57  ;;  %2999 = vrcp.f32 %v3594_v50  ;;  %vm643_vm11 = vcmp.lt.f32.partialorder %v642_v56, 0.0004427343  ;;  %v712_v7 = vadd.f32 1.0, %v711_v58  ;;  %v761_v56 = vld [vmem:[%s3765_s11 + $0x18] sm:$0xff] }
 0x11c   : > { %814 = vrot.lane.b32.xlu0 %v3714_v53, %s3315_s29  ;;  %v733_v9 = vsel %vm525_vm10, %v3495_v54, %v653_v63  ;;  %v722_v13 = vmul.f32 %v3546_v2, %v721_v61  ;;  %v714_v5 = vand.u32 2147483647, %v3589_v44  ;;  %3001 = vrcp.f32 %v3620_v11 }
 0x11d   : > { %816 = vrot.lane.b32.xlu1 %v3705_v38, %s3315_s29  ;;  %v3725_v1 = vadd.f32 0.01, %v733_v9  ;;  %vm524_vm12 = vcmp.gt.f32.partialorder %v3500_v59, 20.0  ;;  %vm724_vm13 = vcmp.lt.f32.partialorder %v723_v60, 0.0004427343  ;;  %3003 = vrcp.f32 %v3622_v12  ;;  %v766_v9 = vld [vmem:[%s3765_s11 + $0x40] sm:$0xff] }
 0x11e   : > { %vm533_vm14 = vcmp.gt.f32.partialorder %v3497_v55, 20.0  ;;  %v713_v23 = vmul.f32 %v3589_v44, %v712_v7  ;;  %vm715_vm15 = vcmp.lt.f32.partialorder %v714_v5, 0.0004427343  ;;  %3005 = vrcp.f32 %v3676_v6  ;;  %v769_v7 = vld [vmem:[%s3765_s11 + $0x58] sm:$0xff] }
 0x11f   : > { %vm532_vm0 = vcmp.gt.f32.partialorder %v3503_v62, 20.0  ;;  %3007 = vrcp.f32 %v3693_v26  ;;  %vm955_vm1 = vcmask 31744  }
 0x120   : > { %v2994_v3 = vpop.eup %2993  ;;  %3009 = vrcp.f32 %v3689_v19  ;;  %v759_v19 = vld [vmem:[%s3765_s11 + $0x8] sm:$0xff] }
 0x121   : > { %v638_v46 = vmul.f32 0.6931472, %v2994_v3  ;;  %804 = vrot.lane.b32.xlu1 %v3725_v1, %s3315_s29 }
 0x123   : > { %v2996_v18 = vpop.eup %2995  ;;  %v644_v28 = vsel %vm643_vm11, %v641_v0, %v638_v46 }
 0x124   : > { %v732_v50 = vsel %vm524_vm12, %v3500_v59, %v644_v28  ;;  %v719_v40 = vmul.f32 0.6931472, %v2996_v18  ;;  %v2998_v8 = vpop.eup %2997 }
 0x125   : > { %v3736_v2 = vadd.f32 0.01, %v732_v50  ;;  %v710_v12 = vmul.f32 0.6931472, %v2998_v8 }
 0x126   : > { %v725_v11 = vsel %vm724_vm13, %v722_v13, %v719_v40 }
 0x127   : > { %802 = vrot.lane.b32.xlu0 %v3736_v2, %s3315_s29  ;;  %v741_v29 = vsel %vm533_vm14, %v3497_v55, %v725_v11  ;;  %v716_v15 = vsel %vm715_vm15, %v713_v23, %v710_v12  ;;  %v768_v23 = vld [vmem:[%s3765_s11 + $0x50] sm:$0xff]  ;;  %3011 = vrcp.f32 %v3736_v2 }
 0x128   : > { %v3744_v16 = vadd.f32 0.01, %v741_v29  ;;  %v740_v44 = vsel %vm532_vm0, %v3503_v62, %v716_v15  ;;  %v3000_v14 = vpop.eup %2999  ;;  %v760_v11 = vld [vmem:[%s3765_s11 + $0x10] sm:$0xff]  ;;  %3013 = vrcp.f32 %v3725_v1 }
 0x129   : > { %v3750_v6 = vadd.f32 0.01, %v740_v44  ;;  %v3002_v27 = vpop.eup %3001  ;;  %3015 = vrcp.f32 %v3644_v22 }
 0x12a   : > { %820 = vrot.lane.b32.xlu1 %v3744_v16, %s3315_s29  ;;  %v3004_v32 = vpop.eup %3003  ;;  %3017 = vrcp.f32 %v3599_v17 }
 0x12b   : > { %818 = vrot.lane.b32.xlu0 %v3750_v6, %s3315_s29  ;;  %v3006_v34 = vpop.eup %3005  ;;  %3019 = vrcp.f32 %v3673_v4 }
 0x12c   : > { %v3008_v26 = vpop.eup %3007  ;;  %3021 = vrcp.f32 %v3651_v39 }
 0x12d   : > { %v3010_v33 = vpop.eup %3009  ;;  %3023 = vrcp.f32 %v3714_v53 }
 0x12e   : > { %1438 = vrot.lane.b32.xlu1 %v3000_v14, %s3315_s29 }
 0x12f   : > { %1436 = vrot.lane.b32.xlu0 %v3002_v27, %s3315_s29 }
 0x132   : > { %1442 = vrot.lane.b32.xlu1 %v3004_v32, %s3315_s29 }
 0x133   : > { %1440 = vrot.lane.b32.xlu0 %v3006_v34, %s3315_s29  ;;  %v762_v34 = vld [vmem:[%s3765_s11 + $0x20] sm:$0xff] }
 0x137   : > { %1446 = vrot.lane.b32.xlu0 %v3008_v26, %s3315_s29 }
 0x13b   : > { %1444 = vrot.lane.b32.xlu0 %v3010_v33, %s3315_s29  ;;  %v763_v33 = vld [vmem:[%s3765_s11 + $0x28] sm:$0xff] }
 0x17a   : > { %v793_v52 = vpop.permute.xlu0 %792 }
 0x17b   : > { %v809_v45 = vpop.permute.xlu1 %808  ;;  %v839_v41 = vmul.f32 %v793_v52, %v759_v19 }
 0x17c   : > { %v847_v35 = vmul.f32 %v809_v45, %v767_v10 }
 0x17d   : > { %v3771_v51 = vadd.f32 %v3459_v20, %v839_v41 }
 0x17e   : > { %v3775_v57 = vadd.f32 %v3461_v21, %v847_v35  ;;  %v791_v58 = vpop.permute.xlu0 %790 }
 0x17f   : > { %5910 = vst [vmem:[#allocation24_spill] sm:$0xff] %v3771_v51  ;;  %v838_v61 = vmul.f32 %v791_v58, %v758_v47  ;;  %v797_v63 = vpop.permute.xlu1 %796  ;;  %v959_v0 = vsel %vm955_vm1, %v3771_v51, -inf  ;;  %v771_v58 = vld [vmem:[%s3765_s11 + $0x68] sm:$0xff] }
 0x180   : > { %5911 = vst [vmem:[#allocation25_spill] sm:$0xff] %v3775_v57  ;;  %v841_v60 = vmul.f32 %v797_v63, %v761_v56  ;;  %960 = vmax.xlane.f32.xlu1 %v959_v0  ;;  %v983_v3 = vsel %vm955_vm1, %v3775_v57, -inf }
 0x181   : > { %v3783_v46 = vadd.f32 %v838_v61, %v3465_v24  ;;  %984 = vmax.xlane.f32.xlu0 %v983_v3 }
 0x182   : > { %v807_v13 = vpop.permute.xlu0 %806  ;;  %v3789_v50 = vadd.f32 %v3471_v30, %v841_v60 }
 0x183   : > { %5912 = vst [vmem:[#allocation26_spill] sm:$0xff] %v3783_v46  ;;  %v846_v5 = vmul.f32 %v807_v13, %v766_v9  ;;  %v813_v18 = vpop.permute.xlu1 %812  ;;  %v956_v28 = vsel %vm955_vm1, %v3783_v46, -inf  ;;  %v770_v9 = vld [vmem:[%s3765_s11 + $0x60] sm:$0xff] }
 0x184   : > { %5913 = vst [vmem:[#allocation27_spill] sm:$0xff] %v3789_v50  ;;  %v849_v40 = vmul.f32 %v813_v18, %v769_v7  ;;  %v965_v32 = vsel %vm955_vm1, %v3789_v50, -inf }
 0x185   : > { %v3793_v8 = vadd.f32 %v846_v5, %v3467_v25  ;;  %957 = vmax.xlane.f32.xlu0 %v956_v28 }
 0x186   : > { %v811_v29 = vpop.permute.xlu0 %810  ;;  %v3799_v14 = vadd.f32 %v3473_v31, %v849_v40  ;;  %v765_v40 = vld [vmem:[%s3765_s11 + $0x38] sm:$0xff] }
 0x187   : > { %5914 = vst [vmem:[#allocation28_spill] sm:$0xff] %v3793_v8  ;;  %v848_v12 = vmul.f32 %v811_v29, %v768_v23  ;;  %v795_v15 = vpop.permute.xlu1 %794  ;;  %v980_v44 = vsel %vm955_vm1, %v3793_v8, -inf }
 0x188   : > { %5915 = vst [vmem:[#allocation29_spill] sm:$0xff] %v3799_v14  ;;  %v840_v27 = vmul.f32 %v795_v15, %v760_v11  ;;  %981 = vmax.xlane.f32.xlu1 %v980_v44  ;;  %v989_v47 = vsel %vm955_vm1, %v3799_v14, -inf  ;;  %v764_v15 = vld [vmem:[%s3765_s11 + $0x30] sm:$0xff] }
 0x189   : > { %v3805_v26 = vadd.f32 %v848_v12, %v3479_v37  ;;  %966 = vmax.xlane.f32.xlu0 %v965_v32 }
 0x18a   : > { %v799_v19 = vpop.permute.xlu0 %798  ;;  %v3811_v41 = vadd.f32 %v840_v27, %v3477_v36 }
 0x18b   : > { %5916 = vst [vmem:[#allocation30_spill] sm:$0xff] %v3805_v26  ;;  %v801_v10 = vpop.permute.xlu1 %800  ;;  %v842_v52 = vmul.f32 %v799_v19, %v762_v34  ;;  %v986_v45 = vsel %vm955_vm1, %v3805_v26, -inf  ;;  %v773_v34 = vld [vmem:[%s3765_s11 + $0x78] sm:$0xff] }
 0x18c   : > { %5917 = vst [vmem:[#allocation31_spill] sm:$0xff] %v3811_v41  ;;  %v843_v35 = vmul.f32 %v801_v10, %v763_v33  ;;  %987 = vmax.xlane.f32.xlu1 %v986_v45  ;;  %v962_v3 = vsel %vm955_vm1, %v3811_v41, -inf  ;;  %v772_v45 = vld [vmem:[%s3765_s11 + $0x70] sm:$0xff]  ;;  %s3223_s11 = scalar_lea.vmem %s5642_s26, 16 }
 0x18d   : > { %v3816_v56 = vadd.f32 %v842_v52, %v3489_v48  ;;  %990 = vmax.xlane.f32.xlu0 %v989_v47  ;;  %p3224_p12 = scmp.ne.s32.totalorder %s5642_s26, %s3223_s11 }
 0x18e   : > { %v3822_v0 = vadd.f32 %v3483_v42, %v843_v35  ;;  %v815_v7 = vpop.permute.xlu0 %814 }
 0x18f   : > { %5918 = vst [vmem:[#allocation32_spill] sm:$0xff] %v3816_v56  ;;  %v817_v61 = vpop.permute.xlu1 %816  ;;  %v968_v63 = vsel %vm955_vm1, %v3816_v56, -inf  ;;  %v850_v5 = vmul.f32 %v815_v7, %v770_v9  ;;  %v3012_v9 = vpop.eup %3011  ;;  %p3225_p13 = pnand %p3224_p12, %p3392_p5 }
 0x190   : > { %5919 = vst [vmem:[#allocation33_spill] sm:$0xff] %v3822_v0  ;;  %v851_v60 = vmul.f32 %v817_v61, %v771_v58  ;;  %969 = vmax.xlane.f32.xlu1 %v968_v63  ;;  %v971_v18 = vsel %vm955_vm1, %v3822_v0, -inf  ;;  %v3014_v7 = vpop.eup %3013 }
 0x191   : > { %963 = vmax.xlane.f32.xlu0 %v962_v3  ;;  %v3833_v28 = vadd.f32 %v850_v5, %v3491_v49  ;;  %v3016_v5 = vpop.eup %3015  ;;  %p3226_p0 = pneg %p3225_p13 }
 0x192   : > { %v3828_v13 = vadd.f32 %v3485_v43, %v851_v60  ;;  %v3018_v1 = vpop.eup %3017 }
 0x193   : > { %5921 = vst [vmem:[#allocation35_spill] sm:$0xff] %v3833_v28  ;;  %v805_v23 = vpop.permute.xlu1 %804  ;;  %v992_v11 = vsel %vm955_vm1, %v3833_v28, -inf  ;;  %v3020_v22 = vpop.eup %3019 }
 0x194   : > { %5920 = vst [vmem:[#allocation34_spill] sm:$0xff] %v3828_v13  ;;  %v995_v29 = vsel %vm955_vm1, %v3828_v13, -inf  ;;  %v845_v12 = vmul.f32 %v805_v23, %v765_v40  ;;  %993 = vmax.xlane.f32.xlu1 %v992_v11  ;;  %v3022_v17 = vpop.eup %3021 }
 0x195   : > { %972 = vmax.xlane.f32.xlu0 %v971_v18  ;;  %v3024_v4 = vpop.eup %3023 }
 0x196   : > { %v3842_v44 = vadd.f32 %v3495_v54, %v845_v12 }
 0x198   : > { %5922 = vst [vmem:[#allocation36_spill] sm:$0xff] %v3842_v44  ;;  %v977_v33 = vsel %vm955_vm1, %v3842_v44, -inf }
 0x199   : > { %996 = vmax.xlane.f32.xlu0 %v995_v29  ;;  %v803_v27 = vpop.permute.xlu0 %802 }
 0x19a   : > { %v844_v32 = vmul.f32 %v803_v27, %v764_v15 }
 0x19c   : > { %v3848_v19 = vadd.f32 %v844_v32, %v3500_v59  ;;  %v821_v10 = vpop.permute.xlu1 %820 }
 0x19d   : > { %978 = vmax.xlane.f32.xlu0 %v977_v33  ;;  %v853_v52 = vmul.f32 %v821_v10, %v773_v34  ;;  %v819_v58 = vpop.permute.xlu0 %818 }
 0x19e   : > { %5923 = vst [vmem:[#allocation37_spill] sm:$0xff] %v3848_v19  ;;  %v974_v35 = vsel %vm955_vm1, %v3848_v19, -inf  ;;  %v852_v61 = vmul.f32 %v819_v58, %v772_v45 }
 0x19f   : > { %v3854_v47 = vadd.f32 %v3497_v55, %v853_v52  ;;  %975 = vmax.xlane.f32.xlu1 %v974_v35 }
 0x1a0   : > { %v3859_v60 = vadd.f32 %v852_v61, %v3503_v62  ;;  %v3881_v18 = vpop.permute.xlu1 %1438 }
 0x1a1   : > { %5924 = vst [vmem:[#allocation38_spill] sm:$0xff] %v3854_v47  ;;  %v1001_v63 = vsel %vm955_vm1, %v3854_v47, -inf  ;;  %v3877_v2 = vpop.permute.xlu0 %1436  ;;  %5928 = vst [vmem:[#allocation42_spill] sm:$0xff] %v3881_v18 }
 0x1a2   : > { %5925 = vst [vmem:[#allocation39_spill] sm:$0xff] %v3859_v60  ;;  %1002 = vmax.xlane.f32.xlu0 %v1001_v63  ;;  %v998_v3 = vsel %vm955_vm1, %v3859_v60, -inf  ;;  %5926 = vst [vmem:[#allocation40_spill] sm:$0xff] %v3877_v2 }
 0x1a3   : > { %999 = vmax.xlane.f32.xlu1 %v998_v3 }
 0x1a4   : > { %v3885_v53 = vpop.permute.xlu1 %1442 }
 0x1a5   : > { %v3879_v39 = vpop.permute.xlu0 %1440  ;;  %5930 = vst [vmem:[#allocation44_spill] sm:$0xff] %v3885_v53 }
 0x1a6   : > { %5927 = vst [vmem:[#allocation41_spill] sm:$0xff] %v3879_v39 }
 0x1a9   : > { %v3883_v40 = vpop.permute.xlu0 %1446 }
 0x1aa   : > { %5929 = vst [vmem:[#allocation43_spill] sm:$0xff] %v3883_v40 }
 0x1ad   : > { %v3887_v23 = vpop.permute.xlu0 %1444 }
 0x1ae   : > { %5931 = vst [vmem:[#allocation45_spill] sm:$0xff] %v3887_v23 }
 0x1b4   : > { %1448 = vrot.lane.b32.xlu1 %v3012_v9, %s3315_s29 }
 0x1b8   : > { %1450 = vrot.lane.b32.xlu0 %v3014_v7, %s3315_s29 }
 0x1bc   : > { %1452 = vrot.lane.b32.xlu0 %v3016_v5, %s3315_s29 }
 0x1c0   : > { %1454 = vrot.lane.b32.xlu0 %v3018_v1, %s3315_s29 }
 0x1c4   : > { %1456 = vrot.lane.b32.xlu0 %v3020_v22, %s3315_s29 }
 0x1c8   : > { %1458 = vrot.lane.b32.xlu0 %v3022_v17, %s3315_s29 }
 0x1cc   : > { %1460 = vrot.lane.b32.xlu0 %v3024_v4, %s3315_s29 }
 0x209   : > { %v3889_v11 = vpop.xlane.xlu1 %960 }
 0x20a   : > { %vm1005_vm2 = vcmp.ge.f32.partialorder %v3771_v51, %v3889_v11  ;;  %v3893_v29 = vpop.xlane.xlu0 %984 }
 0x20b   : > { %vm1013_vm3 = vcmp.ge.f32.partialorder %v3775_v57, %v3893_v29  ;;  %v3898_v12 = vsel %vm1005_vm2, -1e+30, %v3771_v51 }
 0x20c   : > { %v1039_v15 = vsel %vm955_vm1, %v3898_v12, -inf  ;;  %v3903_v27 = vsel %vm1013_vm3, -1e+30, %v3775_v57 }
 0x20d   : > { %1040 = vmax.xlane.f32.xlu0 %v1039_v15  ;;  %v1063_v34 = vsel %vm955_vm1, %v3903_v27, -inf }
 0x20e   : > { %v3905_v32 = vpop.xlane.xlu0 %957 }
 0x20f   : > { %vm1004_vm4 = vcmp.ge.f32.partialorder %v3783_v46, %v3905_v32 }
 0x210   : > { %v3912_v33 = vsel %vm1004_vm4, -1e+30, %v3783_v46 }
 0x211   : > { %v3914_v10 = vpop.xlane.xlu1 %981  ;;  %1064 = vmax.xlane.f32.xlu0 %v1063_v34  ;;  %v1036_v52 = vsel %vm955_vm1, %v3912_v33, -inf }
 0x212   : > { %vm1012_vm5 = vcmp.ge.f32.partialorder %v3793_v8, %v3914_v10  ;;  %v3920_v45 = vpop.xlane.xlu0 %966  ;;  %1037 = vmax.xlane.f32.xlu1 %v1036_v52 }
 0x213   : > { %vm1007_vm6 = vcmp.ge.f32.partialorder %v3789_v50, %v3920_v45  ;;  %v3925_v35 = vsel %vm1012_vm5, -1e+30, %v3793_v8 }
 0x214   : > { %v3928_v58 = vsel %vm1007_vm6, -1e+30, %v3789_v50  ;;  %v1060_v61 = vsel %vm955_vm1, %v3925_v35, -inf }
 0x215   : > { %v1045_v63 = vsel %vm955_vm1, %v3928_v58, -inf  ;;  %v3934_v3 = vpop.xlane.xlu1 %987 }
 0x216   : > { %1046 = vmax.xlane.f32.xlu0 %v1045_v63  ;;  %v3936_v9 = vpop.xlane.xlu0 %990  ;;  %1061 = vmax.xlane.f32.xlu1 %v1060_v61  ;;  %vm1014_vm8 = vcmp.ge.f32.partialorder %v3805_v26, %v3934_v3 }
 0x217   : > { %vm1015_vm7 = vcmp.ge.f32.partialorder %v3799_v14, %v3936_v9  ;;  %v3961_v34 = vsel %vm1014_vm8, -1e+30, %v3805_v26 }
 0x218   : > { %v3941_v7 = vsel %vm1015_vm7, -1e+30, %v3799_v14  ;;  %v1066_v63 = vsel %vm955_vm1, %v3961_v34, -inf }
 0x219   : > { %v1069_v5 = vsel %vm955_vm1, %v3941_v7, -inf  ;;  %v3951_v22 = vpop.xlane.xlu1 %969 }
 0x21a   : > { %1070 = vmax.xlane.f32.xlu0 %v1069_v5  ;;  %v3945_v1 = vpop.xlane.xlu0 %963  ;;  %vm1008_vm10 = vcmp.ge.f32.partialorder %v3816_v56, %v3951_v22 }
 0x21b   : > { %vm1006_vm9 = vcmp.ge.f32.partialorder %v3811_v41, %v3945_v1  ;;  %v3979_v55 = vsel %vm1008_vm10, -1e+30, %v3816_v56 }
 0x21c   : > { %v3954_v17 = vsel %vm1006_vm9, -1e+30, %v3811_v41 }
 0x21d   : > { %v1042_v4 = vsel %vm955_vm1, %v3954_v17, -inf  ;;  %v3974_v5 = vpop.xlane.xlu1 %993 }
 0x21e   : > { %v3958_v15 = vpop.xlane.xlu0 %972  ;;  %1043 = vmax.xlane.f32.xlu1 %v1042_v4  ;;  %vm1016_vm12 = vcmp.ge.f32.partialorder %v3833_v28, %v3974_v5 }
 0x21f   : > { %vm1009_vm11 = vcmp.ge.f32.partialorder %v3822_v0, %v3958_v15 }
 0x220   : > { %v3968_v52 = vsel %vm1009_vm11, -1e+30, %v3822_v0 }
 0x221   : > { %v1051_v61 = vsel %vm955_vm1, %v3968_v52, -inf }
 0x222   : > { %1052 = vmax.xlane.f32.xlu0 %v1051_v61  ;;  %v3976_v4 = vpop.xlane.xlu0 %996  ;;  %1067 = vmax.xlane.f32.xlu1 %v1066_v63  ;;  %v1048_v61 = vsel %vm955_vm1, %v3979_v55, -inf  ;;  %v3993_v63 = vsel %vm1016_vm12, -1e+30, %v3833_v28 }
 0x223   : > { %vm1017_vm13 = vcmp.ge.f32.partialorder %v3828_v13, %v3976_v4  ;;  %5933 = vst [vmem:[#allocation47_spill] sm:$0xff] %v3993_v63  ;;  %v1072_v23 = vsel %vm955_vm1, %v3993_v63, -inf }
 0x224   : > { %v3986_v62 = vsel %vm1017_vm13, -1e+30, %v3828_v13 }
 0x225   : > { %5932 = vst [vmem:[#allocation46_spill] sm:$0xff] %v3986_v62  ;;  %v1075_v43 = vsel %vm955_vm1, %v3986_v62, -inf  ;;  %v1180_v62 = vsub.f32 %v3783_v46, %v3905_v32  ;;  %v1183_v32 = vsub.f32 %v3789_v50, %v3920_v45 }
 0x226   : > { %1076 = vmax.xlane.f32.xlu0 %v1075_v43  ;;  %1049 = vmax.xlane.f32.xlu1 %v1048_v61  ;;  %v3995_v59 = vpop.xlane.xlu0 %978 }
 0x227   : > { %vm1011_vm14 = vcmp.ge.f32.partialorder %v3842_v44, %v3995_v59 }
 0x228   : > { %v4000_v54 = vsel %vm1011_vm14, -1e+30, %v3842_v44  ;;  %v4006_v43 = vpop.xlane.xlu1 %975 }
 0x229   : > { %5934 = vst [vmem:[#allocation48_spill] sm:$0xff] %v4000_v54  ;;  %v1057_v49 = vsel %vm955_vm1, %v4000_v54, -inf  ;;  %vm1010_vm15 = vcmp.ge.f32.partialorder %v3848_v19, %v4006_v43 }
 0x22a   : > { %1073 = vmax.xlane.f32.xlu1 %v1072_v23  ;;  %1058 = vmax.xlane.f32.xlu0 %v1057_v49  ;;  %v4011_v61 = vsel %vm1010_vm15, -1e+30, %v3848_v19 }
 0x22b   : > { %5935 = vst [vmem:[#allocation49_spill] sm:$0xff] %v4011_v61  ;;  %v4013_v48 = vpop.xlane.xlu0 %1002  ;;  %v1054_v37 = vsel %vm955_vm1, %v4011_v61, -inf }
 0x22c   : > { %vm1019_vm0 = vcmp.ge.f32.partialorder %v3854_v47, %v4013_v48  ;;  %v4022_v40 = vpop.xlane.xlu1 %999 }
 0x22d   : > { %v4020_v23 = vsel %vm1019_vm0, -1e+30, %v3854_v47  ;;  %vm1018_vm2 = vcmp.ge.f32.partialorder %v3859_v60, %v4022_v40 }
 0x22e   : > { %1055 = vmax.xlane.f32.xlu1 %v1054_v37  ;;  %5936 = vst [vmem:[#allocation50_spill] sm:$0xff] %v4020_v23  ;;  %v1081_v49 = vsel %vm955_vm1, %v4020_v23, -inf  ;;  %v4029_v39 = vsel %vm1018_vm2, -1e+30, %v3859_v60  ;;  %v1181_v23 = vsub.f32 %v3771_v51, %v3889_v11 }
 0x22f   : > { %1082 = vmax.xlane.f32.xlu0 %v1081_v49  ;;  %5937 = vst [vmem:[#allocation51_spill] sm:$0xff] %v4029_v39  ;;  %v1078_v42 = vsel %vm955_vm1, %v4029_v39, -inf  ;;  %v4033_v37 = vpop.permute.xlu0 %1450 }
 0x230   : > { %5938 = vst [vmem:[#allocation52_spill] sm:$0xff] %v4033_v37  ;;  %v1198_v31 = vmul.f32 1.442695, %v1181_v23 }
 0x232   : > { %1079 = vmax.xlane.f32.xlu1 %v1078_v42  ;;  %3025 = vpow2.f32 %v1198_v31  ;;  %v1189_v42 = vsub.f32 %v3775_v57, %v3893_v29  ;;  %v1188_v31 = vsub.f32 %v3793_v8, %v3914_v10 }
 0x233   : > { %v4035_v36 = vpop.permute.xlu0 %1452  ;;  %3027 = vrcp.f32 %v3705_v38  ;;  %v1184_v38 = vsub.f32 %v3816_v56, %v3951_v22 }
 0x234   : > { %5939 = vst [vmem:[#allocation53_spill] sm:$0xff] %v4035_v36  ;;  %v4053_v36 = vpop.permute.xlu1 %1448  ;;  %3029 = vrcp.f32 %v3744_v16  ;;  %v1212_v45 = vmul.f32 1.442695, %v1188_v31  ;;  %v1182_v16 = vsub.f32 %v3811_v41, %v3945_v1  ;;  %v1185_v31 = vsub.f32 %v3822_v0, %v3958_v15 }
 0x235   : > { %5944 = vst [vmem:[#allocation58_spill] sm:$0xff] %v4053_v36  ;;  %v1214_v36 = vmul.f32 1.442695, %v1189_v42  ;;  %3031 = vrcp.f32 %v3750_v6  ;;  %v1204_v6 = vmul.f32 1.442695, %v1184_v38  ;;  %v1193_v1 = vsub.f32 %v3828_v13, %v3976_v4 }
 0x236   : > { %v1206_v15 = vmul.f32 1.442695, %v1185_v31  ;;  %v1186_v4 = vsub.f32 %v3848_v19, %v4006_v43 }
 0x237   : > { %v4037_v61 = vpop.permute.xlu0 %1454  ;;  %3033 = vpow2.f32 %v1214_v36  ;;  %v1200_v36 = vmul.f32 1.442695, %v1182_v16  ;;  %v4118_v16 = vstv %s2792_s12  ;;  %s3317_s12 = smov [#allocation4]  }
 0x238   : > { %5940 = vst [vmem:[#allocation54_spill] sm:$0xff] %v4037_v61  ;;  %s3227_s14 = sshll.u32 %s3317_s12, 4  ;;  %s3228_s14 = int_to_ptr.vmem [resolvable:$false] %s3227_s14 }
 0x239   : > { %s3229_s15 = scalar_lea.vmem %s3228_s14, 32  ;;  %p3230_p1 = scmp.lt.s32.totalorder %s5642_s26, %s3228_s14 }
 0x23a   : > { %p3231_p2 = scmp.lt.s32.totalorder %s3229_s15, %s3223_s11 }
 0x23b   : > { %v4041_v54 = vpop.permute.xlu0 %1456 }
 0x23c   : > { %5941 = vst [vmem:[#allocation55_spill] sm:$0xff] %v4041_v54  ;;  %p3232_p3 = por %p3231_p2, %p3230_p1 }
 0x23e   : > { %p3233_p4 = pnand %p3232_p3, %p3226_p0 }
 0x23f   : > { %v4043_v49 = vpop.permute.xlu0 %1458  ;;  %v3026_v37 = vpop.eup %3025 }
 0x240   : > { %5942 = vst [vmem:[#allocation56_spill] sm:$0xff] %v4043_v49  ;;  %v4112_v38 = vpop.eup %3027 }
 0x241   : > { %5946 = vst [vmem:[#allocation60_spill] sm:$0xff] %v4112_v38 }
 0x243   : > { %v4045_v63 = vpop.permute.xlu0 %1460 }
 0x244   : > { %5943 = vst [vmem:[#allocation57_spill] sm:$0xff] %v4045_v63  ;;  %v1190_v63 = vsub.f32 %v3805_v26, %v3934_v3 }
 0x246   : > { %v1216_v42 = vmul.f32 1.442695, %v1190_v63 }
 0x296   : > { %v4049_v39 = vpop.xlane.xlu0 %1040 }
 0x297   : > { %vm1085_vm3 = vcmp.ge.f32.partialorder %v3898_v12, %v4049_v39  ;;  %vm1165_vm4 = vcmp.ge.f32.partialorder %v3771_v51, %v4049_v39 }
 0x298   : > { %v1101_v11 = vsel %vm1085_vm3, -1e+30, %v3898_v12  ;;  %v4065_v29 = vsel %vm1165_vm4, %v3026_v37, 0.0  ;;  %v1196_v12 = vmul.f32 1.442695, %v1180_v62  ;;  %v1191_v37 = vsub.f32 %v3799_v14, %v3936_v9 }
 0x299   : > { %5945 = vst [vmem:[#allocation59_spill] sm:$0xff] %v4065_v29  ;;  %v1119_v23 = vsel %vm955_vm1, %v1101_v11, -inf  ;;  %v1202_v62 = vmul.f32 1.442695, %v1183_v32  ;;  %v1192_v11 = vsub.f32 %v3833_v28, %v3974_v5  ;;  %v1187_v5 = vsub.f32 %v3842_v44, %v3995_v59 }
 0x29a   : > { %1120 = vmax.xlane.f32.xlu0 %v1119_v23  ;;  %v4073_v10 = vpop.xlane.xlu0 %1064  ;;  %3035 = vpow2.f32 %v1196_v12  ;;  %v1222_v12 = vmul.f32 1.442695, %v1193_v1 }
 0x29b   : > { %v4078_v29 = vpop.xlane.xlu1 %1037  ;;  %vm1093_vm5 = vcmp.ge.f32.partialorder %v3903_v27, %v4073_v10  ;;  %3037 = vpow2.f32 %v1212_v45  ;;  %v1220_v23 = vmul.f32 1.442695, %v1192_v11  ;;  %v1210_v59 = vmul.f32 1.442695, %v1187_v5 }
 0x29c   : > { %v1109_v3 = vsel %vm1093_vm5, -1e+30, %v3903_v27  ;;  %vm1084_vm6 = vcmp.ge.f32.partialorder %v3912_v33, %v4078_v29  ;;  %v1218_v27 = vmul.f32 1.442695, %v1191_v37  ;;  %3039 = vpow2.f32 %v1202_v62 }
 0x29d   : > { %v1143_v9 = vsel %vm955_vm1, %v1109_v3, -inf  ;;  %v1100_v22 = vsel %vm1084_vm6, -1e+30, %v3912_v33  ;;  %3041 = vpow2.f32 %v1216_v42  ;;  %v871_v33 = vlaneseq  ;;  %v4114_v3 = vpop.eup %3029 }
 0x29e   : > { %1144 = vmax.xlane.f32.xlu1 %v1143_v9  ;;  %v1116_v63 = vsel %vm955_vm1, %v1100_v22, -inf  ;;  %3043 = vpow2.f32 %v1218_v27  ;;  %v1195_v37 = vsub.f32 %v3854_v47, %v4013_v48  ;;  %5947 = vst [vmem:[#allocation61_spill] sm:$0xff] %v4114_v3  ;;  %v1208_v62 = vmul.f32 1.442695, %v1186_v4  ;;  %v4125_v22 = vpop.eup %3031 }
 0x29f   : > { %v4099_v32 = vpop.xlane.xlu0 %1046  ;;  %3045 = vpow2.f32 %v1204_v6  ;;  %v4110_v45 = vshrl.u32 %v871_v33, 7  ;;  %v4120_v9 = vpop.xlane.xlu1 %1061  ;;  %5948 = vst [vmem:[#allocation62_spill] sm:$0xff] %v4125_v22  ;;  %v5757_v47 = vmov 0.0   ;;  %v1925_v38 = vsub.f32 %v3461_v21, %v4073_v10 }
 0x2a0   : > { %3047 = vpow2.f32 %v1200_v36  ;;  %vm1087_vm7 = vcmp.ge.f32.partialorder %v3928_v58, %v4099_v32  ;;  %v1226_v48 = vmul.f32 1.442695, %v1195_v37  ;;  %v4131_v36 = vpop.eup %3033  ;;  %vm1092_vm9 = vcmp.ge.f32.partialorder %v3925_v35, %v4120_v9 }
 0x2a1   : > { %3049 = vpow2.f32 %v1206_v15  ;;  %v1103_v42 = vsel %vm1087_vm7, -1e+30, %v3928_v58  ;;  %v889_v31 = vadd.s32 %v4118_v16, %v4110_v45  ;;  %v885_v11 = vadd.s32 104, %v4110_v45 }
 0x2a2   : > { %1117 = vmax.xlane.f32.xlu1 %v1116_v63  ;;  %3051 = vpow2.f32 %v1220_v23  ;;  %v1125_v27 = vsel %vm955_vm1, %v1103_v42, -inf  ;;  %v876_v6 = vadd.s32 32, %v4110_v45  ;;  %v873_v1 = vadd.s32 8, %v4110_v45 }
 0x2a3   : > { %3053 = vpow2.f32 %v1222_v12  ;;  %v4116_v43 = vpop.xlane.xlu0 %1070  ;;  %1126 = vmax.xlane.f32.xlu0 %v1125_v27  ;;  %v4135_v58 = vand.u32 127, %v871_v33  ;;  %v887_v63 = vadd.s32 120, %v4110_v45  ;;  %v1194_v23 = vsub.f32 %v3859_v60, %v4022_v40 }
 0x2a4   : > { %3055 = vpow2.f32 %v1210_v59  ;;  %vm1095_vm8 = vcmp.ge.f32.partialorder %v3941_v7, %v4116_v43  ;;  %v1917_v33 = vsub.f32 %v3459_v20, %v4049_v39  ;;  %vm905_vm10 = vcmp.lt.s32.totalorder %v889_v31, 256 }
 0x2a5   : > { %3057 = vpow2.f32 %v1208_v62  ;;  %v1111_v5 = vsel %vm1095_vm8, -1e+30, %v3941_v7  ;;  %v1108_v40 = vsel %vm1092_vm9, -1e+30, %v3925_v35  ;;  %v902_v7 = vadd.s32 %v4118_v16, %v885_v11 }
 0x2a6   : > { %3059 = vpow2.f32 %v1226_v48  ;;  %v1149_v12 = vsel %vm955_vm1, %v1111_v5, -inf  ;;  %v893_v62 = vadd.s32 %v4118_v16, %v876_v6  ;;  %v890_v42 = vadd.s32 %v4118_v16, %v873_v1 }
 0x2a7   : > { %v4138_v15 = vpop.eup %3035  ;;  %v4150_v37 = vpop.xlane.xlu1 %1043  ;;  %1150 = vmax.xlane.f32.xlu0 %v1149_v12  ;;  %v1140_v48 = vsel %vm955_vm1, %v1108_v40, -inf  ;;  %v904_v5 = vadd.s32 %v4118_v16, %v887_v63  ;;  %v875_v20 = vadd.s32 24, %v4110_v45  ;;  %v880_v3 = vadd.s32 64, %v4110_v45 }
 0x2a8   : > { %v4145_v4 = vpop.eup %3037  ;;  %1141 = vmax.xlane.f32.xlu1 %v1140_v48  ;;  %vm1086_vm11 = vcmp.ge.f32.partialorder %v3954_v17, %v4150_v37  ;;  %v874_v35 = vadd.s32 16, %v4110_v45  ;;  %v877_v11 = vadd.s32 40, %v4110_v45  ;;  %v881_v6 = vadd.s32 72, %v4110_v45 }
 0x2a9   : > { %v4152_v59 = vpop.eup %3039  ;;  %v1224_v12 = vmul.f32 1.442695, %v1194_v23  ;;  %v1933_v63 = vmul.f32 %v1917_v33, %v3881_v18  ;;  %v1102_v40 = vsel %vm1086_vm11, -1e+30, %v3954_v17  ;;  %v4177_v48 = vsel %vm905_vm10, 1.0, %v5757_v47 }
 0x2aa   : > { %v4158_v27 = vpop.eup %3041  ;;  %5952 = vst [vmem:[#allocation66_spill] sm:$0xff] %v4177_v48  ;;  %v1122_v54 = vsel %vm955_vm1, %v1102_v40, -inf  ;;  %vm918_vm12 = vcmp.lt.s32.totalorder %v902_v7, 256  ;;  %vm909_vm13 = vcmp.lt.s32.totalorder %v893_v62, 256  ;;  %vm920_vm14 = vcmp.lt.s32.totalorder %v904_v5, 256 }
 0x2ab   : > { %5949 = vst [vmem:[#allocation63_spill] sm:$0xff] %v4158_v27  ;;  %v4164_v60 = vpop.eup %3043  ;;  %vm906_vm15 = vcmp.lt.s32.totalorder %v890_v42, 256  ;;  %v892_v17 = vadd.s32 %v4118_v16, %v875_v20  ;;  %v897_v23 = vadd.s32 %v4118_v16, %v880_v3  ;;  %v1916_v33 = vsub.f32 %v3465_v24, %v4078_v29  ;;  %v4224_v24 = vpop.xlane.xlu0 %1052 }
 0x2ac   : > { %5950 = vst [vmem:[#allocation64_spill] sm:$0xff] %v4164_v60  ;;  %v4171_v1 = vpop.eup %3045  ;;  %1123 = vmax.xlane.f32.xlu1 %v1122_v54  ;;  %v891_v47 = vadd.s32 %v4118_v16, %v874_v35  ;;  %v894_v40 = vadd.s32 %v4118_v16, %v877_v11  ;;  %v898_v21 = vadd.s32 %v4118_v16, %v881_v6  ;;  %3061 = vpow2.f32 %v1224_v12  ;;  %v4202_v60 = vpop.xlane.xlu1 %1067 }
 0x2ad   : > { %5951 = vst [vmem:[#allocation65_spill] sm:$0xff] %v4171_v1  ;;  %v4179_v22 = vpop.eup %3047  ;;  %v4197_v28 = vmul.f32 0.70710677, %v1933_v63  ;;  %v879_v20 = vadd.s32 56, %v4110_v45  ;;  %v883_v3 = vadd.s32 88, %v4110_v45  ;;  %v5956_v54 = vmov 0.0  }
 0x2ae   : > { %v4184_v1 = vpop.eup %3049  ;;  %v4206_v35 = vsel %vm918_vm12, 1.0, %v5956_v54  ;;  %v4210_v11 = vsel %vm909_vm13, 1.0, %v5956_v54  ;;  %v882_v6 = vadd.s32 80, %v4110_v45  ;;  %v4215_v12 = vsel %vm920_vm14, 1.0, %v5956_v54 }
 0x2af   : > { %v4188_v31 = vpop.eup %3051  ;;  %5955 = vst [vmem:[#allocation69_spill] sm:$0xff] %v4197_v28  ;;  %5957 = vst [vmem:[#allocation70_spill] sm:$0xff] %v4206_v35  ;;  %v4219_v63 = vsel %vm906_vm15, 1.0, %v5956_v54  ;;  %vm908_vm0 = vcmp.lt.s32.totalorder %v892_v17, 256  ;;  %vm913_vm2 = vcmp.lt.s32.totalorder %v897_v23, 256  ;;  %v1932_v7 = vmul.f32 %v1916_v33, %v3877_v2 }
 0x2b0   : > { %5953 = vst [vmem:[#allocation67_spill] sm:$0xff] %v4188_v31  ;;  %v4195_v18 = vpop.eup %3053  ;;  %v1941_v31 = vmul.f32 %v1925_v38, %v4037_v61  ;;  %5958 = vst [vmem:[#allocation71_spill] sm:$0xff] %v4210_v11  ;;  %vm907_vm3 = vcmp.lt.s32.totalorder %v891_v47, 256  ;;  %vm910_vm5 = vcmp.lt.s32.totalorder %v894_v40, 256  ;;  %vm914_vm6 = vcmp.lt.s32.totalorder %v898_v21, 256  ;;  %v4271_v47 = vpop.xlane.xlu0 %1076 }
 0x2b1   : > { %5954 = vst [vmem:[#allocation68_spill] sm:$0xff] %v4195_v18  ;;  %5959 = vst [vmem:[#allocation72_spill] sm:$0xff] %v4215_v12  ;;  %v4221_v38 = vpop.eup %3055  ;;  %v1965_v5 = vand.u32 2147483647, %v4197_v28  ;;  %vm1094_vm7 = vcmp.ge.f32.partialorder %v3961_v34, %v4202_v60  ;;  %v896_v42 = vadd.s32 %v4118_v16, %v879_v20  ;;  %v900_v61 = vadd.s32 %v4118_v16, %v883_v3 }
 0x2b2   : > { %5960 = vst [vmem:[#allocation73_spill] sm:$0xff] %v4219_v63  ;;  %v4226_v62 = vpop.eup %3057  ;;  %v4235_v18 = vmul.f32 0.70710677, %v1941_v31  ;;  %v1110_v33 = vsel %vm1094_vm7, -1e+30, %v3961_v34  ;;  %v899_v2 = vadd.s32 %v4118_v16, %v882_v6  ;;  %v884_v35 = vadd.s32 96, %v4110_v45  ;;  %v4252_v34 = vpop.xlane.xlu1 %1049 }
 0x2b3   : > { %v4233_v12 = vpop.eup %3059  ;;  %v1146_v14 = vsel %vm955_vm1, %v1110_v33, -inf  ;;  %v4243_v28 = vsel %vm908_vm0, 1.0, %v5956_v54  ;;  %v4247_v20 = vsel %vm913_vm2, 1.0, %v5956_v54  ;;  %v878_v3 = vadd.s32 48, %v4110_v45  ;;  %5969 = vst [vmem:[#allocation82_spill] sm:$0xff] %v4271_v47 }
 0x2b4   : > { %5961 = vst [vmem:[#allocation74_spill] sm:$0xff] %v4233_v12  ;;  %5962 = vst [vmem:[#allocation75_spill] sm:$0xff] %v4235_v18  ;;  %v4250_v31 = vmul.f32 0.70710677, %v1932_v7  ;;  %1147 = vmax.xlane.f32.xlu0 %v1146_v14  ;;  %v4256_v6 = vsel %vm907_vm3, 1.0, %v5956_v54  ;;  %v4260_v17 = vsel %vm910_vm5, 1.0, %v5956_v54  ;;  %v1919_v7 = vsub.f32 %v3471_v30, %v4099_v32 }
 0x2b5   : > { %5963 = vst [vmem:[#allocation76_spill] sm:$0xff] %v4243_v28  ;;  %5964 = vst [vmem:[#allocation77_spill] sm:$0xff] %v4247_v20  ;;  %v4264_v23 = vsel %vm914_vm6, 1.0, %v5956_v54  ;;  %v2189_v33 = vsub.f32 0.0, %v1965_v5  ;;  %vm1089_vm8 = vcmp.ge.f32.partialorder %v3968_v52, %v4224_v24  ;;  %vm916_vm9 = vcmp.lt.s32.totalorder %v900_v61, 256 }
 0x2b6   : > { %5965 = vst [vmem:[#allocation78_spill] sm:$0xff] %v4250_v31  ;;  %5966 = vst [vmem:[#allocation79_spill] sm:$0xff] %v4256_v6  ;;  %v1973_v14 = vand.u32 2147483647, %v4235_v18  ;;  %vm912_vm10 = vcmp.lt.s32.totalorder %v896_v42, 256  ;;  %vm915_vm11 = vcmp.lt.s32.totalorder %v899_v2, 256  ;;  %v901_v40 = vadd.s32 %v4118_v16, %v884_v35 }
 0x2b7   : > { %5967 = vst [vmem:[#allocation80_spill] sm:$0xff] %v4260_v17  ;;  %5968 = vst [vmem:[#allocation81_spill] sm:$0xff] %v4264_v23  ;;  %v1924_v21 = vsub.f32 %v3467_v25, %v4120_v9  ;;  %v1105_v12 = vsel %vm1089_vm8, -1e+30, %v3968_v52  ;;  %vm1088_vm12 = vcmp.ge.f32.partialorder %v3979_v55, %v4252_v34  ;;  %v895_v30 = vadd.s32 %v4118_v16, %v878_v3 }
 0x2b8   : > { %v1981_v23 = vmul.f32 0.3275911, %v1965_v5  ;;  %v1964_v61 = vand.u32 2147483647, %v4250_v31  ;;  %v1131_v18 = vsel %vm955_vm1, %v1105_v12, -inf  ;;  %v4283_v42 = vsel %vm916_vm9, 1.0, %v5956_v54 }
 0x2b9   : > { %5970 = vst [vmem:[#allocation83_spill] sm:$0xff] %v4283_v42  ;;  %v2205_v13 = vmul.f32 %v2189_v33, %v1965_v5  ;;  %v1935_v35 = vmul.f32 %v1919_v7, %v3885_v53  ;;  %1132 = vmax.xlane.f32.xlu0 %v1131_v18  ;;  %v1104_v25 = vsel %vm1088_vm12, -1e+30, %v3979_v55  ;;  %v4288_v52 = vsel %vm912_vm10, 1.0, %v5956_v54  ;;  %v4290_v27 = vpop.eup %3061  ;;  %v5974_v5 = vld [vmem:[#allocation53_spill] sm:$0xff] }
 0x2ba   : > { %5971 = vst [vmem:[#allocation84_spill] sm:$0xff] %v4288_v52  ;;  %5972 = vst [vmem:[#allocation85_spill] sm:$0xff] %v4290_v27  ;;  %v2197_v3 = vsub.f32 0.0, %v1973_v14  ;;  %v4294_v31 = vsel %vm915_vm11, 1.0, %v5956_v54  ;;  %vm917_vm13 = vcmp.lt.s32.totalorder %v901_v40, 256  ;;  %v886_v12 = vadd.s32 112, %v4110_v45  ;;  %v4300_v27 = vpop.xlane.xlu0 %1058 }
 0x2bb   : > { %5973 = vst [vmem:[#allocation86_spill] sm:$0xff] %v4294_v31  ;;  %v1989_v42 = vmul.f32 0.3275911, %v1973_v14  ;;  %v1940_v33 = vmul.f32 %v1924_v21, %v5974_v5  ;;  %v1128_v18 = vsel %vm955_vm1, %v1104_v25, -inf  ;;  %vm911_vm14 = vcmp.lt.s32.totalorder %v895_v30, 256  ;;  %v4308_v21 = vpop.xlane.xlu1 %1073  ;;  %v5975_v25 = vld [vmem:[#allocation46_spill] sm:$0xff] }
 0x2bc   : > { %v1997_v55 = vadd.f32 1.0, %v1981_v23  ;;  %v1980_v7 = vmul.f32 0.3275911, %v1964_v61  ;;  %v2188_v53 = vsub.f32 0.0, %v1964_v61  ;;  %vm2473_vm15 = vcmp.ne.s32.totalorder %v4135_v58, 0  ;;  %1129 = vmax.xlane.f32.xlu1 %v1128_v18 }
 0x2bd   : > { %v2810_v2 = vsel %vm1165_vm4, 1.0, %v5956_v54  ;;  %v2222_v45 = vmul.f32 1.442695, %v2205_v13  ;;  %v4306_v31 = vmul.f32 0.70710677, %v1935_v35  ;;  %vm1097_vm0 = vcmp.ge.f32.partialorder %v5975_v25, %v4271_v47 }
 0x2be   : > { %vm1164_vm2 = vcmp.ge.f32.partialorder %v3783_v46, %v4078_v29  ;;  %v2213_v30 = vmul.f32 %v2197_v3, %v1973_v14  ;;  %v4315_v23 = vsel %vm911_vm14, 1.0, %v5956_v54  ;;  %v4319_v18 = vsel %vm917_vm13, 1.0, %v5956_v54 }
 0x2bf   : > { %5976 = vst [vmem:[#allocation46_spill] sm:$0xff] %v4315_v23  ;;  %5977 = vst [vmem:[#allocation87_spill] sm:$0xff] %v4319_v18  ;;  %v4322_v13 = vadd.s32 %v4118_v16, %v886_v12  ;;  %v2005_v39 = vadd.f32 1.0, %v1989_v42  ;;  %v4324_v35 = vmul.f32 0.70710677, %v1940_v33  ;;  %v2507_v5 = vmul.f32 %v2810_v2, %v4219_v63  ;;  %v4350_v29 = vpop.xlane.xlu1 %1055  ;;  %v5983_v2 = vld [vmem:[#allocation13_spill] sm:$0xff] }
 0x2c0   : > { %v1113_v51 = vsel %vm1097_vm0, -1e+30, %v5975_v25  ;;  %3063 = vrcp.f32 %v1997_v55  ;;  %v1996_v47 = vadd.f32 1.0, %v1980_v7  ;;  %v2204_v14 = vmul.f32 %v2188_v53, %v1964_v61  ;;  %v4342_v53 = vpop.xlane.xlu0 %1082  ;;  %v5982_v61 = vld [vmem:[#allocation48_spill] sm:$0xff] }
 0x2c1   : > { %5978 = vst [vmem:[#allocation88_spill] sm:$0xff] %v4324_v35  ;;  %v4332_v40 = vsel %vm1164_vm2, %v4138_v15, 0.0  ;;  %3065 = vpow2.f32 %v2222_v45  ;;  %v1967_v16 = vand.u32 2147483647, %v4306_v31  ;;  %v1155_v42 = vsel %vm955_vm1, %v1113_v51, -inf  ;;  %5980 = vst [vmem:[#allocation90_spill] sm:$0xff] %v4342_v53 }
 0x2c2   : > { %5979 = vst [vmem:[#allocation89_spill] sm:$0xff] %v4332_v40  ;;  %v2809_v3 = vsel %vm1164_vm2, 1.0, %v5956_v54  ;;  %v2238_v12 = vmul.f32 1.442695, %v2213_v30  ;;  %vm1168_vm4 = vcmp.ge.f32.partialorder %v3816_v56, %v4252_v34  ;;  %1156 = vmax.xlane.f32.xlu0 %v1155_v42  ;;  %v5981_v15 = vld [vmem:[#allocation47_spill] sm:$0xff]  ;;  %vm1091_vm5 = vcmp.ge.f32.partialorder %v5982_v61, %v4300_v27  ;;  %v6025_v56 = vld [vmem:[#allocation68_spill] sm:$0xff] }
 0x2c3   : > { %vm1096_vm3 = vcmp.ge.f32.partialorder %v5981_v15, %v4308_v21  ;;  %3067 = vrcp.f32 %v2005_v39  ;;  %v1972_v51 = vand.u32 2147483647, %v4324_v35  ;;  %v1107_v55 = vsel %vm1091_vm5, -1e+30, %v5982_v61 }
 0x2c4   : > { %v1112_v33 = vsel %vm1096_vm3, -1e+30, %v5981_v15  ;;  %3069 = vrcp.f32 %v1996_v47  ;;  %v2220_v7 = vmul.f32 1.442695, %v2204_v14  ;;  %v1927_v45 = vsub.f32 %v5983_v2, %v4116_v43  ;;  %v5984_v15 = vld [vmem:[#allocation50_spill] sm:$0xff] }
 0x2c5   : > { %v1152_v25 = vsel %vm955_vm1, %v1112_v33, -inf  ;;  %v1983_v30 = vmul.f32 0.3275911, %v1967_v16  ;;  %v2813_v39 = vsel %vm1168_vm4, 1.0, %v5956_v54  ;;  %v1137_v42 = vsel %vm955_vm1, %v1107_v55, -inf  ;;  %v5985_v33 = vld [vmem:[#allocation49_spill] sm:$0xff] }
 0x2c6   : > { %1153 = vmax.xlane.f32.xlu1 %v1152_v25  ;;  %vm1099_vm6 = vcmp.ge.f32.partialorder %v5984_v15, %v4342_v53  ;;  %v2191_v61 = vsub.f32 0.0, %v1967_v16  ;;  %1138 = vmax.xlane.f32.xlu0 %v1137_v42  ;;  %v2506_v14 = vmul.f32 %v2809_v3, %v4177_v48  ;;  %vm1090_vm7 = vcmp.ge.f32.partialorder %v5985_v33, %v4350_v29 }
 0x2c7   : > { %v1115_v47 = vsel %vm1099_vm6, -1e+30, %v5984_v15  ;;  %3071 = vpow2.f32 %v2238_v12  ;;  %v1988_v46 = vmul.f32 0.3275911, %v1972_v51  ;;  %v2525_v25 = vsel %vm2473_vm15, %v2507_v5, 0.0 }
 0x2c8   : > { %v1161_v63 = vsel %vm955_vm1, %v1115_v47, -inf  ;;  %3073 = vpow2.f32 %v2220_v7  ;;  %v2196_v55 = vsub.f32 0.0, %v1972_v51  ;;  %v2510_v2 = vmul.f32 %v2813_v39, %v4210_v11 }
 0x2c9   : > { %v2524_v42 = vsel %vm2473_vm15, %v2506_v14, 0.0  ;;  %v1244_v3 = vsel %vm955_vm1, %v4332_v40, 0.0  ;;  %v1106_v15 = vsel %vm1090_vm7, -1e+30, %v5985_v33  ;;  %vm1166_vm8 = vcmp.ge.f32.partialorder %v3811_v41, %v4150_v37 }
 0x2ca   : > { %1162 = vmax.xlane.f32.xlu1 %v1161_v63  ;;  %vm1167_vm9 = vcmp.ge.f32.partialorder %v3789_v50, %v4099_v32  ;;  %v1999_v5 = vadd.f32 1.0, %v1983_v30  ;;  %v2207_v12 = vmul.f32 %v2191_v61, %v1967_v16  ;;  %v1943_v7 = vmul.f32 %v1927_v45, %v4043_v49  ;;  %1245 = vadd.xlane.f32.xlu0 %v1244_v3 }
 0x2cb   : > { %v2540_v39 = vsel %vm955_vm1, %v2524_v42, 0.0  ;;  %v4383_v63 = vsel %vm1166_vm8, %v4179_v22, 0.0  ;;  %v2811_v47 = vsel %vm1166_vm8, 1.0, %v5956_v54  ;;  %v4387_v14 = vsel %vm1167_vm9, %v4152_v59, 0.0 }
 0x2cc   : > { %5986 = vst [vmem:[#allocation47_spill] sm:$0xff] %v4383_v63  ;;  %5987 = vst [vmem:[#allocation48_spill] sm:$0xff] %v4387_v14  ;;  %v2812_v33 = vsel %vm1167_vm9, 1.0, %v5956_v54  ;;  %v2004_v11 = vadd.f32 1.0, %v1988_v46  ;;  %v4390_v40 = vmul.f32 %v2196_v55, %v1972_v51  ;;  %v1134_v32 = vsel %vm955_vm1, %v1106_v15, -inf }
 0x2cd   : > { %v2508_v16 = vmul.f32 %v2811_v47, %v4256_v6  ;;  %v4394_v45 = vpop.eup %3063  ;;  %v2528_v22 = vsel %vm2473_vm15, %v2510_v2, 0.0  ;;  %v2541_v30 = vsel %vm955_vm1, %v2525_v25, 0.0  ;;  %v2509_v59 = vmul.f32 %v2812_v33, %v4243_v28  ;;  %v6003_v28 = vld [vmem:[#allocation29_spill] sm:$0xff] }
 0x2ce   : > { %1135 = vmax.xlane.f32.xlu1 %v1134_v32  ;;  %vm1169_vm10 = vcmp.ge.f32.partialorder %v3822_v0, %v4224_v24  ;;  %v4402_v46 = vpop.eup %3065  ;;  %v2542_v51 = vadd.f32 %v2541_v30, %v2540_v39  ;;  %vm1171_vm11 = vcmp.ge.f32.partialorder %v3842_v44, %v4300_v27  ;;  %v4411_v2 = vmul.f32 0.70710677, %v1943_v7  ;;  %v5990_v39 = vld [vmem:[#allocation14_spill] sm:$0xff] }
 0x2cf   : > { %v2526_v61 = vsel %vm2473_vm15, %v2508_v16, 0.0  ;;  %v4407_v55 = vsel %vm1169_vm10, %v4184_v1, 0.0  ;;  %v2527_v42 = vsel %vm2473_vm15, %v2509_v59, 0.0  ;;  %v2814_v3 = vsel %vm1169_vm10, 1.0, %v5956_v54  ;;  %v6002_v0 = vld [vmem:[#allocation34_spill] sm:$0xff] }
 0x2d0   : > { %5988 = vst [vmem:[#allocation50_spill] sm:$0xff] %v4407_v55  ;;  %5989 = vst [vmem:[#allocation49_spill] sm:$0xff] %v4411_v2  ;;  %v2543_v25 = vsel %vm955_vm1, %v2526_v61, 0.0  ;;  %v4417_v15 = vpop.eup %3067  ;;  %v1918_v47 = vsub.f32 %v5990_v39, %v4150_v37  ;;  %v2547_v1 = vsel %vm955_vm1, %v2528_v22, 0.0  ;;  %v2511_v32 = vmul.f32 %v2814_v3, %v4260_v17  ;;  %v5992_v37 = vld [vmem:[#allocation16_spill] sm:$0xff] }
 0x2d1   : > { %v2544_v33 = vadd.f32 %v2543_v25, %v2542_v51  ;;  %v4423_v16 = vpop.eup %3069  ;;  %v2545_v7 = vsel %vm955_vm1, %v2527_v42, 0.0  ;;  %v4430_v30 = vsel %vm1171_vm11, %v4221_v38, 0.0  ;;  %vm1172_vm12 = vcmp.ge.f32.partialorder %v3793_v8, %v4120_v9 }
 0x2d2   : > { %5991 = vst [vmem:[#allocation91_spill] sm:$0xff] %v4430_v30  ;;  %vm1173_vm13 = vcmp.ge.f32.partialorder %v3775_v57, %v4073_v10  ;;  %v1921_v22 = vsub.f32 %v5992_v37, %v4224_v24  ;;  %v2529_v51 = vsel %vm2473_vm15, %v2511_v32, 0.0  ;;  %v2816_v61 = vsel %vm1171_vm11, 1.0, %v5956_v54 }
 0x2d3   : > { %v2546_v59 = vadd.f32 %v2545_v7, %v2544_v33  ;;  %3075 = vrcp.f32 %v1999_v5  ;;  %v4445_v38 = vand.u32 2147483647, %v4411_v2  ;;  %v4451_v25 = vsel %vm1172_vm12, %v4145_v4, 0.0  ;;  %v5995_v5 = vld [vmem:[#allocation41_spill] sm:$0xff] }
 0x2d4   : > { %5993 = vst [vmem:[#allocation92_spill] sm:$0xff] %v4451_v25  ;;  %v4457_v24 = vsel %vm1173_vm13, %v4131_v36, 0.0  ;;  %v4459_v42 = vpop.eup %3071  ;;  %v4461_v3 = vmul.f32 1.442695, %v2207_v12  ;;  %3077 = vrcp.f32 %v2004_v11  ;;  %v1934_v33 = vmul.f32 %v1918_v47, %v5995_v5  ;;  %v5996_v12 = vld [vmem:[#allocation43_spill] sm:$0xff]  ;;  %v6037_v5 = vld [vmem:[#allocation72_spill] sm:$0xff] }
 0x2d5   : > { %5994 = vst [vmem:[#allocation93_spill] sm:$0xff] %v4457_v24  ;;  %v2548_v32 = vadd.f32 %v2547_v1, %v2546_v59  ;;  %v4464_v7 = vpop.eup %3073  ;;  %v2549_v44 = vsel %vm955_vm1, %v2529_v51, 0.0  ;;  %v2513_v4 = vmul.f32 %v2816_v61, %v4288_v52  ;;  %v2817_v36 = vsel %vm1172_vm12, 1.0, %v5956_v54  ;;  %v5997_v11 = vld [vmem:[#allocation15_spill] sm:$0xff] }
 0x2d6   : > { %vm1170_vm14 = vcmp.ge.f32.partialorder %v3848_v19, %v4350_v29  ;;  %v1937_v17 = vmul.f32 %v1921_v22, %v5996_v12  ;;  %v1926_v47 = vsub.f32 %v5997_v11, %v4202_v60  ;;  %v1991_v51 = vmul.f32 0.3275911, %v4445_v38  ;;  %v6001_v19 = vld [vmem:[#allocation82_spill] sm:$0xff]  ;;  %v6015_v12 = vld [vmem:[#allocation60_spill] sm:$0xff] }
 0x2d7   : > { %v2550_v1 = vadd.f32 %v2549_v44, %v2548_v32  ;;  %v4478_v59 = vsel %vm1170_vm14, %v4226_v62, 0.0  ;;  %v2818_v9 = vsel %vm1173_vm13, 1.0, %v5956_v54  ;;  %v2815_v61 = vsel %vm1170_vm14, 1.0, %v5956_v54  ;;  %v5999_v62 = vld [vmem:[#allocation63_spill] sm:$0xff] }
 0x2d8   : > { %5998 = vst [vmem:[#allocation94_spill] sm:$0xff] %v4478_v59  ;;  %vm1174_vm0 = vcmp.ge.f32.partialorder %v3805_v26, %v4202_v60  ;;  %v2199_v22 = vsub.f32 0.0, %v4445_v38  ;;  %v2514_v52 = vmul.f32 %v2817_v36, %v4247_v20  ;;  %v2512_v44 = vmul.f32 %v2815_v61, %v4315_v23  ;;  %v6004_v60 = vld [vmem:[#allocation81_spill] sm:$0xff]  ;;  %v6005_v61 = vld [vmem:[#allocation64_spill] sm:$0xff] }
 0x2d9   : > { %v4492_v32 = vsel %vm1174_vm0, %v5999_v62, 0.0  ;;  %vm1177_vm2 = vcmp.ge.f32.partialorder %v6002_v0, %v6001_v19  ;;  %v2531_v10 = vsel %vm2473_vm15, %v2513_v4, 0.0  ;;  %v2819_v6 = vsel %vm1174_vm0, 1.0, %v5956_v54  ;;  %v6007_v62 = vld [vmem:[#allocation35_spill] sm:$0xff] }
 0x2da   : > { %6000 = vst [vmem:[#allocation63_spill] sm:$0xff] %v4492_v32  ;;  %vm1175_vm3 = vcmp.ge.f32.partialorder %v6003_v28, %v4116_v43  ;;  %v2515_v26 = vmul.f32 %v2818_v9, %v6004_v60  ;;  %v2530_v36 = vsel %vm2473_vm15, %v2512_v44, 0.0  ;;  %vm1176_vm5 = vcmp.ge.f32.partialorder %v6007_v62, %v4308_v21  ;;  %v6010_v60 = vld [vmem:[#allocation86_spill] sm:$0xff]  ;;  %v6011_v28 = vld [vmem:[#allocation67_spill] sm:$0xff] }
 0x2db   : > { %v4505_v23 = vsel %vm1175_vm3, %v6005_v61, 0.0  ;;  %v4509_v20 = vmul.f32 0.70710677, %v1934_v33  ;;  %v4511_v41 = vmul.f32 0.70710677, %v1937_v17  ;;  %v2551_v4 = vsel %vm955_vm1, %v2530_v36, 0.0 }
 0x2dc   : > { %6006 = vst [vmem:[#allocation64_spill] sm:$0xff] %v4505_v23  ;;  %v2820_v8 = vsel %vm1175_vm3, 1.0, %v5956_v54  ;;  %v2532_v43 = vsel %vm2473_vm15, %v2514_v52, 0.0  ;;  %v2552_v9 = vadd.f32 %v2551_v4, %v2550_v1  ;;  %v2516_v44 = vmul.f32 %v2819_v6, %v6010_v60  ;;  %v6013_v62 = vld [vmem:[#allocation18_spill] sm:$0xff]  ;;  %v6014_v36 = vld [vmem:[#allocation55_spill] sm:$0xff] }
 0x2dd   : > { %6008 = vst [vmem:[#allocation95_spill] sm:$0xff] %v4509_v20  ;;  %6009 = vst [vmem:[#allocation96_spill] sm:$0xff] %v4511_v41  ;;  %v4519_v61 = vsel %vm1176_vm5, %v6011_v28, 0.0  ;;  %v2007_v48 = vadd.f32 1.0, %v1991_v51  ;;  %v1920_v33 = vsub.f32 %v6013_v62, %v4252_v34  ;;  %v2553_v17 = vsel %vm955_vm1, %v2531_v10, 0.0  ;;  %v6016_v1 = vld [vmem:[#allocation83_spill] sm:$0xff] }
 0x2de   : > { %6012 = vst [vmem:[#allocation67_spill] sm:$0xff] %v4519_v61  ;;  %v2821_v50 = vsel %vm1176_vm5, 1.0, %v5956_v54  ;;  %v1942_v57 = vmul.f32 %v1926_v47, %v6014_v36  ;;  %v2533_v52 = vsel %vm2473_vm15, %v2515_v26, 0.0  ;;  %v2554_v6 = vadd.f32 %v2553_v17, %v2552_v9  ;;  %v6017_v4 = vld [vmem:[#allocation19_spill] sm:$0xff]  ;;  %v6019_v17 = vld [vmem:[#allocation65_spill] sm:$0xff] }
 0x2df   : > { %1462 = vrot.lane.b32.xlu1 %v6015_v12, %s3315_s29  ;;  %v2517_v28 = vmul.f32 %v2820_v8, %v6016_v1  ;;  %v1966_v51 = vand.u32 2147483647, %v4509_v20  ;;  %v2822_v10 = vsel %vm1177_vm2, 1.0, %v5956_v54  ;;  %v1928_v60 = vsub.f32 %v6017_v4, %v4308_v21  ;;  %v6018_v12 = vld [vmem:[#allocation62_spill] sm:$0xff]  ;;  %v6021_v4 = vld [vmem:[#allocation45_spill] sm:$0xff] }
 0x2e0   : > { %v2555_v47 = vsel %vm955_vm1, %v2532_v43, 0.0  ;;  %v4539_v62 = vpop.eup %3075  ;;  %1464 = vrot.lane.b32.xlu0 %v6018_v12, %s3315_s29  ;;  %v2534_v8 = vsel %vm2473_vm15, %v2516_v44, 0.0  ;;  %v2518_v9 = vmul.f32 %v2821_v50, %v4319_v18  ;;  %v4550_v1 = vsel %vm1168_vm4, %v6019_v17, 0.0  ;;  %v6023_v44 = vld [vmem:[#allocation70_spill] sm:$0xff]  ;;  %v6024_v17 = vld [vmem:[#allocation20_spill] sm:$0xff] }
 0x2e1   : > { %v2556_v26 = vadd.f32 %v2555_v47, %v2554_v6  ;;  %6020 = vst [vmem:[#allocation60_spill] sm:$0xff] %v4550_v1  ;;  %v4552_v21 = vpop.eup %3077  ;;  %3079 = vrcp.f32 %v2007_v48  ;;  %v1969_v43 = vand.u32 2147483647, %v4511_v41  ;;  %v1936_v36 = vmul.f32 %v1920_v33, %v6021_v4 }
 0x2e2   : > { %v2557_v12 = vsel %vm955_vm1, %v2533_v52, 0.0  ;;  %v4557_v37 = vmul.f32 0.70710677, %v1942_v57  ;;  %v2519_v6 = vmul.f32 %v2822_v10, %v6023_v44  ;;  %v2535_v47 = vsel %vm2473_vm15, %v2517_v28, 0.0  ;;  %v6027_v52 = vld [vmem:[#allocation57_spill] sm:$0xff] }
 0x2e3   : > { %v2558_v50 = vadd.f32 %v2557_v12, %v2556_v26  ;;  %v1982_v34 = vmul.f32 0.3275911, %v1966_v51  ;;  %v1923_v18 = vsub.f32 %v6024_v17, %v4300_v27  ;;  %v2559_v48 = vsel %vm955_vm1, %v2534_v8, 0.0 }
 0x2e4   : > { %6022 = vst [vmem:[#allocation62_spill] sm:$0xff] %v4557_v37  ;;  %v4569_v33 = vsel %vm1177_vm2, %v6025_v56, 0.0  ;;  %v2190_v57 = vsub.f32 0.0, %v1966_v51  ;;  %v1944_v4 = vmul.f32 %v1928_v60, %v6027_v52  ;;  %v2536_v26 = vsel %vm2473_vm15, %v2518_v9, 0.0  ;;  %v6029_v9 = vld [vmem:[#allocation52_spill] sm:$0xff] }
 0x2e5   : > { %6026 = vst [vmem:[#allocation65_spill] sm:$0xff] %v4569_v33  ;;  %v2560_v10 = vadd.f32 %v2559_v48, %v2558_v50  ;;  %vm919_vm4 = vcmp.lt.s32.totalorder %v4322_v13, 256  ;;  %v2236_v28 = vmul.f32 1.442695, %v4390_v40  ;;  %v2215_v27 = vmul.f32 %v2199_v22, %v4445_v38 }
 0x2e6   : > { %v4577_v8 = vmul.f32 0.70710677, %v1936_v36  ;;  %v2561_v12 = vsel %vm955_vm1, %v2535_v47, 0.0  ;;  %v1985_v44 = vmul.f32 0.3275911, %v1969_v43  ;;  %v2193_v56 = vsub.f32 0.0, %v1969_v43 }
 0x2e7   : > { %v2537_v0 = vsel %vm2473_vm15, %v2519_v6, 0.0  ;;  %v2562_v60 = vadd.f32 %v2561_v12, %v2560_v10  ;;  %v1998_v50 = vadd.f32 1.0, %v1982_v34  ;;  %v1974_v48 = vand.u32 2147483647, %v4557_v37  ;;  %v6031_v6 = vld [vmem:[#allocation22_spill] sm:$0xff]  ;;  %v6039_v37 = vld [vmem:[#allocation39_spill] sm:$0xff] }
 0x2e8   : > { %6028 = vst [vmem:[#allocation68_spill] sm:$0xff] %v4577_v8  ;;  %v1939_v52 = vmul.f32 %v1923_v18, %v6029_v9  ;;  %v2563_v17 = vsel %vm955_vm1, %v2536_v26, 0.0  ;;  %3081 = vpow2.f32 %v4461_v3  ;;  %v2206_v40 = vmul.f32 %v2190_v57, %v1966_v51  ;;  %v4621_v9 = vpop.xlane.xlu1 %1079 }
 0x2e9   : > { %v4586_v38 = vmul.f32 0.70710677, %v1944_v4  ;;  %v2564_v22 = vadd.f32 %v2563_v17, %v2562_v60  ;;  %v2565_v36 = vsel %vm955_vm1, %v2537_v0, 0.0  ;;  %v1968_v47 = vand.u32 2147483647, %v4577_v8 }
 0x2ea   : > { %v1922_v10 = vsub.f32 %v6031_v6, %v4350_v29  ;;  %v2045_v34 = vmul.f32 1.0614054, %v4394_v45  ;;  %v2242_v12 = vmul.f32 1.442695, %v2215_v27  ;;  %v2209_v11 = vmul.f32 %v2193_v56, %v1969_v43  ;;  %v6033_v29 = vld [vmem:[#allocation38_spill] sm:$0xff] }
 0x2eb   : > { %6030 = vst [vmem:[#allocation97_spill] sm:$0xff] %v4586_v38  ;;  %v4593_v18 = vadd.f32 %v2565_v36, %v2564_v22  ;;  %v2053_v26 = vmul.f32 1.0614054, %v4417_v15  ;;  %3083 = vrcp.f32 %v1998_v50  ;;  %v2001_v3 = vadd.f32 1.0, %v1985_v44  ;;  %v6034_v27 = vld [vmem:[#allocation58_spill] sm:$0xff] }
 0x2ec   : > { %v1990_v51 = vmul.f32 0.3275911, %v1974_v48  ;;  %v4596_v4 = vmul.f32 0.70710677, %v1939_v52  ;;  %3085 = vpow2.f32 %v2236_v28  ;;  %v2224_v0 = vmul.f32 1.442695, %v2206_v40 }
 0x2ed   : > { %v2198_v17 = vsub.f32 0.0, %v1974_v48  ;;  %v1976_v57 = vand.u32 2147483647, %v4586_v38  ;;  %v1984_v60 = vmul.f32 0.3275911, %v1968_v47  ;;  %vm1179_vm6 = vcmp.ge.f32.partialorder %v6033_v29, %v4342_v53  ;;  %v6038_v38 = vld [vmem:[#allocation51_spill] sm:$0xff] }
 0x2ee   : > { %6032 = vst [vmem:[#allocation98_spill] sm:$0xff] %v4596_v4  ;;  %v1938_v43 = vmul.f32 %v1922_v10, %v6034_v27  ;;  %v2061_v56 = vadd.f32 -1.4531521, %v2045_v34  ;;  %v4602_v22 = vpop.eup %3079  ;;  %3087 = vpow2.f32 %v2242_v12  ;;  %v2230_v50 = vmul.f32 1.442695, %v2209_v11  ;;  %v6051_v29 = vld [vmem:[#allocation78_spill] sm:$0xff] }
 0x2ef   : > { %v2069_v44 = vadd.f32 -1.4531521, %v2053_v26  ;;  %v2047_v52 = vmul.f32 1.0614054, %v4539_v62  ;;  %3089 = vrcp.f32 %v2001_v3  ;;  %v2006_v28 = vadd.f32 1.0, %v1990_v51 }
 0x2f0   : > { %v1971_v40 = vand.u32 2147483647, %v4596_v4  ;;  %v4609_v36 = vsel %vm919_vm4, 1.0, %v5956_v54  ;;  %3091 = vpow2.f32 %v2224_v0  ;;  %v2214_v6 = vmul.f32 %v2198_v17, %v1974_v48 }
 0x2f1   : > { %6035 = vst [vmem:[#allocation99_spill] sm:$0xff] %v4609_v36  ;;  %v1992_v10 = vmul.f32 0.3275911, %v1976_v57  ;;  %v2824_v11 = vsel %vm1179_vm6, 1.0, %v5956_v54  ;;  %v2000_v34 = vadd.f32 1.0, %v1984_v60  ;;  %v2077_v26 = vmul.f32 %v4394_v45, %v2061_v56 }
 0x2f2   : > { %v4615_v12 = vmul.f32 0.70710677, %v1938_v43  ;;  %v2044_v3 = vmul.f32 1.0614054, %v4423_v16  ;;  %3093 = vpow2.f32 %v2230_v50  ;;  %v2085_v13 = vmul.f32 %v4417_v15, %v2069_v44 }
 0x2f3   : > { %v2063_v51 = vadd.f32 -1.4531521, %v2047_v52  ;;  %v2055_v0 = vmul.f32 1.0614054, %v4602_v22  ;;  %3095 = vrcp.f32 %v2006_v28  ;;  %v2192_v48 = vsub.f32 0.0, %v1968_v47 }
 0x2f4   : > { %6036 = vst [vmem:[#allocation100_spill] sm:$0xff] %v4615_v12  ;;  %v1987_v17 = vmul.f32 0.3275911, %v1971_v40  ;;  %v2195_v27 = vsub.f32 0.0, %v1971_v40  ;;  %v2240_v4 = vmul.f32 1.442695, %v2214_v6  ;;  %v2521_v39 = vmul.f32 %v2824_v11, %v6037_v5 }
 0x2f5   : > { %v2008_v60 = vadd.f32 1.0, %v1992_v10  ;;  %v2200_v43 = vsub.f32 0.0, %v1976_v57  ;;  %v4624_v56 = vpop.eup %3081  ;;  %3097 = vrcp.f32 %v2000_v34  ;;  %v1970_v50 = vand.u32 2147483647, %v4615_v12 }
 0x2f6   : > { %v2093_v44 = vadd.f32 1.4214138, %v2077_v26  ;;  %v2060_v52 = vadd.f32 -1.4531521, %v2044_v3  ;;  %vm1098_vm7 = vcmp.ge.f32.partialorder %v6038_v38, %v4621_v9  ;;  %v2101_v28 = vadd.f32 1.4214138, %v2085_v13 }
 0x2f7   : > { %v2079_v49 = vmul.f32 %v4539_v62, %v2063_v51  ;;  %v2071_v8 = vadd.f32 -1.4531521, %v2055_v0  ;;  %v2208_v41 = vmul.f32 %v2192_v48, %v1968_v47  ;;  %v2003_v6 = vadd.f32 1.0, %v1987_v17 }
 0x2f8   : > { %v2211_v10 = vmul.f32 %v2195_v27, %v1971_v40  ;;  %vm1178_vm8 = vcmp.ge.f32.partialorder %v6039_v37, %v4621_v9  ;;  %v4632_v11 = vpop.eup %3083  ;;  %3099 = vrcp.f32 %v2008_v60  ;;  %v2216_v34 = vmul.f32 %v2200_v43, %v1976_v57 }
 0x2f9   : > { %v2539_v26 = vsel %vm2473_vm15, %v2521_v39, 0.0  ;;  %v2052_v3 = vmul.f32 1.0614054, %v4552_v21  ;;  %v4637_v5 = vpop.eup %3085  ;;  %v1986_v13 = vmul.f32 0.3275911, %v1970_v50  ;;  %v2109_v47 = vmul.f32 %v4394_v45, %v2093_v44 }
 0x2fa   : > { %6040 = vst [vmem:[#allocation51_spill] sm:$0xff] %v4637_v5  ;;  %v1114_v51 = vsel %vm1098_vm7, -1e+30, %v6038_v38  ;;  %v2076_v27 = vmul.f32 %v4423_v16, %v2060_v52  ;;  %v2823_v40 = vsel %vm1178_vm8, 1.0, %v5956_v54  ;;  %v2117_v57 = vmul.f32 %v4417_v15, %v2101_v28 }
 0x2fb   : > { %v2095_v0 = vadd.f32 1.4214138, %v2079_v49  ;;  %v2087_v39 = vmul.f32 %v4602_v22, %v2071_v8  ;;  %v4648_v48 = vpop.eup %3087  ;;  %v2228_v17 = vmul.f32 1.442695, %v2208_v41  ;;  %3101 = vrcp.f32 %v2003_v6 }
 0x2fc   : > { %v2194_v60 = vsub.f32 0.0, %v1970_v50  ;;  %v2046_v38 = vmul.f32 1.0614054, %v4632_v11  ;;  %v4651_v43 = vpop.eup %3089  ;;  %3103 = vpow2.f32 %v2240_v4  ;;  %v2234_v44 = vmul.f32 1.442695, %v2211_v10  ;;  %v6042_v10 = vld [vmem:[#allocation59_spill] sm:$0xff] }
 0x2fd   : > { %v2244_v52 = vmul.f32 1.442695, %v2216_v34  ;;  %v2068_v12 = vadd.f32 -1.4531521, %v2052_v3  ;;  %v4653_v20 = vpop.eup %3091  ;;  %v1158_v54 = vsel %vm955_vm1, %v1114_v51, -inf  ;;  %v2520_v49 = vmul.f32 %v2823_v40, %v4609_v36  ;;  %v6043_v51 = vld [vmem:[#allocation17_spill] sm:$0xff] }
 0x2fe   : > { %6041 = vst [vmem:[#allocation101_spill] sm:$0xff] %v4653_v20  ;;  %v2125_v8 = vadd.f32 -0.28449672, %v2109_v47  ;;  %v2092_v28 = vadd.f32 1.4214138, %v2076_v27  ;;  %v2002_v35 = vadd.f32 1.0, %v1986_v13  ;;  %v2111_v6 = vmul.f32 %v4539_v62, %v2095_v0 }
 0x2ff   : > { %v2133_v41 = vadd.f32 -0.28449672, %v2117_v57  ;;  %v2103_v2 = vadd.f32 1.4214138, %v2087_v39  ;;  %v4658_v5 = vpop.eup %3093  ;;  %3105 = vpow2.f32 %v2228_v17  ;;  %v2210_v4 = vmul.f32 %v2194_v60, %v1970_v50  ;;  %1159 = vmax.xlane.f32.xlu0 %v1158_v54 }
 0x300   : > { %v1247_v34 = vsel %vm955_vm1, %v6042_v10, 0.0  ;;  %v2062_v3 = vadd.f32 -1.4531521, %v2046_v38  ;;  %v4662_v20 = vpop.eup %3095  ;;  %3107 = vpow2.f32 %v2234_v44  ;;  %v2569_v13 = vsel %vm955_vm1, %v2539_v26, 0.0 }
 0x301   : > { %v2084_v27 = vmul.f32 %v4552_v21, %v2068_v12  ;;  %3109 = vpow2.f32 %v2244_v52  ;;  %v2538_v40 = vsel %vm2473_vm15, %v2520_v49, 0.0  ;;  %v2141_v50 = vmul.f32 %v4394_v45, %v2125_v8 }
 0x302   : > { %v2108_v57 = vmul.f32 %v4423_v16, %v2092_v28  ;;  %v4672_v0 = vpop.eup %3097  ;;  %3111 = vrcp.f32 %v2002_v35  ;;  %v2149_v39 = vmul.f32 %v4417_v15, %v2133_v41  ;;  %v2127_v17 = vadd.f32 -0.28449672, %v2111_v6 }
 0x303   : > { %1248 = vadd.xlane.f32.xlu1 %v1247_v34  ;;  %v2119_v60 = vmul.f32 %v4602_v22, %v2103_v2  ;;  %v2232_v26 = vmul.f32 1.442695, %v2210_v4  ;;  %v1250_v12 = vsel %vm955_vm1, %v4383_v63, 0.0  ;;  %v2078_v58 = vmul.f32 %v4632_v11, %v2062_v3 }
 0x304   : > { %v2054_v38 = vmul.f32 1.0614054, %v4662_v20  ;;  %v1253_v44 = vsel %vm955_vm1, %v4387_v14, 0.0  ;;  %v2567_v52 = vsel %vm955_vm1, %v2538_v40, 0.0  ;;  %v2100_v35 = vadd.f32 1.4214138, %v2084_v27 }
 0x305   : > { %v2049_v54 = vmul.f32 1.0614054, %v4651_v43  ;;  %v4684_v49 = vpop.eup %3099  ;;  %v1259_v2 = vsel %vm955_vm1, %v4407_v55, 0.0  ;;  %v2568_v8 = vadd.f32 %v2567_v52, %v4593_v18  ;;  %v2157_v28 = vadd.f32 0.2548296, %v2141_v50 }
 0x306   : > { %v2124_v41 = vadd.f32 -0.28449672, %v2108_v57  ;;  %v2165_v6 = vadd.f32 0.2548296, %v2149_v39  ;;  %v2143_v4 = vmul.f32 %v4539_v62, %v2127_v17  ;;  %v2135_v34 = vadd.f32 -0.28449672, %v2119_v60 }
 0x307   : > { %1251 = vadd.xlane.f32.xlu1 %v1250_v12  ;;  %v2048_v3 = vmul.f32 1.0614054, %v4672_v0  ;;  %v1265_v27 = vsel %vm955_vm1, %v4430_v30, 0.0  ;;  %v4695_v40 = vsel %vm955_vm1, %v4451_v25, 0.0  ;;  %v2094_v47 = vadd.f32 1.4214138, %v2078_v58 }
 0x308   : > { %v2070_v36 = vadd.f32 -1.4531521, %v2054_v38  ;;  %v4697_v55 = vpop.eup %3101  ;;  %v4701_v18 = vsel %vm955_vm1, %v4457_v24, 0.0  ;;  %v4705_v50 = vsel %vm955_vm1, %v4478_v59, 0.0  ;;  %v2116_v57 = vmul.f32 %v4552_v21, %v2100_v35 }
 0x309   : > { %v2065_v39 = vadd.f32 -1.4531521, %v2049_v54  ;;  %v4708_v17 = vpop.eup %3103  ;;  %v2173_v60 = vmul.f32 %v4394_v45, %v2157_v28  ;;  %v2570_v12 = vadd.f32 %v2569_v13, %v2568_v8  ;;  %v2140_v58 = vmul.f32 %v4423_v16, %v2124_v41 }
 0x30a   : > { %v2056_v38 = vmul.f32 1.0614054, %v4684_v49  ;;  %v2181_v52 = vmul.f32 %v4417_v15, %v2165_v6  ;;  %v2159_v24 = vadd.f32 0.2548296, %v2143_v4  ;;  %v2151_v25 = vmul.f32 %v4602_v22, %v2135_v34  ;;  %v6044_v15 = vld [vmem:[#allocation85_spill] sm:$0xff] }
 0x30b   : > { %1254 = vadd.xlane.f32.xlu1 %v1253_v44  ;;  %v2064_v59 = vadd.f32 -1.4531521, %v2048_v3  ;;  %v4717_v35 = vsel %vm955_vm1, %v4492_v32, 0.0  ;;  %v2110_v54 = vmul.f32 %v4632_v11, %v2094_v47  ;;  %v2086_v45 = vmul.f32 %v4662_v20, %v2070_v36 }
 0x30c   : > { %v2051_v13 = vmul.f32 1.0614054, %v4697_v55  ;;  %v4722_v8 = vpop.eup %3105  ;;  %v4726_v44 = vsel %vm955_vm1, %v4505_v23, 0.0  ;;  %v4732_v28 = vsel %vm1178_vm8, %v6044_v15, 0.0  ;;  %v2132_v41 = vadd.f32 -0.28449672, %v2116_v57 }
 0x30d   : > { %6045 = vst [vmem:[#allocation17_spill] sm:$0xff] %v4732_v28  ;;  %v2081_v6 = vmul.f32 %v4651_v43, %v2065_v39  ;;  %v4735_v47 = vpop.eup %3107  ;;  %v2253_v36 = vmul.f32 %v4402_v46, %v2173_v60  ;;  %v2571_v4 = vrot.slane %v2570_v12, 4  ;;  %v2156_v34 = vadd.f32 0.2548296, %v2140_v58  ;;  %v6046_v46 = vld [vmem:[#allocation69_spill] sm:$0xff] }
 0x30e   : > { %v2072_v3 = vadd.f32 -1.4531521, %v2056_v38  ;;  %v4738_v32 = vpop.eup %3109  ;;  %v2261_v23 = vmul.f32 %v4459_v42, %v2181_v52  ;;  %v2175_v30 = vmul.f32 %v4539_v62, %v2159_v24  ;;  %v2167_v37 = vadd.f32 0.2548296, %v2151_v25 }
 0x30f   : > { %1260 = vadd.xlane.f32.xlu1 %v1259_v2  ;;  %v2080_v15 = vmul.f32 %v4672_v0, %v2064_v59  ;;  %v4743_v57 = vpop.eup %3111  ;;  %3113 = vpow2.f32 %v2232_v26  ;;  %v2126_v39 = vadd.f32 -0.28449672, %v2110_v54  ;;  %v2102_v14 = vadd.f32 1.4214138, %v2086_v45  ;;  %v6047_v59 = vld [vmem:[#allocation75_spill] sm:$0xff] }
 0x310   : > { %v2067_v63 = vadd.f32 -1.4531521, %v2051_v13  ;;  %vm2285_vm15 = vcmp.ge.f32.partialorder %v6046_v46, 0.0  ;;  %v4748_v60 = vsel %vm955_vm1, %v4519_v61, 0.0  ;;  %v4752_v42 = vsel %vm955_vm1, %v4732_v28, 0.0 }
 0x311   : > { %v2148_v25 = vmul.f32 %v4552_v21, %v2132_v41  ;;  %v2097_v24 = vadd.f32 1.4214138, %v2081_v6  ;;  %vm2293_vm9 = vcmp.ge.f32.partialorder %v6047_v59, 0.0  ;;  %v2269_v62 = vsub.f32 1.0, %v2253_v36  ;;  %v6052_v59 = vld [vmem:[#allocation8_spill] sm:$0xff] }
 0x312   : > { %v2572_v26 = vadd.f32 %v2571_v4, %v2570_v12  ;;  %v2172_v2 = vmul.f32 %v4423_v16, %v2156_v34  ;;  %v2088_v58 = vmul.f32 %v4684_v49, %v2072_v3  ;;  %v2277_v38 = vsub.f32 1.0, %v2261_v23 }
 0x313   : > { %1266 = vadd.xlane.f32.xlu1 %v1265_v27  ;;  %v2255_v52 = vmul.f32 %v4624_v56, %v2175_v30  ;;  %v2096_v54 = vadd.f32 1.4214138, %v2080_v15  ;;  %v2050_v45 = vmul.f32 1.0614054, %v4743_v57  ;;  %v2183_v13 = vmul.f32 %v4602_v22, %v2167_v37  ;;  %v6048_v27 = vld [vmem:[#allocation74_spill] sm:$0xff]  ;;  %v6050_v37 = vld [vmem:[#allocation61_spill] sm:$0xff] }
 0x314   : > { %v2142_v41 = vmul.f32 %v4632_v11, %v2126_v39  ;;  %v2118_v6 = vmul.f32 %v4662_v20, %v2102_v14  ;;  %v2083_v36 = vmul.f32 %v4697_v55, %v2067_v63  ;;  %v4766_v16 = vsel %vm955_vm1, %v4550_v1, 0.0 }
 0x315   : > { %v2164_v12 = vadd.f32 0.2548296, %v2148_v25  ;;  %v4772_v23 = vsel %vm1179_vm6, %v6048_v27, 0.0  ;;  %v2113_v30 = vmul.f32 %v4651_v43, %v2097_v24  ;;  %vm2287_vm10 = vcmp.ge.f32.partialorder %v4306_v31, 0.0  ;;  %1466 = vrot.lane.b32.xlu0 %v6050_v37, %s3315_s29  ;;  %v6058_v31 = vld [vmem:[#allocation9_spill] sm:$0xff] }
 0x316   : > { %6049 = vst [vmem:[#allocation85_spill] sm:$0xff] %v4772_v23  ;;  %v2301_v14 = vsub.f32 0.0, %v2269_v62  ;;  %v2573_v63 = vrot.slane %v2572_v26, 2  ;;  %v2252_v22 = vmul.f32 %v4464_v7, %v2172_v2  ;;  %v2104_v56 = vadd.f32 1.4214138, %v2088_v58 }
 0x317   : > { %1269 = vadd.xlane.f32.xlu1 %v4695_v40  ;;  %v2309_v4 = vsub.f32 0.0, %v2277_v38  ;;  %v2271_v34 = vsub.f32 1.0, %v2255_v52  ;;  %v2112_v3 = vmul.f32 %v4672_v0, %v2096_v54  ;;  %v2066_v15 = vadd.f32 -1.4531521, %v2050_v45 }
 0x318   : > { %v4782_v39 = vmul.f32 %v4648_v48, %v2183_v13  ;;  %v2158_v25 = vadd.f32 0.2548296, %v2142_v41  ;;  %v2134_v24 = vadd.f32 -0.28449672, %v2118_v6  ;;  %v2099_v27 = vadd.f32 1.4214138, %v2083_v36 }
 0x319   : > { %vm2284_vm11 = vcmp.ge.f32.partialorder %v6051_v29, 0.0  ;;  %v4787_v37 = vsel %vm955_vm1, %v4569_v33, 0.0  ;;  %v2180_v7 = vmul.f32 %v4552_v21, %v2164_v12  ;;  %v4792_v40 = vsel %vm955_vm1, %v4772_v23, 0.0 }
 0x31a   : > { %v2129_v2 = vadd.f32 -0.28449672, %v2113_v30  ;;  %v2317_v48 = vsel %vm2285_vm15, %v2269_v62, %v2301_v14  ;;  %v2574_v58 = vadd.f32 %v2573_v63, %v2572_v26  ;;  %v2268_v52 = vsub.f32 1.0, %v2252_v22  ;;  %v6053_v30 = vld [vmem:[#allocation51_spill] sm:$0xff] }
 0x31b   : > { %v2120_v54 = vmul.f32 %v4684_v49, %v2104_v56  ;;  %1272 = vadd.xlane.f32.xlu1 %v4701_v18  ;;  %v2325_v45 = vsel %vm2293_vm9, %v2277_v38, %v2309_v4  ;;  %v2303_v13 = vsub.f32 0.0, %v2271_v34  ;;  %v2128_v41 = vadd.f32 -0.28449672, %v2112_v3 }
 0x31c   : > { %v2082_v21 = vmul.f32 %v4743_v57, %v2066_v15  ;;  %v5859_v36 = vsub.f32 1.0, %v4782_v39  ;;  %v2174_v46 = vmul.f32 %v4632_v11, %v2158_v25  ;;  %v2150_v62 = vmul.f32 %v4662_v20, %v2134_v24  ;;  %v4807_v12 = vpop.eup %3113  ;;  %v6054_v11 = vld [vmem:[#allocation42_spill] sm:$0xff] }
 0x31d   : > { %v2115_v26 = vmul.f32 %v4697_v55, %v2099_v27  ;;  %v2333_v18 = vadd.f32 1.0, %v2317_v48  ;;  %v2260_v14 = vmul.f32 %v6053_v30, %v2180_v7  ;;  %v2145_v63 = vmul.f32 %v4651_v43, %v2129_v2  ;;  %v6055_v48 = vld [vmem:[#allocation49_spill] sm:$0xff] }
 0x31e   : > { %v2575_v22 = vrot.slane %v2574_v58, 1  ;;  %v2341_v56 = vadd.f32 1.0, %v2325_v45  ;;  %v2300_v4 = vsub.f32 0.0, %v2268_v52  ;;  %v2136_v3 = vadd.f32 -0.28449672, %v2120_v54  ;;  %v6056_v2 = vld [vmem:[#allocation101_spill] sm:$0xff] }
 0x31f   : > { %1263 = vadd.xlane.f32.xlu1 %v4705_v50  ;;  %v2319_v25 = vsel %vm2287_vm10, %v2271_v34, %v2303_v13  ;;  %v2144_v24 = vmul.f32 %v4672_v0, %v2128_v41  ;;  %v2098_v27 = vadd.f32 1.4214138, %v2082_v21  ;;  %vm2295_vm12 = vcmp.ge.f32.partialorder %v6055_v48, 0.0  ;;  %v6057_v50 = vld [vmem:[#allocation88_spill] sm:$0xff] }
 0x320   : > { %v2311_v7 = vsub.f32 0.0, %v5859_v36  ;;  %v2254_v45 = vmul.f32 %v6056_v2, %v2174_v46  ;;  %v2166_v54 = vadd.f32 0.2548296, %v2150_v62  ;;  %v2131_v30 = vadd.f32 -0.28449672, %v2115_v26  ;;  %v6059_v46 = vld [vmem:[#allocation95_spill] sm:$0xff] }
 0x321   : > { %vm2292_vm13 = vcmp.ge.f32.partialorder %v6057_v50, 0.0  ;;  %v2276_v13 = vsub.f32 1.0, %v2260_v14  ;;  %v2161_v41 = vadd.f32 0.2548296, %v2145_v63  ;;  %v4829_v21 = vmul.f32 0.5, %v2333_v18  ;;  %v6060_v26 = vld [vmem:[#allocation54_spill] sm:$0xff] }
 0x322   : > { %v2316_v23 = vsel %vm2284_vm11, %v2268_v52, %v2300_v4  ;;  %v2152_v36 = vmul.f32 %v4684_v49, %v2136_v3  ;;  %vm2286_vm14 = vcmp.ge.f32.partialorder %v6059_v46, 0.0  ;;  %v2160_v2 = vadd.f32 0.2548296, %v2144_v24  ;;  %v6061_v24 = vld [vmem:[#allocation10_spill] sm:$0xff] }
 0x323   : > { %v4801_v6 = vpop.xlane.xlu0 %1120  ;;  %1275 = vadd.xlane.f32.xlu1 %v4717_v35  ;;  %v2114_v14 = vmul.f32 %v4743_v57, %v2098_v27  ;;  %v2335_v18 = vadd.f32 1.0, %v2319_v25  ;;  %v2182_v29 = vmul.f32 %v4662_v20, %v2166_v54  ;;  %v2147_v52 = vmul.f32 %v4697_v55, %v2131_v30  ;;  %v6062_v30 = vld [vmem:[#allocation40_spill] sm:$0xff] }
 0x324   : > { %v1405_v38 = vsub.f32 %v6052_v59, %v4801_v6  ;;  %v4846_v4 = vmul.f32 0.5, %v2341_v56  ;;  %v2177_v3 = vmul.f32 %v4651_v43, %v2161_v41  ;;  %v2308_v25 = vsub.f32 0.0, %v2276_v13 }
 0x325   : > { %v2176_v54 = vmul.f32 %v4672_v0, %v2160_v2  ;;  %v2130_v56 = vadd.f32 -0.28449672, %v2114_v14  ;;  %v2262_v43 = vmul.f32 %v4708_v17, %v2182_v29  ;;  %v6064_v14 = vld [vmem:[#allocation62_spill] sm:$0xff] }
 0x326   : > { %v1485_v15 = vmul.f32 %v6054_v11, %v1405_v38  ;;  %v2576_v11 = vadd.f32 %v2575_v22, %v2574_v58  ;;  %v2270_v58 = vsub.f32 1.0, %v2254_v45  ;;  %v2324_v2 = vsel %vm2292_vm13, %v2276_v13, %v2308_v25 }
 0x327   : > { %v4819_v59 = vpop.xlane.xlu1 %1144  ;;  %1278 = vadd.xlane.f32.xlu1 %v4726_v44  ;;  %vm2294_vm0 = vcmp.ge.f32.partialorder %v6064_v14, 0.0  ;;  %v4877_v48 = vmul.f32 %v4722_v8, %v2176_v54  ;;  %v2278_v50 = vsub.f32 1.0, %v2262_v43 }
 0x328   : > { %v4825_v38 = vmul.f32 0.70710677, %v1485_v15  ;;  %v1413_v34 = vsub.f32 %v6058_v31, %v4819_v59  ;;  %v2332_v31 = vadd.f32 1.0, %v2316_v23  ;;  %v2163_v23 = vadd.f32 0.2548296, %v2147_v52 }
 0x329   : > { %v2340_v52 = vadd.f32 1.0, %v2324_v2 }
 0x32a   : > { %v4837_v62 = vand.u32 2147483647, %v4825_v38  ;;  %v1493_v15 = vmul.f32 %v6060_v26, %v1413_v34  ;;  %v2168_v34 = vadd.f32 0.2548296, %v2152_v36  ;;  %v6063_v36 = vsub.f32 1.0, %v4782_v39 }
 0x32b   : > { %v4841_v63 = vpop.xlane.xlu1 %1117  ;;  %1281 = vadd.xlane.f32.xlu1 %v4748_v60  ;;  %v4874_v39 = vmul.f32 0.5, %v2335_v18  ;;  %v2179_v13 = vmul.f32 %v4697_v55, %v2163_v23  ;;  %v4897_v46 = vmul.f32 0.5, %v2332_v31  ;;  %vm1837_vm4 = vcmp.ge.f32.partialorder %v4825_v38, 0.0 }
 0x32c   : > { %v1533_v22 = vmul.f32 0.3275911, %v4837_v62  ;;  %v4848_v35 = vmul.f32 0.70710677, %v1493_v15  ;;  %v1404_v27 = vsub.f32 %v6061_v24, %v4841_v63  ;;  %v2302_v15 = vsub.f32 0.0, %v2270_v58  ;;  %v4887_v60 = vpop.xlane.xlu0 %1126 }
 0x32d   : > { %v2327_v44 = vsel %vm2295_vm12, %v6063_v36, %v2311_v7  ;;  %v2577_v24 = vsel %vm955_vm1, %v2576_v11, 0.0  ;;  %v2184_v17 = vmul.f32 %v4684_v49, %v2168_v34  ;;  %v6065_v7 = vld [vmem:[#allocation96_spill] sm:$0xff]  ;;  %v4902_v43 = vmul.f32 %v4735_v47, %v2179_v13 }
 0x32e   : > { %v1549_v45 = vadd.f32 1.0, %v1533_v22  ;;  %v4855_v20 = vand.u32 2147483647, %v4848_v35  ;;  %v1484_v26 = vmul.f32 %v6062_v30, %v1404_v27  ;;  %v2257_v22 = vmul.f32 %v4658_v5, %v2177_v3  ;;  %v6066_v27 = vld [vmem:[#allocation12_spill] sm:$0xff] }
 0x32f   : > { %v2146_v5 = vmul.f32 %v4743_v57, %v2130_v56  ;;  %vm2289_vm2 = vcmp.ge.f32.partialorder %v6065_v7, 0.0  ;;  %v2318_v49 = vsel %vm2286_vm14, %v2270_v58, %v2302_v15  ;;  %v2343_v18 = vadd.f32 1.0, %v2327_v44  ;;  %1287 = vadd.xlane.f32.xlu1 %v4752_v42  ;;  %v6067_v56 = vld [vmem:[#allocation44_spill] sm:$0xff] }
 0x330   : > { %3115 = vrcp.f32 %v1549_v45  ;;  %v1541_v41 = vmul.f32 0.3275911, %v4855_v20  ;;  %v4867_v0 = vmul.f32 0.70710677, %v1484_v26  ;;  %v2273_v8 = vsub.f32 1.0, %v2257_v22  ;;  %v6068_v47 = vld [vmem:[#allocation68_spill] sm:$0xff] }
 0x331   : > { %v1741_v3 = vsub.f32 0.0, %v4837_v62  ;;  %v1407_v25 = vsub.f32 %v6066_v27, %v4887_v60  ;;  %v4894_v45 = vmul.f32 %v4738_v32, %v2184_v17  ;;  %v2334_v55 = vadd.f32 1.0, %v2318_v49  ;;  %v4907_v32 = vpop.xlane.xlu0 %1150  ;;  %v4914_v22 = vpop.xlane.xlu1 %1141  ;;  %v6069_v17 = vld [vmem:[#allocation13_spill] sm:$0xff] }
 0x332   : > { %v1557_v29 = vadd.f32 1.0, %v1541_v41  ;;  %v4882_v11 = vand.u32 2147483647, %v4867_v0  ;;  %v2272_v58 = vsub.f32 1.0, %v4877_v48  ;;  %v2162_v54 = vadd.f32 0.2548296, %v2146_v5 }
 0x333   : > { %v1487_v30 = vmul.f32 %v6067_v56, %v1407_v25  ;;  %v2310_v15 = vsub.f32 0.0, %v2278_v50  ;;  %v1749_v23 = vsub.f32 0.0, %v4855_v20  ;;  %v4905_v41 = vmul.f32 0.5, %v2343_v18  ;;  %2578 = vadd.xlane.f32.xlu1 %v2577_v24  ;;  %v6070_v5 = vld [vmem:[#allocation11_spill] sm:$0xff]  ;;  %v6071_v25 = vld [vmem:[#allocation56_spill] sm:$0xff] }
 0x334   : > { %3117 = vrcp.f32 %v1557_v29  ;;  %v1532_v34 = vmul.f32 0.3275911, %v4882_v11  ;;  %v4909_v42 = vmul.f32 0.5, %v2340_v52  ;;  %v2305_v31 = vsub.f32 0.0, %v2273_v8  ;;  %1257 = vadd.xlane.f32.xlu0 %v4766_v16  ;;  %v6073_v16 = vld [vmem:[#allocation23_spill] sm:$0xff] }
 0x335   : > { %v1757_v36 = vmul.f32 %v1741_v3, %v4837_v62  ;;  %v4912_v44 = vmul.f32 0.70710677, %v1487_v30  ;;  %v5860_v2 = vsub.f32 1.0, %v4894_v45  ;;  %vm2288_vm3 = vcmp.ge.f32.partialorder %v6068_v47, 0.0 }
 0x336   : > { %v1548_v26 = vadd.f32 1.0, %v1532_v34  ;;  %v1415_v29 = vsub.f32 %v6069_v17, %v4907_v32  ;;  %v1412_v49 = vsub.f32 %v6070_v5, %v4914_v22  ;;  %v4922_v13 = vmul.f32 0.5, %v2334_v55  ;;  %v6072_v55 = vld [vmem:[#allocation53_spill] sm:$0xff] }
 0x337   : > { %v2178_v62 = vmul.f32 %v4743_v57, %v2162_v54  ;;  %v4926_v18 = vand.u32 2147483647, %v4912_v44  ;;  %v2326_v52 = vsel %vm2294_vm0, %v2278_v50, %v2310_v15  ;;  %v2304_v3 = vsub.f32 0.0, %v2272_v58 }
 0x338   : > { %3119 = vrcp.f32 %v1548_v26  ;;  %v1765_v27 = vmul.f32 %v1749_v23, %v4855_v20  ;;  %v1495_v34 = vmul.f32 %v6071_v25, %v1415_v29  ;;  %v1492_v56 = vmul.f32 %v6072_v55, %v1412_v49  ;;  %v4943_v26 = vpop.xlane.xlu1 %1123  ;;  %1284 = vadd.xlane.f32.xlu0 %v4787_v37 }
 0x339   : > { %v2321_v57 = vsel %vm2289_vm2, %v2273_v8, %v2305_v31  ;;  %v1774_v14 = vmul.f32 1.442695, %v1757_v36  ;;  %v1535_v50 = vmul.f32 0.3275911, %v4926_v18  ;;  %v1740_v30 = vsub.f32 0.0, %v4882_v11  ;;  %v6074_v8 = vld [vmem:[#allocation97_spill] sm:$0xff] }
 0x33a   : > { %v2312_v20 = vsub.f32 0.0, %v5860_v2  ;;  %v4950_v17 = vmul.f32 0.70710677, %v1495_v34  ;;  %v4952_v7 = vmul.f32 0.70710677, %v1492_v56  ;;  %vm2296_vm5 = vcmp.ge.f32.partialorder %v6074_v8, 0.0 }
 0x33b   : > { %v1551_v31 = vadd.f32 1.0, %v1535_v50  ;;  %v6075_v36 = vld [vmem:[#allocation14_spill] sm:$0xff]  ;;  %v4957_v5 = vadd.f32 1.0, %v2326_v52  ;;  %v4959_v49 = vadd.f32 1.0, %v2321_v57  ;;  %v1790_v55 = vmul.f32 1.442695, %v1765_v27 }
 0x33c   : > { %v1406_v29 = vsub.f32 %v6075_v36, %v4943_v26  ;;  %v1527_v15 = vand.u32 2147483647, %v4950_v17  ;;  %v4964_v34 = vmul.f32 %v4807_v12, %v2178_v62  ;;  %v1756_v50 = vmul.f32 %v1740_v30, %v4882_v11  ;;  %v6076_v52 = vld [vmem:[#allocation41_spill] sm:$0xff]  ;;  %1290 = vadd.xlane.f32.xlu0 %v4792_v40  ;;  %v6081_v8 = vld [vmem:[#allocation16_spill] sm:$0xff] }
 0x33d   : > { %v4939_v54 = vpop.eup %3115  ;;  %3121 = vrcp.f32 %v1551_v31  ;;  %v1524_v36 = vand.u32 2147483647, %v4952_v7  ;;  %v2320_v12 = vsel %vm2288_vm3, %v2272_v58, %v2304_v3  ;;  %v6077_v11 = vsub.f32 1.0, %v4902_v43  ;;  %v4986_v48 = vpop.xlane.xlu0 %1147 }
 0x33e   : > { %v1597_v23 = vmul.f32 1.0614054, %v4939_v54  ;;  %v1486_v2 = vmul.f32 %v6076_v52, %v1406_v29  ;;  %3123 = vpow2.f32 %v1774_v14  ;;  %v1543_v37 = vmul.f32 0.3275911, %v1527_v15 }
 0x33f   : > { %v4981_v62 = vsub.f32 0.0, %v6077_v11  ;;  %3125 = vpow2.f32 %v1790_v55  ;;  %v1743_v14 = vsub.f32 0.0, %v4926_v18  ;;  %v6078_v11 = vsub.f32 1.0, %v4894_v45 }
 0x340   : > { %v1613_v25 = vadd.f32 -1.4531521, %v1597_v23  ;;  %v1540_v23 = vmul.f32 0.3275911, %v1524_v36  ;;  %v4973_v24 = vmul.f32 0.70710677, %v1486_v2 }
 0x341   : > { %v4966_v56 = vpop.eup %3117  ;;  %v1559_v29 = vadd.f32 1.0, %v1543_v37  ;;  %v4999_v33 = vsel %vm2296_vm5, %v6078_v11, %v2312_v20  ;;  %vm1845_vm6 = vcmp.ge.f32.partialorder %v4848_v35, 0.0  ;;  %vm1836_vm15 = vcmp.ge.f32.partialorder %v4867_v0, 0.0  ;;  %v6086_v35 = vld [vmem:[#allocation18_spill] sm:$0xff] }
 0x342   : > { %v1629_v57 = vmul.f32 %v4939_v54, %v1613_v25  ;;  %v1605_v27 = vmul.f32 1.0614054, %v4966_v56  ;;  %v1772_v25 = vmul.f32 1.442695, %v1756_v50  ;;  %v1556_v2 = vadd.f32 1.0, %v1540_v23  ;;  %v5006_v28 = vpop.xlane.xlu0 %1132 }
 0x343   : > { %v1518_v52 = vand.u32 2147483647, %v4973_v24  ;;  %3127 = vrcp.f32 %v1559_v29  ;;  %v1748_v23 = vsub.f32 0.0, %v1524_v36  ;;  %6080 = vst [vmem:[#allocation69_spill] sm:$0xff] %v5006_v28  ;;  %vm1839_vm10 = vcmp.ge.f32.partialorder %v4912_v44, 0.0 }
 0x344   : > { %v1645_v30 = vadd.f32 1.4214138, %v1629_v57  ;;  %v1621_v31 = vadd.f32 -1.4531521, %v1605_v27  ;;  %v1751_v57 = vsub.f32 0.0, %v1527_v15  ;;  %3129 = vrcp.f32 %v1556_v2 }
 0x345   : > { %v4988_v47 = vpop.eup %3119  ;;  %v1534_v40 = vmul.f32 0.3275911, %v1518_v52  ;;  %v4993_v27 = vadd.f32 1.0, %v2320_v12  ;;  %3131 = vpow2.f32 %v1772_v25  ;;  %v1742_v20 = vsub.f32 0.0, %v1518_v52 }
 0x346   : > { %v1661_v58 = vmul.f32 %v4939_v54, %v1645_v30  ;;  %v1637_v3 = vmul.f32 %v4966_v56, %v1621_v31  ;;  %v1596_v55 = vmul.f32 1.0614054, %v4988_v47  ;;  %v1759_v30 = vmul.f32 %v1743_v14, %v4926_v18 }
 0x347   : > { %v1550_v29 = vadd.f32 1.0, %v1534_v40  ;;  %v1767_v12 = vmul.f32 %v1751_v57, %v1527_v15  ;;  %v1409_v18 = vsub.f32 %v6081_v8, %v5006_v28  ;;  %v6082_v40 = vld [vmem:[#allocation55_spill] sm:$0xff]  ;;  %vm1847_vm12 = vcmp.ge.f32.partialorder %v4950_v17, 0.0 }
 0x348   : > { %v1677_v50 = vadd.f32 -0.28449672, %v1661_v58  ;;  %v1653_v37 = vadd.f32 1.4214138, %v1637_v3  ;;  %v1612_v31 = vadd.f32 -1.4531521, %v1596_v55  ;;  %v1764_v55 = vmul.f32 %v1748_v23, %v1524_v36 }
 0x349   : > { %v6079_v58 = vld [vmem:[#allocation15_spill] sm:$0xff]  ;;  %3133 = vrcp.f32 %v1550_v29  ;;  %v1778_v15 = vmul.f32 1.442695, %v1759_v30  ;;  %v1794_v61 = vmul.f32 1.442695, %v1767_v12  ;;  %vm1844_vm14 = vcmp.ge.f32.partialorder %v4952_v7, 0.0 }
 0x34a   : > { %v1693_v1 = vmul.f32 %v4939_v54, %v1677_v50  ;;  %v1669_v2 = vmul.f32 %v4966_v56, %v1653_v37  ;;  %v1414_v3 = vsub.f32 %v6079_v58, %v4986_v48  ;;  %v1628_v45 = vmul.f32 %v4988_v47, %v1612_v31  ;;  %v6083_v37 = vld [vmem:[#allocation43_spill] sm:$0xff]  ;;  %v5014_v58 = vpop.eup %3121  ;;  %v6095_v7 = vld [vmem:[#allocation28_spill] sm:$0xff] }
 0x34b   : > { %v1489_v11 = vmul.f32 %v6083_v37, %v1409_v18  ;;  %v1599_v36 = vmul.f32 1.0614054, %v5014_v58  ;;  %v1788_v8 = vmul.f32 1.442695, %v1764_v55  ;;  %3135 = vpow2.f32 %v1778_v15 }
 0x34c   : > { %v1709_v14 = vadd.f32 0.2548296, %v1693_v1  ;;  %v1685_v25 = vadd.f32 -0.28449672, %v1669_v2  ;;  %v1494_v50 = vmul.f32 %v6082_v40, %v1414_v3  ;;  %v1644_v57 = vadd.f32 1.4214138, %v1628_v45  ;;  %v3124_v1 = vpop.eup %3123 }
 0x34d   : > { %v1758_v2 = vmul.f32 %v1742_v20, %v1518_v52  ;;  %v5022_v3 = vmul.f32 0.70710677, %v1489_v11  ;;  %v1615_v12 = vadd.f32 -1.4531521, %v1599_v36  ;;  %v6084_v40 = vld [vmem:[#allocation24_spill] sm:$0xff]  ;;  %3137 = vpow2.f32 %v1794_v61 }
 0x34e   : > { %v1725_v31 = vmul.f32 %v4939_v54, %v1709_v14  ;;  %v1701_v29 = vmul.f32 %v4966_v56, %v1685_v25  ;;  %v5018_v10 = vmul.f32 0.70710677, %v1494_v50  ;;  %v1660_v23 = vmul.f32 %v4988_v47, %v1644_v57  ;;  %v3126_v54 = vpop.eup %3125 }
 0x34f   : > { %v5029_v25 = vand.u32 2147483647, %v5022_v3  ;;  %vm1357_vm7 = vcmp.gt.f32.partialorder %v6084_v40, %v4801_v6  ;;  %v1631_v57 = vmul.f32 %v5014_v58, %v1615_v12  ;;  %v1776_v15 = vmul.f32 1.442695, %v1758_v2  ;;  %v6085_v2 = vld [vmem:[#allocation25_spill] sm:$0xff] }
 0x350   : > { %v1805_v30 = vmul.f32 %v3124_v1, %v1725_v31  ;;  %v1717_v45 = vadd.f32 0.2548296, %v1701_v29  ;;  %v5025_v18 = vand.u32 2147483647, %v5018_v10  ;;  %v1676_v14 = vadd.f32 -0.28449672, %v1660_v23  ;;  %v5035_v50 = vpop.eup %3127 }
 0x351   : > { %v1537_v11 = vmul.f32 0.3275911, %v5029_v25  ;;  %v5040_v31 = vpop.eup %3129  ;;  %v1607_v36 = vmul.f32 1.0614054, %v5035_v50  ;;  %3139 = vpow2.f32 %v1788_v8  ;;  %vm1365_vm8 = vcmp.gt.f32.partialorder %v6085_v2, %v4819_v59 }
 0x352   : > { %v1821_v52 = vsub.f32 1.0, %v1805_v30  ;;  %v1733_v20 = vmul.f32 %v4966_v56, %v1717_v45  ;;  %v1542_v55 = vmul.f32 0.3275911, %v5025_v18  ;;  %v1692_v37 = vmul.f32 %v4988_v47, %v1676_v14  ;;  %v3132_v45 = vpop.eup %3131 }
 0x353   : > { %v1647_v56 = vadd.f32 1.4214138, %v1631_v57  ;;  %v1604_v30 = vmul.f32 1.0614054, %v5040_v31  ;;  %v1623_v53 = vadd.f32 -1.4531521, %v1607_v36  ;;  %v5055_v36 = vpop.xlane.xlu1 %1129  ;;  %vm1364_vm2 = vcmp.gt.f32.partialorder %v6095_v7, %v4914_v22 }
 0x354   : > { %v1853_v29 = vsub.f32 0.0, %v1821_v52  ;;  %v1813_v1 = vmul.f32 %v3126_v54, %v1733_v20  ;;  %v1558_v23 = vadd.f32 1.0, %v1542_v55  ;;  %v1708_v61 = vadd.f32 0.2548296, %v1692_v37 }
 0x355   : > { %v1663_v20 = vmul.f32 %v5014_v58, %v1647_v56  ;;  %v1620_v57 = vadd.f32 -1.4531521, %v1604_v30  ;;  %v1639_v38 = vmul.f32 %v5035_v50, %v1623_v53  ;;  %v1745_v59 = vsub.f32 0.0, %v5029_v25 }
 0x356   : > { %v1869_v12 = vsel %vm1837_vm4, %v1821_v52, %v1853_v29  ;;  %v1829_v14 = vsub.f32 1.0, %v1813_v1  ;;  %3141 = vrcp.f32 %v1558_v23  ;;  %v1724_v55 = vmul.f32 %v4988_v47, %v1708_v61  ;;  %v5051_v37 = vpop.eup %3133 }
 0x357   : > { %v1885_v54 = vadd.f32 1.0, %v1869_v12  ;;  %3143 = vpow2.f32 %v1776_v15  ;;  %v1553_v52 = vadd.f32 1.0, %v1537_v11  ;;  %v1679_v19 = vadd.f32 -0.28449672, %v1663_v20 }
 0x358   : > { %v1861_v8 = vsub.f32 0.0, %v1829_v14  ;;  %v1804_v1 = vmul.f32 %v3132_v45, %v1724_v55  ;;  %v1636_v28 = vmul.f32 %v5040_v31, %v1620_v57  ;;  %v1655_v56 = vadd.f32 1.4214138, %v1639_v38 }
 0x359   : > { %v1901_v29 = vmul.f32 0.5, %v1885_v54  ;;  %v1598_v47 = vmul.f32 1.0614054, %v5051_v37  ;;  %v1750_v61 = vsub.f32 0.0, %v5025_v18  ;;  %v1695_v11 = vmul.f32 %v5014_v58, %v1679_v19 }
 0x35a   : > { %v1877_v23 = vsel %vm1845_vm6, %v1829_v14, %v1861_v8  ;;  %v1820_v30 = vsub.f32 1.0, %v1804_v1  ;;  %v1671_v45 = vmul.f32 %v5035_v50, %v1655_v56  ;;  %v1652_v12 = vadd.f32 1.4214138, %v1636_v28  ;;  %v3136_v8 = vpop.eup %3135  ;;  %v6088_v56 = vld [vmem:[#allocation26_spill] sm:$0xff] }
 0x35b   : > { %v2365_v53 = vsel %vm1357_vm7, %v1901_v29, %v4829_v21  ;;  %v1893_v15 = vadd.f32 1.0, %v1877_v23  ;;  %v1614_v54 = vadd.f32 -1.4531521, %v1598_v47  ;;  %v1408_v14 = vsub.f32 %v6086_v35, %v5055_v36  ;;  %v3138_v40 = vpop.eup %3137  ;;  %v6087_v29 = vld [vmem:[#allocation73_spill] sm:$0xff] }
 0x35c   : > { %v1711_v55 = vadd.f32 0.2548296, %v1695_v11  ;;  %v1852_v57 = vsub.f32 0.0, %v1820_v30  ;;  %3145 = vrcp.f32 %v1553_v52  ;;  %v1687_v38 = vadd.f32 -0.28449672, %v1671_v45 }
 0x35d   : > { %v1909_v20 = vmul.f32 0.5, %v1893_v15  ;;  %v1668_v6 = vmul.f32 %v5040_v31, %v1652_v12  ;;  %v1630_v21 = vmul.f32 %v5051_v37, %v1614_v54  ;;  %v1766_v19 = vmul.f32 %v1750_v61, %v5025_v18  ;;  %v6089_v12 = vld [vmem:[#allocation27_spill] sm:$0xff] }
 0x35e   : > { %v2420_v1 = vmul.f32 %v6087_v29, %v2365_v53  ;;  %v1727_v23 = vmul.f32 %v5014_v58, %v1711_v55  ;;  %v1868_v52 = vsel %vm1836_vm15, %v1820_v30, %v1852_v57  ;;  %vm1356_vm9 = vcmp.gt.f32.partialorder %v6088_v56, %v4841_v63 }
 0x35f   : > { %v5077_v28 = vsel %vm1365_vm8, %v1909_v20, %v4846_v4  ;;  %v1884_v47 = vadd.f32 1.0, %v1868_v52  ;;  %v1703_v18 = vmul.f32 %v5035_v50, %v1687_v38  ;;  %v1684_v61 = vadd.f32 -0.28449672, %v1668_v6  ;;  %v3140_v4 = vpop.eup %3139  ;;  %v6090_v20 = vld [vmem:[#allocation45_spill] sm:$0xff] }
 0x360   : > { %v1807_v15 = vmul.f32 %v3136_v8, %v1727_v23  ;;  %v1646_v53 = vadd.f32 1.4214138, %v1630_v21  ;;  %v1792_v0 = vmul.f32 1.442695, %v1766_v19  ;;  %v2436_v45 = vsel %vm955_vm1, %v2420_v1, 0.0  ;;  %v6091_v1 = vld [vmem:[#allocation66_spill] sm:$0xff] }
 0x361   : > { %v1900_v2 = vmul.f32 0.5, %v1884_v47  ;;  %v1719_v11 = vadd.f32 0.2548296, %v1703_v18  ;;  %v1700_v58 = vmul.f32 %v5040_v31, %v1684_v61  ;;  %vm1359_vm11 = vcmp.gt.f32.partialorder %v6089_v12, %v4887_v60 }
 0x362   : > { %v1823_v54 = vsub.f32 1.0, %v1807_v15  ;;  %v1662_v35 = vmul.f32 %v5051_v37, %v1646_v53  ;;  %v1488_v55 = vmul.f32 %v6090_v20, %v1408_v14  ;;  %v1761_v15 = vmul.f32 %v1745_v59, %v5029_v25  ;;  %v5117_v59 = vpop.xlane.xlu1 %1153 }
 0x363   : > { %v5088_v30 = vpop.eup %3141  ;;  %v2364_v57 = vsel %vm1356_vm9, %v1900_v2, %v4897_v46  ;;  %v1735_v8 = vmul.f32 %v5035_v50, %v1719_v11  ;;  %v1716_v38 = vadd.f32 0.2548296, %v1700_v58  ;;  %3147 = vpow2.f32 %v1792_v0 }
 0x364   : > { %v1606_v6 = vmul.f32 1.0614054, %v5088_v30  ;;  %v3144_v21 = vpop.eup %3143  ;;  %v1855_v19 = vsub.f32 0.0, %v1823_v54  ;;  %v2419_v23 = vmul.f32 %v6091_v1, %v2364_v57  ;;  %v1678_v52 = vadd.f32 -0.28449672, %v1662_v35 }
 0x365   : > { %v5102_v47 = vmul.f32 0.70710677, %v1488_v55  ;;  %v1815_v18 = vmul.f32 %v3138_v40, %v1735_v8  ;;  %v1732_v14 = vmul.f32 %v5040_v31, %v1716_v38  ;;  %v5113_v40 = vpop.xlane.xlu0 %1156  ;;  %vm1838_vm3 = vcmp.ge.f32.partialorder %v4973_v24, 0.0 }
 0x366   : > { %v1622_v61 = vadd.f32 -1.4531521, %v1606_v6  ;;  %v1871_v63 = vsel %vm1839_vm10, %v1823_v54, %v1855_v19  ;;  %v2435_v46 = vsel %vm955_vm1, %v2419_v23, 0.0  ;;  %v1694_v50 = vmul.f32 %v5051_v37, %v1678_v52  ;;  %v6092_v23 = vld [vmem:[#allocation98_spill] sm:$0xff] }
 0x367   : > { %v1520_v56 = vand.u32 2147483647, %v5102_v47  ;;  %v1887_v53 = vadd.f32 1.0, %v1871_v63  ;;  %v5111_v2 = vadd.f32 %v2436_v45, %v2435_v46  ;;  %v1831_v11 = vsub.f32 1.0, %v1815_v18  ;;  %v5135_v46 = vpop.xlane.xlu1 %1162 }
 0x368   : > { %v1812_v58 = vmul.f32 %v3140_v4, %v1732_v14  ;;  %v1710_v31 = vadd.f32 0.2548296, %v1694_v50  ;;  %v1638_v25 = vmul.f32 %v5088_v30, %v1622_v61  ;;  %v1782_v19 = vmul.f32 1.442695, %v1761_v15  ;;  %6094 = vst [vmem:[#allocation75_spill] sm:$0xff] %v5135_v46 }
 0x369   : > { %v1536_v44 = vmul.f32 0.3275911, %v1520_v56  ;;  %v5119_v54 = vpop.eup %3145  ;;  %v1903_v35 = vmul.f32 0.5, %v1887_v53  ;;  %v1863_v20 = vsub.f32 0.0, %v1831_v11  ;;  %vm2291_vm13 = vcmp.ge.f32.partialorder %v6092_v23, 0.0  ;;  %v5130_v61 = vpop.xlane.xlu0 %1138 }
 0x36a   : > { %v1828_v55 = vsub.f32 1.0, %v1812_v58  ;;  %v1726_v45 = vmul.f32 %v5051_v37, %v1710_v31  ;;  %v1654_v57 = vadd.f32 1.4214138, %v1638_v25  ;;  %v1601_v4 = vmul.f32 1.0614054, %v5119_v54 }
 0x36b   : > { %v1552_v8 = vadd.f32 1.0, %v1536_v44  ;;  %v2367_v17 = vsel %vm1359_vm11, %v1903_v35, %v4874_v39  ;;  %v1879_v38 = vsel %vm1847_vm12, %v1831_v11, %v1863_v20  ;;  %v2274_v63 = vsub.f32 1.0, %v4964_v34  ;;  %v6093_v39 = vld [vmem:[#allocation29_spill] sm:$0xff]  ;;  %v6096_v44 = vld [vmem:[#allocation19_spill] sm:$0xff]  ;;  %v6108_v34 = vld [vmem:[#allocation30_spill] sm:$0xff] }
 0x36c   : > { %v1860_v6 = vsub.f32 0.0, %v1828_v55  ;;  %v1895_v52 = vadd.f32 1.0, %v1879_v38  ;;  %v1806_v0 = vmul.f32 %v3144_v21, %v1726_v45  ;;  %v1670_v37 = vmul.f32 %v5088_v30, %v1654_v57 }
 0x36d   : > { %v1617_v14 = vadd.f32 -1.4531521, %v1601_v4  ;;  %3149 = vrcp.f32 %v1552_v8  ;;  %vm1367_vm0 = vcmp.gt.f32.partialorder %v6093_v39, %v4907_v32  ;;  %v1744_v31 = vsub.f32 0.0, %v1520_v56  ;;  %v1246_v38 = vpop.xlane.xlu0 %1245 }
 0x36e   : > { %v1876_v18 = vsel %vm1844_vm14, %v1828_v55, %v1860_v6  ;;  %v1911_v60 = vmul.f32 0.5, %v1895_v52  ;;  %v1822_v15 = vsub.f32 1.0, %v1806_v0  ;;  %v1686_v21 = vadd.f32 -0.28449672, %v1670_v37  ;;  %v6099_v0 = vld [vmem:[#allocation52_spill] sm:$0xff]  ;;  %v5164_v37 = vpop.xlane.xlu1 %1135 }
 0x36f   : > { %v1892_v12 = vadd.f32 1.0, %v1876_v18  ;;  %v1633_v50 = vmul.f32 %v5119_v54, %v1617_v14  ;;  %3151 = vpow2.f32 %v1782_v19  ;;  %v1416_v35 = vsub.f32 %v6096_v44, %v5117_v59  ;;  %v6098_v19 = vld [vmem:[#allocation57_spill] sm:$0xff]  ;;  %v6100_v18 = vld [vmem:[#allocation100_spill] sm:$0xff]  ;;  %v6101_v14 = vld [vmem:[#allocation31_spill] sm:$0xff] }
 0x370   : > { %v5141_v53 = vsel %vm1367_vm0, %v1911_v60, %v4905_v41  ;;  %v1854_v58 = vsub.f32 0.0, %v1822_v15  ;;  %v1702_v32 = vmul.f32 %v5088_v30, %v1686_v21  ;;  %v5151_v55 = vmul.f32 0.5, %v4957_v5  ;;  %v6097_v41 = vld [vmem:[#allocation20_spill] sm:$0xff]  ;;  %v3148_v60 = vpop.eup %3147 }
 0x371   : > { %v1908_v11 = vmul.f32 0.5, %v1892_v12  ;;  %v1649_v25 = vadd.f32 1.4214138, %v1633_v50  ;;  %v1411_v45 = vsub.f32 %v6097_v41, %v5130_v61  ;;  %v5156_v24 = vmul.f32 0.5, %v4959_v49  ;;  %v6103_v21 = vld [vmem:[#allocation76_spill] sm:$0xff] }
 0x372   : > { %v1870_v20 = vsel %vm1838_vm3, %v1822_v15, %v1854_v58  ;;  %v1718_v4 = vadd.f32 0.2548296, %v1702_v32  ;;  %v5159_v8 = vadd.f32 1.0, %v4999_v33  ;;  %v1496_v52 = vmul.f32 %v6098_v19, %v1416_v35 }
 0x373   : > { %v5148_v22 = vsel %vm1364_vm2, %v1908_v11, %v4909_v42  ;;  %v1886_v57 = vadd.f32 1.0, %v1870_v20  ;;  %v1665_v6 = vmul.f32 %v5119_v54, %v1649_v25  ;;  %v1760_v42 = vmul.f32 %v1744_v31, %v1520_v56  ;;  %v6105_v31 = vld [vmem:[#allocation79_spill] sm:$0xff] }
 0x374   : > { %v1491_v5 = vmul.f32 %v6099_v0, %v1411_v45  ;;  %vm2290_vm5 = vcmp.ge.f32.partialorder %v6100_v18, 0.0  ;;  %vm1358_vm4 = vcmp.gt.f32.partialorder %v6101_v14, %v4943_v26  ;;  %v1734_v39 = vmul.f32 %v5088_v30, %v1718_v4  ;;  %v6104_v30 = vld [vmem:[#allocation22_spill] sm:$0xff] }
 0x375   : > { %v1902_v49 = vmul.f32 0.5, %v1886_v57  ;;  %v6102_v33 = vsub.f32 1.0, %v4902_v43  ;;  %v1681_v12 = vadd.f32 -0.28449672, %v1665_v6  ;;  %v5175_v15 = vmul.f32 0.70710677, %v1496_v52 }
 0x376   : > { %v5177_v7 = vmul.f32 0.70710677, %v1491_v5  ;;  %3153 = vrcp.f32 %v1246_v38  ;;  %v2422_v50 = vmul.f32 %v6103_v21, %v2367_v17  ;;  %v1814_v11 = vmul.f32 %v3148_v60, %v1734_v39  ;;  %v6106_v45 = vld [vmem:[#allocation58_spill] sm:$0xff] }
 0x377   : > { %v2323_v56 = vsel %vm2291_vm13, %v6102_v33, %v4981_v62  ;;  %v2366_v26 = vsel %vm1358_vm4, %v1902_v49, %v4922_v13  ;;  %v1410_v58 = vsub.f32 %v6104_v30, %v5164_v37  ;;  %v1697_v23 = vmul.f32 %v5119_v54, %v1681_v12 }
 0x378   : > { %v2421_v43 = vmul.f32 %v6105_v31, %v2366_v26  ;;  %v1780_v62 = vmul.f32 1.442695, %v1760_v42  ;;  %v1528_v32 = vand.u32 2147483647, %v5175_v15  ;;  %v1830_v25 = vsub.f32 1.0, %v1814_v11 }
 0x379   : > { %vm1846_vm6 = vcmp.ge.f32.partialorder %v5018_v10, 0.0  ;;  %v5188_v44 = vand.u32 2147483647, %v5177_v7  ;;  %v2306_v13 = vsub.f32 0.0, %v2274_v63  ;;  %v1713_v20 = vadd.f32 0.2548296, %v1697_v23 }
 0x37a   : > { %v5192_v17 = vpop.eup %3149  ;;  %v2438_v35 = vsel %vm955_vm1, %v2421_v43, 0.0  ;;  %v1544_v41 = vmul.f32 0.3275911, %v1528_v32  ;;  %v1490_v57 = vmul.f32 %v6106_v45, %v1410_v58  ;;  %v1862_v38 = vsub.f32 0.0, %v1830_v25 }
 0x37b   : > { %v2439_v4 = vadd.f32 %v2438_v35, %v5111_v2  ;;  %v1600_v6 = vmul.f32 1.0614054, %v5192_v17  ;;  %v1539_v42 = vmul.f32 0.3275911, %v5188_v44  ;;  %v2440_v52 = vsel %vm955_vm1, %v2422_v50, 0.0  ;;  %v5205_v2 = vpop.permute.xlu0 %1464  ;;  %v1463_v35 = vpop.permute.xlu1 %1462 }
 0x37c   : > { %v3152_v19 = vpop.eup %3151  ;;  %v1729_v0 = vmul.f32 %v5119_v54, %v1713_v20  ;;  %3155 = vpow2.f32 %v1780_v62  ;;  %v1560_v5 = vadd.f32 1.0, %v1544_v41  ;;  %v1878_v14 = vsel %vm1846_vm6, %v1830_v25, %v1862_v38 }
 0x37d   : > { %v5203_v49 = vadd.f32 %v2440_v52, %v2439_v4  ;;  %v1616_v39 = vadd.f32 -1.4531521, %v1600_v6  ;;  %v1555_v33 = vadd.f32 1.0, %v1539_v42  ;;  %v1894_v60 = vadd.f32 1.0, %v1878_v14  ;;  %v6110_v52 = vld [vmem:[#allocation81_spill] sm:$0xff] }
 0x37e   : > { %v1809_v12 = vmul.f32 %v3152_v19, %v1729_v0  ;;  %3157 = vrcp.f32 %v1560_v5  ;;  %v2322_v50 = vsel %vm2290_vm5, %v2274_v63, %v2306_v13  ;;  %v5212_v54 = vmul.f32 0.5, %v4993_v27 }
 0x37f   : > { %v1632_v10 = vmul.f32 %v5192_v17, %v1616_v39  ;;  %3159 = vrcp.f32 %v1555_v33  ;;  %v5215_v26 = vmul.f32 0.70710677, %v1490_v57  ;;  %v1910_v11 = vmul.f32 0.5, %v1894_v60 }
 0x380   : > { %v1825_v30 = vsub.f32 1.0, %v1809_v12  ;;  %v2339_v58 = vadd.f32 1.0, %v2323_v56  ;;  %v6107_v43 = vsub.f32 %v6073_v16, %v4621_v9  ;;  %vm1366_vm7 = vcmp.gt.f32.partialorder %v6108_v34, %v4986_v48 }
 0x381   : > { %v1648_v63 = vadd.f32 1.4214138, %v1632_v10  ;;  %v2338_v18 = vadd.f32 1.0, %v2322_v50  ;;  %v5224_v27 = vand.u32 2147483647, %v5215_v26  ;;  %v5227_v62 = vsel %vm1366_vm7, %v1910_v11, %v5151_v55  ;;  %v6109_v55 = vld [vmem:[#allocation89_spill] sm:$0xff] }
 0x382   : > { %v1946_v23 = vmul.f32 %v6107_v43, %v5205_v2  ;;  %v1857_v25 = vsub.f32 0.0, %v1825_v30  ;;  %v1752_v13 = vsub.f32 0.0, %v1528_v32  ;;  %vm1841_vm8 = vcmp.ge.f32.partialorder %v5022_v3, 0.0  ;;  %v6111_v50 = vld [vmem:[#allocation69_spill] sm:$0xff] }
 0x383   : > { %v3154_v20 = vpop.eup %3153  ;;  %v1664_v9 = vmul.f32 %v5192_v17, %v1648_v63  ;;  %v1417_v48 = vsub.f32 %v6043_v51, %v5113_v40  ;;  %v1538_v41 = vmul.f32 0.3275911, %v5224_v27  ;;  %v1747_v57 = vsub.f32 0.0, %v5188_v44  ;;  %v6112_v10 = vld [vmem:[#allocation33_spill] sm:$0xff] }
 0x384   : > { %v5229_v56 = vmul.f32 0.70710677, %v1946_v23  ;;  %v1873_v45 = vsel %vm1841_vm8, %v1825_v30, %v1857_v25  ;;  %v1293_v4 = vmul.f32 %v3154_v20, %v6109_v55  ;;  %v2428_v0 = vmul.f32 %v6110_v52, %v5077_v28 }
 0x385   : > { %v1889_v3 = vadd.f32 1.0, %v1873_v45  ;;  %v1680_v6 = vadd.f32 -0.28449672, %v1664_v9  ;;  %v1554_v42 = vadd.f32 1.0, %v1538_v41  ;;  %v1497_v19 = vmul.f32 %v1463_v35, %v1417_v48  ;;  %v6117_v45 = vld [vmem:[#allocation21_spill] sm:$0xff] }
 0x386   : > { %v5239_v38 = vand.u32 2147483647, %v5229_v56  ;;  %v1768_v5 = vmul.f32 %v1752_v13, %v1528_v32  ;;  %v5250_v14 = vmul.f32 %v6091_v1, %v1293_v4  ;;  %v5255_v12 = vmul.f32 0.5, %v5159_v8  ;;  %v6113_v8 = vld [vmem:[#allocation82_spill] sm:$0xff] }
 0x387   : > { %v1905_v33 = vmul.f32 0.5, %v1889_v3  ;;  %v1696_v60 = vmul.f32 %v5192_v17, %v1680_v6  ;;  %3161 = vrcp.f32 %v1554_v42  ;;  %vm1361_vm15 = vcmp.gt.f32.partialorder %v6112_v10, %v6111_v50  ;;  %v6120_v10 = vld [vmem:[#allocation77_spill] sm:$0xff] }
 0x388   : > { %v1994_v39 = vmul.f32 0.3275911, %v5239_v38  ;;  %v5259_v11 = vmul.f32 0.5, %v2339_v58  ;;  %v1763_v28 = vmul.f32 %v1747_v57, %v5188_v44  ;;  %1340 = vst.msk [vmem:[%s5245_s16] sm:$0xff] %vm955_vm1, %v5250_v14  ;;  %v5266_v23 = vmul.f32 0.70710677, %v1497_v19  ;;  %v5299_v50 = vpop.xlane.xlu0 %1159 }
 0x389   : > { %v3156_v32 = vpop.eup %3155  ;;  %v2369_v30 = vsel %vm1361_vm15, %v1905_v33, %v5156_v24  ;;  %v1712_v43 = vadd.f32 0.2548296, %v1696_v60  ;;  %v6114_v34 = vsub.f32 %v6043_v51, %v6113_v8  ;;  %v5272_v25 = vsel %vm955_vm1, %v2428_v0, 0.0  ;;  %v6115_v58 = vld [vmem:[#allocation83_spill] sm:$0xff]  ;;  %v6118_v0 = vld [vmem:[#allocation32_spill] sm:$0xff]  ;;  %6119 = vst [vmem:[#allocation74_spill] sm:$0xff] %v5299_v50 }
 0x38a   : > { %v2010_v1 = vadd.f32 1.0, %v1994_v39  ;;  %v2430_v44 = vmul.f32 %v6115_v58, %v5141_v53  ;;  %v1796_v13 = vmul.f32 1.442695, %v1768_v5  ;;  %v5276_v20 = vmul.f32 0.5, %v2338_v18 }
 0x38b   : > { %v1945_v63 = vmul.f32 %v6114_v34, %v1463_v35  ;;  %v5278_v9 = vpop.eup %3157  ;;  %v1728_v24 = vmul.f32 %v5192_v17, %v1712_v43  ;;  %v1746_v48 = vsub.f32 0.0, %v5224_v27  ;;  %v1529_v41 = vand.u32 2147483647, %v5266_v23  ;;  %v6116_v35 = vld [vmem:[#allocation90_spill] sm:$0xff] }
 0x38c   : > { %3163 = vrcp.f32 %v2010_v1  ;;  %v5283_v51 = vpop.eup %3159  ;;  %v1608_v55 = vmul.f32 1.0614054, %v5278_v9  ;;  %v1786_v53 = vmul.f32 1.442695, %v1763_v28  ;;  %vm1840_vm9 = vcmp.ge.f32.partialorder %v5102_v47, 0.0 }
 0x38d   : > { %v5288_v4 = vmul.f32 0.70710677, %v1945_v63  ;;  %v1808_v18 = vmul.f32 %v3156_v32, %v1728_v24  ;;  %v1603_v17 = vmul.f32 1.0614054, %v5283_v51  ;;  %v1545_v3 = vmul.f32 0.3275911, %v1529_v41  ;;  %v1249_v24 = vpop.xlane.xlu1 %1248 }
 0x38e   : > { %v5293_v6 = vsel %vm955_vm1, %v2430_v44, 0.0  ;;  %v1624_v42 = vadd.f32 -1.4531521, %v1608_v55  ;;  %3165 = vpow2.f32 %v1796_v13  ;;  %vm1360_vm10 = vcmp.gt.f32.partialorder %v6118_v0, %v5055_v36 }
 0x38f   : > { %v1977_v19 = vand.u32 2147483647, %v5288_v4  ;;  %v1824_v5 = vsub.f32 1.0, %v1808_v18  ;;  %v1619_v39 = vadd.f32 -1.4531521, %v1603_v17  ;;  %v1762_v33 = vmul.f32 %v1746_v48, %v5224_v27  ;;  %v5314_v17 = vpop.permute.xlu0 %1466 }
 0x390   : > { %v1561_v60 = vadd.f32 1.0, %v1545_v3  ;;  %v5303_v28 = vmul.f32 %v6120_v10, %v5148_v22  ;;  %v1640_v1 = vmul.f32 %v5278_v9, %v1624_v42  ;;  %3167 = vpow2.f32 %v1786_v53  ;;  %v6121_v22 = vld [vmem:[#allocation80_spill] sm:$0xff] }
 0x391   : > { %v1993_v32 = vmul.f32 0.3275911, %v1977_v19  ;;  %v1856_v43 = vsub.f32 0.0, %v1824_v5  ;;  %v1635_v8 = vmul.f32 %v5283_v51, %v1619_v39  ;;  %v1419_v34 = vsub.f32 %v6117_v45, %v5135_v46 }
 0x392   : > { %3169 = vrcp.f32 %v1561_v60  ;;  %v1656_v63 = vadd.f32 1.4214138, %v1640_v1  ;;  %v1753_v27 = vsub.f32 0.0, %v1529_v41  ;;  %v1418_v13 = vsub.f32 %v6073_v16, %v5299_v50 }
 0x393   : > { %v2009_v44 = vadd.f32 1.0, %v1993_v32  ;;  %v2424_v48 = vmul.f32 %v6121_v22, %v2369_v30  ;;  %v1872_v55 = vsel %vm1840_vm9, %v1824_v5, %v1856_v43  ;;  %v1651_v53 = vadd.f32 1.4214138, %v1635_v8  ;;  %v1252_v43 = vpop.xlane.xlu1 %1251 }
 0x394   : > { %v1784_v18 = vmul.f32 1.442695, %v1762_v33  ;;  %v5316_v3 = vpop.eup %3161  ;;  %v1888_v42 = vadd.f32 1.0, %v1872_v55  ;;  %v1672_v39 = vmul.f32 %v5278_v9, %v1656_v63  ;;  %v2201_v60 = vsub.f32 0.0, %v1977_v19 }
 0x395   : > { %3171 = vrcp.f32 %v2009_v44  ;;  %v1667_v1 = vmul.f32 %v5283_v51, %v1651_v53  ;;  %v1602_v16 = vmul.f32 1.0614054, %v5316_v3  ;;  %v1498_v30 = vmul.f32 %v5205_v2, %v1418_v13 }
 0x396   : > { %3173 = vrcp.f32 %v1249_v24  ;;  %v1904_v47 = vmul.f32 0.5, %v1888_v42  ;;  %v1688_v5 = vadd.f32 -0.28449672, %v1672_v39  ;;  %v1769_v32 = vmul.f32 %v1753_v27, %v1529_v41  ;;  %v6123_v41 = vld [vmem:[#allocation71_spill] sm:$0xff]  ;;  %v6124_v42 = vld [vmem:[#allocation86_spill] sm:$0xff] }
 0x397   : > { %v1499_v33 = vmul.f32 %v5314_v17, %v1419_v34  ;;  %v1683_v8 = vadd.f32 -0.28449672, %v1667_v1  ;;  %v1618_v57 = vadd.f32 -1.4531521, %v1602_v16  ;;  %3175 = vpow2.f32 %v1784_v18 }
 0x398   : > { %v5323_v55 = vmul.f32 0.70710677, %v1498_v30  ;;  %v2368_v44 = vsel %vm1360_vm10, %v1904_v47, %v5212_v54  ;;  %v1704_v2 = vmul.f32 %v5278_v9, %v1688_v5  ;;  %v2217_v13 = vmul.f32 %v2201_v60, %v1977_v19  ;;  %v5345_v19 = vpop.xlane.xlu1 %1254 }
 0x399   : > { %v5325_v63 = vpop.eup %3163  ;;  %v5332_v24 = vmul.f32 0.70710677, %v1499_v33  ;;  %v2423_v34 = vmul.f32 %v6123_v41, %v2368_v44  ;;  %v1699_v27 = vmul.f32 %v5283_v51, %v1683_v8  ;;  %v1634_v53 = vmul.f32 %v5316_v3, %v1618_v57 }
 0x39a   : > { %v2058_v18 = vmul.f32 1.0614054, %v5325_v63  ;;  %v5340_v39 = vmul.f32 %v6124_v42, %v5227_v62  ;;  %v1720_v1 = vadd.f32 0.2548296, %v1704_v2  ;;  %v1798_v36 = vmul.f32 1.442695, %v1769_v32 }
 0x39b   : > { %6122 = vst [vmem:[#allocation61_spill] sm:$0xff] %v5332_v24  ;;  %v5343_v54 = vand.u32 2147483647, %v5323_v55  ;;  %v3166_v0 = vpop.eup %3165  ;;  %v2444_v60 = vsel %vm955_vm1, %v2424_v48, 0.0  ;;  %v2442_v16 = vsel %vm955_vm1, %v2423_v34, 0.0  ;;  %vm1848_vm11 = vcmp.ge.f32.partialorder %v5175_v15, 0.0 }
 0x39c   : > { %v1715_v57 = vadd.f32 0.2548296, %v1699_v27  ;;  %v1650_v30 = vadd.f32 1.4214138, %v1634_v53  ;;  %v2443_v47 = vadd.f32 %v2442_v16, %v5203_v49  ;;  %v1736_v62 = vmul.f32 %v5278_v9, %v1720_v1 }
 0x39d   : > { %vm1843_vm12 = vcmp.ge.f32.partialorder %v5177_v7, 0.0  ;;  %v2074_v5 = vadd.f32 -1.4531521, %v2058_v18  ;;  %v1546_v32 = vmul.f32 0.3275911, %v5343_v54  ;;  %v3168_v33 = vpop.eup %3167  ;;  %v2202_v9 = vsub.f32 0.0, %v5239_v38  ;;  %v5364_v18 = vpop.xlane.xlu1 %1260 }
 0x39e   : > { %v1731_v8 = vmul.f32 %v5283_v51, %v1715_v57  ;;  %v1666_v48 = vmul.f32 %v5316_v3, %v1650_v30  ;;  %v2246_v44 = vmul.f32 1.442695, %v2217_v13  ;;  %v5357_v2 = vand.u32 2147483647, %v5332_v24  ;;  %v6125_v13 = vld [vmem:[#allocation35_spill] sm:$0xff] }
 0x39f   : > { %v5359_v34 = vpop.eup %3169  ;;  %v1816_v27 = vmul.f32 %v3166_v0, %v1736_v62  ;;  %v5361_v49 = vadd.f32 %v2444_v60, %v2443_v47  ;;  %v1562_v53 = vadd.f32 1.0, %v1546_v32  ;;  %3177 = vpow2.f32 %v1798_v36  ;;  %v6126_v47 = vld [vmem:[#allocation36_spill] sm:$0xff] }
 0x3a0   : > { %v1811_v1 = vmul.f32 %v3168_v33, %v1731_v8  ;;  %v1682_v16 = vadd.f32 -0.28449672, %v1666_v48  ;;  %v1609_v51 = vmul.f32 1.0614054, %v5359_v34  ;;  %vm1368_vm13 = vcmp.gt.f32.partialorder %v6125_v13, %v5117_v59 }
 0x3a1   : > { %v1832_v57 = vsub.f32 1.0, %v1816_v27  ;;  %v2090_v30 = vmul.f32 %v5325_v63, %v2074_v5  ;;  %3179 = vrcp.f32 %v1562_v53  ;;  %v1547_v0 = vmul.f32 0.3275911, %v5357_v2  ;;  %v5378_v5 = vpop.xlane.xlu1 %1266 }
 0x3a2   : > { %v5371_v60 = vpop.eup %3171  ;;  %vm1363_vm14 = vcmp.gt.f32.partialorder %v6126_v47, %v5130_v61  ;;  %v1827_v62 = vsub.f32 1.0, %v1811_v1  ;;  %v1698_v32 = vmul.f32 %v5316_v3, %v1682_v16  ;;  %v1625_v33 = vadd.f32 -1.4531521, %v1609_v51  ;;  %v6127_v51 = vld [vmem:[#allocation59_spill] sm:$0xff] }
 0x3a3   : > { %3181 = vpow2.f32 %v2246_v44  ;;  %v3174_v36 = vpop.eup %3173  ;;  %v1864_v8 = vsub.f32 0.0, %v1832_v57  ;;  %v2218_v48 = vmul.f32 %v2202_v9, %v5239_v38  ;;  %v2057_v27 = vmul.f32 1.0614054, %v5371_v60 }
 0x3a4   : > { %3183 = vrcp.f32 %v1252_v43  ;;  %v1859_v53 = vsub.f32 0.0, %v1827_v62  ;;  %v1714_v46 = vadd.f32 0.2548296, %v1698_v32  ;;  %v1641_v50 = vmul.f32 %v5359_v34, %v1625_v33  ;;  %v3176_v24 = vpop.eup %3175 }
 0x3a5   : > { %v1563_v41 = vadd.f32 1.0, %v1547_v0  ;;  %v1880_v1 = vsel %vm1848_vm11, %v1832_v57, %v1864_v8  ;;  %v2106_v16 = vadd.f32 1.4214138, %v2090_v30  ;;  %v2073_v44 = vadd.f32 -1.4531521, %v2057_v27  ;;  %v5392_v57 = vpop.xlane.xlu1 %1269 }
 0x3a6   : > { %v1295_v58 = vmul.f32 %v3174_v36, %v6127_v51  ;;  %v1896_v42 = vadd.f32 1.0, %v1880_v1  ;;  %v1875_v38 = vsel %vm1843_vm12, %v1827_v62, %v1859_v53  ;;  %v1730_v43 = vmul.f32 %v5316_v3, %v1714_v46 }
 0x3a7   : > { %v1657_v9 = vadd.f32 1.4214138, %v1641_v50  ;;  %v1891_v32 = vadd.f32 1.0, %v1875_v38  ;;  %v2089_v33 = vmul.f32 %v5371_v60, %v2073_v44  ;;  %v1754_v0 = vsub.f32 0.0, %v5343_v54 }
 0x3a8   : > { %v5390_v15 = vmul.f32 %v6087_v29, %v1295_v58  ;;  %v1912_v30 = vmul.f32 0.5, %v1896_v42  ;;  %v1810_v36 = vmul.f32 %v3176_v24, %v1730_v43  ;;  %3185 = vrcp.f32 %v1563_v41 }
 0x3a9   : > { %v1673_v8 = vmul.f32 %v5359_v34, %v1657_v9  ;;  %v1907_v7 = vmul.f32 0.5, %v1891_v32  ;;  %v2122_v62 = vmul.f32 %v5325_v63, %v2106_v16  ;;  %v2105_v46 = vadd.f32 1.4214138, %v2089_v33  ;;  %v5420_v59 = vpop.xlane.xlu1 %1272 }
 0x3aa   : > { %1341 = vst.msk [vmem:[%s5245_s16 + $0x8] sm:$0xff] %vm955_vm1, %v5390_v15  ;;  %v6128_v50 = vsub.f32 %v6117_v45, %v6116_v35  ;;  %v5407_v58 = vsel %vm1368_vm13, %v1912_v30, %v5255_v12  ;;  %v1826_v3 = vsub.f32 1.0, %v1810_v36  ;;  %3187 = vrcp.f32 %v5345_v19 }
 0x3ab   : > { %v1689_v24 = vadd.f32 -0.28449672, %v1673_v8  ;;  %v5412_v41 = vsel %vm955_vm1, %v5303_v28, 0.0  ;;  %v2371_v35 = vsel %vm1363_vm14, %v1907_v7, %v5259_v11  ;;  %v2121_v45 = vmul.f32 %v5371_v60, %v2105_v46  ;;  %v6129_v28 = vld [vmem:[#allocation37_spill] sm:$0xff] }
 0x3ac   : > { %v1947_v29 = vmul.f32 %v6128_v50, %v5314_v17  ;;  %v1770_v17 = vmul.f32 %v1754_v0, %v5343_v54  ;;  %vm1842_vm0 = vcmp.ge.f32.partialorder %v5215_v26, 0.0  ;;  %v1858_v12 = vsub.f32 0.0, %v1826_v3  ;;  %v3178_v13 = vpop.eup %3177 }
 0x3ad   : > { %v2248_v42 = vmul.f32 1.442695, %v2218_v48  ;;  %v1705_v19 = vmul.f32 %v5359_v34, %v1689_v24  ;;  %vm1362_vm2 = vcmp.gt.f32.partialorder %v6129_v28, %v5164_v37  ;;  %v2138_v27 = vadd.f32 -0.28449672, %v2122_v62  ;;  %v5437_v43 = vpop.xlane.xlu1 %1263  ;;  %v6132_v37 = vld [vmem:[#allocation47_spill] sm:$0xff] }
 0x3ae   : > { %v2137_v53 = vadd.f32 -0.28449672, %v2121_v45  ;;  %v5426_v61 = vmul.f32 0.70710677, %v1947_v29  ;;  %v5428_v11 = vpop.eup %3179  ;;  %v5432_v54 = vsel %vm955_vm1, %v5340_v39, 0.0  ;;  %v1874_v47 = vsel %vm1842_vm0, %v1826_v3, %v1858_v12  ;;  %v6130_v3 = vld [vmem:[#allocation84_spill] sm:$0xff] }
 0x3af   : > { %v1721_v26 = vadd.f32 0.2548296, %v1705_v19  ;;  %v1755_v48 = vsub.f32 0.0, %v5357_v2  ;;  %v1890_v16 = vadd.f32 1.0, %v1874_v47  ;;  %v1610_v51 = vmul.f32 1.0614054, %v5428_v11 }
 0x3b0   : > { %v3182_v1 = vpop.eup %3181  ;;  %v2153_v44 = vmul.f32 %v5371_v60, %v2137_v53  ;;  %v1800_v38 = vmul.f32 1.442695, %v1770_v17  ;;  %3189 = vpow2.f32 %v2248_v42  ;;  %vm1849_vm3 = vcmp.ge.f32.partialorder %v5266_v23, 0.0  ;;  %v6131_v45 = vld [vmem:[#allocation46_spill] sm:$0xff]  ;;  %v6134_v23 = vld [vmem:[#allocation48_spill] sm:$0xff] }
 0x3b1   : > { %v3184_v9 = vpop.eup %3183  ;;  %v1737_v32 = vmul.f32 %v5359_v34, %v1721_v26  ;;  %v5442_v39 = vand.u32 2147483647, %v5426_v61  ;;  %v1906_v33 = vmul.f32 0.5, %v1890_v16  ;;  %v2154_v0 = vmul.f32 %v5325_v63, %v2138_v27  ;;  %v5454_v29 = vpop.xlane.xlu1 %1275 }
 0x3b2   : > { %v2169_v30 = vadd.f32 0.2548296, %v2153_v44  ;;  %v1626_v36 = vadd.f32 -1.4531521, %v1610_v51  ;;  %vm2297_vm5 = vcmp.ge.f32.partialorder %v5288_v4, 0.0  ;;  %v1771_v7 = vmul.f32 %v1755_v48, %v5357_v2  ;;  %v6135_v4 = vld [vmem:[#allocation87_spill] sm:$0xff] }
 0x3b3   : > { %v1817_v8 = vmul.f32 %v3178_v13, %v1737_v32  ;;  %v1995_v62 = vmul.f32 0.3275911, %v5442_v39  ;;  %v2370_v34 = vsel %vm1362_vm2, %v1906_v33, %v5276_v20  ;;  %3191 = vpow2.f32 %v1800_v38 }
 0x3b4   : > { %v2185_v46 = vmul.f32 %v5371_v60, %v2169_v30  ;;  %v1642_v50 = vmul.f32 %v5428_v11, %v1626_v36  ;;  %v2426_v24 = vmul.f32 %v6130_v3, %v2371_v35  ;;  %v2425_v17 = vmul.f32 %v6131_v45, %v2370_v34  ;;  %v6133_v35 = vld [vmem:[#allocation34_spill] sm:$0xff] }
 0x3b5   : > { %v1833_v12 = vsub.f32 1.0, %v1817_v8  ;;  %v2011_v2 = vadd.f32 1.0, %v1995_v62  ;;  %v5458_v42 = vpop.eup %3185  ;;  %v2170_v19 = vadd.f32 0.2548296, %v2154_v0  ;;  %v1297_v20 = vmul.f32 %v3184_v9, %v6132_v37  ;;  %v1279_v44 = vpop.xlane.xlu1 %1278 }
 0x3b6   : > { %v2265_v13 = vmul.f32 %v3182_v1, %v2185_v46  ;;  %v1658_v27 = vadd.f32 1.4214138, %v1642_v50  ;;  %v2446_v60 = vsel %vm955_vm1, %v2425_v17, 0.0  ;;  %v1611_v53 = vmul.f32 1.0614054, %v5458_v42 }
 0x3b7   : > { %v1865_v28 = vsub.f32 0.0, %v1833_v12  ;;  %v1802_v47 = vmul.f32 1.442695, %v1771_v7  ;;  %v3188_v26 = vpop.eup %3187  ;;  %vm1369_vm4 = vcmp.gt.f32.partialorder %v6133_v35, %v5113_v40  ;;  %v2447_v48 = vadd.f32 %v2446_v60, %v5361_v49 }
 0x3b8   : > { %v2281_v16 = vsub.f32 1.0, %v2265_v13  ;;  %v1674_v1 = vmul.f32 %v5428_v11, %v1658_v27  ;;  %3193 = vrcp.f32 %v2011_v2  ;;  %v2448_v51 = vsel %vm955_vm1, %v2426_v24, 0.0 }
 0x3b9   : > { %v1881_v38 = vsel %vm1849_vm3, %v1833_v12, %v1865_v28  ;;  %v1627_v9 = vadd.f32 -1.4531521, %v1611_v53  ;;  %v5471_v32 = vmul.f32 %v6105_v31, %v1297_v20  ;;  %v2449_v33 = vadd.f32 %v2448_v51, %v2447_v48  ;;  %v1282_v46 = vpop.xlane.xlu1 %1281 }
 0x3ba   : > { %v1897_v0 = vadd.f32 1.0, %v1881_v38  ;;  %v2313_v30 = vsub.f32 0.0, %v2281_v16  ;;  %v1690_v36 = vadd.f32 -0.28449672, %v1674_v1  ;;  %v2186_v49 = vmul.f32 %v5325_v63, %v2170_v19 }
 0x3bb   : > { %v1643_v8 = vmul.f32 %v5458_v42, %v1627_v9  ;;  %3195 = vpow2.f32 %v1802_v47  ;;  %1342 = vst.msk [vmem:[%s5245_s16 + $0x10] sm:$0xff] %vm955_vm1, %v5471_v32  ;;  %v1299_v7 = vmul.f32 %v3188_v26, %v6134_v23  ;;  %v2451_v31 = vadd.f32 %v5412_v41, %v2449_v33  ;;  %v6136_v47 = vld [vmem:[#allocation70_spill] sm:$0xff] }
 0x3bc   : > { %v2329_v62 = vsel %vm2297_vm5, %v2281_v16, %v2313_v30  ;;  %v1706_v34 = vmul.f32 %v5428_v11, %v1690_v36  ;;  %v2203_v63 = vsub.f32 0.0, %v5442_v39  ;;  %v1913_v50 = vmul.f32 0.5, %v1897_v0 }
 0x3bd   : > { %v2345_v24 = vadd.f32 1.0, %v2329_v62  ;;  %v1659_v17 = vadd.f32 1.4214138, %v1643_v8  ;;  %v5486_v12 = vmul.f32 %v6103_v21, %v1299_v7  ;;  %v3190_v2 = vpop.eup %3189  ;;  %v2453_v19 = vadd.f32 %v5272_v25, %v2451_v31  ;;  %v1288_v20 = vpop.xlane.xlu1 %1287  ;;  %v6137_v31 = vld [vmem:[#allocation50_spill] sm:$0xff] }
 0x3be   : > { %v1722_v13 = vadd.f32 0.2548296, %v1706_v34  ;;  %3197 = vrcp.f32 %v5364_v18  ;;  %vm2580_vm6 = vcmask 0   ;;  %v2431_v41 = vmul.f32 %v6135_v4, %v5407_v58 }
 0x3bf   : > { %v2361_v27 = vmul.f32 0.5, %v2345_v24  ;;  %v1675_v37 = vmul.f32 %v5458_v42, %v1659_v17  ;;  %1343 = vst.msk [vmem:[%s5245_s16 + $0x18] sm:$0xff] %vm955_vm1, %v5486_v12  ;;  %3199 = vrcp.f32 %v5378_v5  ;;  %v2266_v21 = vmul.f32 %v3190_v2, %v2186_v49 }
 0x3c0   : > { %v1738_v25 = vmul.f32 %v5428_v11, %v1722_v13  ;;  %v2455_v18 = vadd.f32 %v5432_v54, %v2453_v19  ;;  %3201 = vrcp.f32 %v5392_v57  ;;  %v3192_v60 = vpop.eup %3191  ;;  %v2219_v53 = vmul.f32 %v2203_v63, %v5442_v39 }
 0x3c1   : > { %v2377_v58 = vsel %vm1369_vm4, %v1913_v50, %v2361_v27  ;;  %v1691_v28 = vadd.f32 -0.28449672, %v1675_v37  ;;  %3203 = vrcp.f32 %v5420_v59  ;;  %v2458_v57 = vsel %vm955_vm1, %v2431_v41, 0.0  ;;  %v2579_v59 = vpop.xlane.xlu1 %2578  ;;  %v6138_v50 = vld [vmem:[#allocation91_spill] sm:$0xff] }
 0x3c2   : > { %v2432_v5 = vmul.f32 %v6136_v47, %v2377_v58  ;;  %v1818_v26 = vmul.f32 %v3192_v60, %v1738_v25  ;;  %v2457_v11 = vadd.f32 %v5293_v6, %v2455_v18  ;;  %3205 = vrcp.f32 %v5437_v43  ;;  %2581 = vst.msk [vmem:[%s303_s19] sm:$0x1] %vm2580_vm6, %v2579_v59 }
 0x3c3   : > { %v1707_v40 = vmul.f32 %v5458_v42, %v1691_v28  ;;  %3207 = vrcp.f32 %v5454_v29  ;;  %v2282_v54 = vsub.f32 1.0, %v2266_v21  ;;  %v2250_v43 = vmul.f32 1.442695, %v2219_v53  ;;  %v1258_v29 = vpop.xlane.xlu0 %1257 }
 0x3c4   : > { %v2459_v39 = vadd.f32 %v2458_v57, %v2457_v11  ;;  %3209 = vrcp.f32 %v1279_v44  ;;  %v2460_v6 = vsel %vm955_vm1, %v2432_v5, 0.0  ;;  %v1834_v16 = vsub.f32 1.0, %v1818_v26  ;;  %v6141_v11 = vld [vmem:[#allocation94_spill] sm:$0xff] }
 0x3c5   : > { %v5520_v35 = vpop.eup %3193  ;;  %v1723_v48 = vadd.f32 0.2548296, %v1707_v40  ;;  %3211 = vrcp.f32 %v1282_v46  ;;  %v2314_v33 = vsub.f32 0.0, %v2282_v54  ;;  %v2380_v7 = vsel %vm955_vm1, %v5250_v14, 0.0  ;;  %v6139_v14 = vld [vmem:[#allocation92_spill] sm:$0xff]  ;;  %v6142_v40 = vld [vmem:[#allocation63_spill] sm:$0xff] }
 0x3c6   : > { %v5524_v1 = vadd.f32 %v2460_v6, %v2459_v39  ;;  %v2059_v51 = vmul.f32 1.0614054, %v5520_v35  ;;  %3213 = vrcp.f32 %v1288_v20  ;;  %v1866_v0 = vsub.f32 0.0, %v1834_v16 }
 0x3c7   : > { %v1739_v38 = vmul.f32 %v5458_v42, %v1723_v48  ;;  %3215 = vrcp.f32 %v1258_v29  ;;  %v1285_v36 = vpop.xlane.xlu0 %1284  ;;  %vm2298_vm7 = vcmp.ge.f32.partialorder %v5229_v56, 0.0  ;;  %vm1850_vm8 = vcmp.ge.f32.partialorder %v5323_v55, 0.0  ;;  %v6145_v29 = vld [vmem:[#allocation86_spill] sm:$0xff] }
 0x3c8   : > { %v3196_v44 = vpop.eup %3195  ;;  %v2075_v9 = vadd.f32 -1.4531521, %v2059_v51  ;;  %3217 = vpow2.f32 %v2250_v43  ;;  %v2330_v63 = vsel %vm2298_vm7, %v2282_v54, %v2314_v33  ;;  %v2381_v46 = vsel %vm955_vm1, %v5390_v15, 0.0  ;;  %v6140_v15 = vld [vmem:[#allocation93_spill] sm:$0xff]  ;;  %v6147_v33 = vld [vmem:[#allocation83_spill] sm:$0xff] }
 0x3c9   : > { %v5529_v8 = vmul.f32 %v3196_v44, %v1739_v38  ;;  %3219 = vrcp.f32 %v1285_v36  ;;  %v1882_v2 = vsel %vm1850_vm8, %v1834_v16, %v1866_v0  ;;  %v2382_v18 = vadd.f32 %v2381_v46, %v2380_v7  ;;  %v6146_v38 = vld [vmem:[#allocation17_spill] sm:$0xff]  ;;  %v6148_v36 = vld [vmem:[#allocation60_spill] sm:$0xff]  ;;  %v6153_v46 = vld [vmem:[#allocation39_spill] sm:$0xff] }
 0x3ca   : > { %v2091_v30 = vmul.f32 %v5520_v35, %v2075_v9  ;;  %v2346_v60 = vadd.f32 1.0, %v2330_v63  ;;  %v1898_v58 = vadd.f32 1.0, %v1882_v2  ;;  %v2383_v26 = vsel %vm955_vm1, %v5471_v32, 0.0  ;;  %v6144_v32 = vld [vmem:[#allocation67_spill] sm:$0xff]  ;;  %v6152_v63 = vld [vmem:[#allocation74_spill] sm:$0xff] }
 0x3cb   : > { %v3198_v49 = vpop.eup %3197  ;;  %v1291_v41 = vpop.xlane.xlu0 %1290  ;;  %v1835_v55 = vsub.f32 1.0, %v5529_v8  ;;  %v2385_v6 = vsel %vm955_vm1, %v5486_v12, 0.0  ;;  %vm1370_vm9 = vcmp.gt.f32.partialorder %v6153_v46, %v6152_v63  ;;  %vm2299_vm10 = vcmp.ge.f32.partialorder %v5426_v61, 0.0 }
 0x3cc   : > { %v3200_v23 = vpop.eup %3199  ;;  %v2107_v42 = vadd.f32 1.4214138, %v2091_v30  ;;  %v1303_v62 = vmul.f32 %v3198_v49, %v6137_v31  ;;  %3221 = vrcp.f32 %v1291_v41  ;;  %v1914_v9 = vmul.f32 0.5, %v1898_v58  ;;  %v6155_v58 = vld [vmem:[#allocation85_spill] sm:$0xff] }
 0x3cd   : > { %v3202_v34 = vpop.eup %3201  ;;  %v1307_v24 = vmul.f32 %v3200_v23, %v6138_v50  ;;  %v1867_v59 = vsub.f32 0.0, %v1835_v55  ;;  %v2384_v23 = vadd.f32 %v2383_v26, %v2382_v18  ;;  %v2362_v31 = vmul.f32 0.5, %v2346_v60 }
 0x3ce   : > { %v3204_v17 = vpop.eup %3203  ;;  %v2123_v19 = vmul.f32 %v5520_v35, %v2107_v42  ;;  %v5541_v56 = vmul.f32 %v6121_v22, %v1303_v62  ;;  %v1309_v13 = vmul.f32 %v3202_v34, %v6139_v14  ;;  %v6150_v62 = vld [vmem:[#allocation61_spill] sm:$0xff]  ;;  %vm2417_vm12 = vcmask 24576  }
 0x3cf   : > { %v3206_v27 = vpop.eup %3205  ;;  %v5546_v37 = vmul.f32 %v6130_v3, %v1307_v24  ;;  %v1311_v21 = vmul.f32 %v3204_v17, %v6140_v15  ;;  %vm1851_vm15 = vcmp.ge.f32.partialorder %v6150_v62, 0.0  ;;  %v2386_v17 = vadd.f32 %v2385_v6, %v2384_v23  ;;  %v6154_v14 = vld [vmem:[#allocation65_spill] sm:$0xff]  ;;  %v6157_v6 = vld [vmem:[#allocation75_spill] sm:$0xff] }
 0x3d0   : > { %v3208_v25 = vpop.eup %3207  ;;  %v2139_v20 = vadd.f32 -0.28449672, %v2123_v19  ;;  %1345 = vst.msk [vmem:[%s5245_s16 + $0x28] sm:$0xff] %vm955_vm1, %v5541_v56  ;;  %v5556_v3 = vmul.f32 %v6120_v10, %v1309_v13  ;;  %v1305_v57 = vmul.f32 %v3206_v27, %v6141_v11  ;;  %v1883_v50 = vsel %vm1851_vm15, %v1835_v55, %v1867_v59 }
 0x3d1   : > { %v3210_v22 = vpop.eup %3209  ;;  %1347 = vst.msk [vmem:[%s5245_s16 + $0x38] sm:$0xff] %vm955_vm1, %v5546_v37  ;;  %v5559_v28 = vmul.f32 %v6110_v52, %v1311_v21  ;;  %v1313_v54 = vmul.f32 %v3208_v25, %v6142_v40  ;;  %v6143_v52 = vld [vmem:[#allocation64_spill] sm:$0xff]  ;;  %v2378_v2 = vsel %vm1370_vm9, %v1914_v9, %v2362_v31  ;;  %v1899_v15 = vadd.f32 1.0, %v1883_v50 }
 0x3d2   : > { %v3212_v53 = vpop.eup %3211  ;;  %v2155_v5 = vmul.f32 %v5520_v35, %v2139_v20  ;;  %1348 = vst.msk [vmem:[%s5245_s16 + $0x40] sm:$0xff] %vm955_vm1, %v5556_v3  ;;  %v1315_v10 = vmul.f32 %v3210_v22, %v6143_v52  ;;  %v1330_v51 = vmul.f32 %v6131_v45, %v1305_v57  ;;  %v6149_v45 = vld [vmem:[#allocation99_spill] sm:$0xff]  ;;  %v2389_v21 = vsel %vm955_vm1, %v5541_v56, 0.0  ;;  %v6156_v57 = vld [vmem:[#allocation72_spill] sm:$0xff]  ;;  %v6158_v52 = vld [vmem:[#allocation38_spill] sm:$0xff] }
 0x3d3   : > { %v3214_v39 = vpop.eup %3213  ;;  %1349 = vst.msk [vmem:[%s5245_s16 + $0x48] sm:$0xff] %vm955_vm1, %v5559_v28  ;;  %v1317_v48 = vmul.f32 %v3212_v53, %v6144_v32  ;;  %v1334_v12 = vmul.f32 %v6145_v29, %v1313_v54  ;;  %v2433_v18 = vmul.f32 %v6149_v45, %v2378_v2  ;;  %v1915_v11 = vmul.f32 0.5, %v1899_v15 }
 0x3d4   : > { %v3216_v43 = vpop.eup %3215  ;;  %v2171_v16 = vadd.f32 0.2548296, %v2155_v5  ;;  %v1321_v44 = vmul.f32 %v3214_v39, %v6146_v38  ;;  %v1335_v0 = vmul.f32 %v6147_v33, %v1315_v10  ;;  %1346 = vst.msk [vmem:[%s5245_s16 + $0x30] sm:$0xff] %vm955_vm1, %v1330_v51  ;;  %v2391_v60 = vsel %vm955_vm1, %v1330_v51, 0.0 }
 0x3d5   : > { %v1336_v30 = vmul.f32 %v6135_v4, %v1317_v48  ;;  %v1301_v49 = vmul.f32 %v3216_v43, %v6148_v36  ;;  %1350 = vst.msk [vmem:[%s5245_s16 + $0x50] sm:$0xff] %vm955_vm1, %v1334_v12  ;;  %v3218_v42 = vpop.eup %3217  ;;  %v6151_v4 = vld [vmem:[#allocation71_spill] sm:$0xff]  ;;  %v2462_v54 = vsel %vm955_vm1, %v2433_v18, 0.0  ;;  %v2395_v61 = vsel %vm955_vm1, %v5556_v3, 0.0 }
 0x3d6   : > { %v2187_v8 = vmul.f32 %v5520_v35, %v2171_v16  ;;  %v1338_v7 = vmul.f32 %v6149_v45, %v1321_v44  ;;  %1351 = vst.msk [vmem:[%s5245_s16 + $0x58] sm:$0xff] %vm955_vm1, %v1335_v0  ;;  %v3220_v35 = vpop.eup %3219  ;;  %vm1371_vm11 = vcmp.gt.f32.partialorder %v6158_v52, %v6157_v6  ;;  %v2463_v32 = vadd.f32 %v2462_v54, %v5524_v1 }
 0x3d7   : > { %1352 = vst.msk [vmem:[%s5245_s16 + $0x60] sm:$0xff] %vm955_vm1, %v1336_v30  ;;  %v1328_v34 = vmul.f32 %v6151_v4, %v1301_v49  ;;  %v1319_v13 = vmul.f32 %v3220_v35, %v6154_v14  ;;  %v2399_v51 = vsel %vm955_vm1, %v1334_v12, 0.0  ;;  %v2401_v38 = vsel %vm955_vm1, %v1335_v0, 0.0 }
 0x3d8   : > { %v2267_v24 = vmul.f32 %v3218_v42, %v2187_v8  ;;  %1354 = vst.msk [vmem:[%s5245_s16 + $0x70] sm:$0xff] %vm955_vm1, %v1338_v7  ;;  %v2403_v33 = vsel %vm955_vm1, %v1336_v30, 0.0  ;;  %v2407_v12 = vsel %vm955_vm1, %v1338_v7, 0.0 }
 0x3d9   : > { %1344 = vst.msk [vmem:[%s5245_s16 + $0x20] sm:$0xff] %vm955_vm1, %v1328_v34  ;;  %v2387_v19 = vsel %vm955_vm1, %v1328_v34, 0.0  ;;  %v1337_v55 = vmul.f32 %v6136_v47, %v1319_v13  ;;  %v3222_v25 = vpop.eup %3221  ;;  %v2393_v47 = vsel %vm955_vm1, %v5546_v37, 0.0  ;;  %v2397_v37 = vsel %vm955_vm1, %v5559_v28, 0.0 }
 0x3da   : > { %v2283_v41 = vsub.f32 1.0, %v2267_v24  ;;  %v2388_v27 = vadd.f32 %v2387_v19, %v2386_v17  ;;  %v1323_v53 = vmul.f32 %v3222_v25, %v6155_v58 }
 0x3db   : > { %1353 = vst.msk [vmem:[%s5245_s16 + $0x68] sm:$0xff] %vm955_vm1, %v1337_v55  ;;  %v2405_v49 = vsel %vm955_vm1, %v1337_v55, 0.0 }
 0x3dc   : > { %v2315_v20 = vsub.f32 0.0, %v2283_v41  ;;  %v2390_v22 = vadd.f32 %v2389_v21, %v2388_v27  ;;  %v1339_v40 = vmul.f32 %v6156_v57, %v1323_v53 }
 0x3de   : > { %v2331_v5 = vsel %vm2299_vm10, %v2283_v41, %v2315_v20  ;;  %v2392_v26 = vadd.f32 %v2391_v60, %v2390_v22  ;;  %1355 = vst.msk [vmem:[%s5245_s16 + $0x78] sm:$0xff] %vm955_vm1, %v1339_v40  ;;  %v2409_v0 = vsel %vm955_vm1, %v1339_v40, 0.0 }
 0x3df   : > { %v2347_v56 = vadd.f32 1.0, %v2331_v5 }
 0x3e0   : > { %v2394_v39 = vadd.f32 %v2393_v47, %v2392_v26 }
 0x3e1   : > { %v2363_v59 = vmul.f32 0.5, %v2347_v56 }
 0x3e2   : > { %v2396_v10 = vadd.f32 %v2395_v61, %v2394_v39 }
 0x3e3   : > { %v2379_v48 = vsel %vm1371_vm11, %v1915_v11, %v2363_v59 }
 0x3e4   : > { %v2434_v43 = vmul.f32 %v6156_v57, %v2379_v48  ;;  %v2398_v16 = vadd.f32 %v2397_v37, %v2396_v10 }
 0x3e6   : > { %v2464_v3 = vsel %vm955_vm1, %v2434_v43, 0.0  ;;  %v2400_v29 = vadd.f32 %v2399_v51, %v2398_v16 }
 0x3e7   : > { %v2465_v44 = vadd.f32 %v2464_v3, %v2463_v32 }
 0x3e8   : > { %v2402_v9 = vadd.f32 %v2401_v38, %v2400_v29 }
 0x3e9   : > { %v2466_v1 = vrot.slane %v2465_v44, 4 }
 0x3ea   : > { %v2404_v36 = vadd.f32 %v2403_v33, %v2402_v9 }
 0x3eb   : > { %v2467_v28 = vadd.f32 %v2466_v1, %v2465_v44 }
 0x3ec   : > { %v2406_v8 = vadd.f32 %v2405_v49, %v2404_v36 }
 0x3ed   : > { %v2468_v23 = vrot.slane %v2467_v28, 2 }
 0x3ee   : > { %v2408_v45 = vadd.f32 %v2407_v12, %v2406_v8 }
 0x3ef   : > { %v2469_v42 = vadd.f32 %v2468_v23, %v2467_v28 }
 0x3f0   : > { %v2410_v30 = vadd.f32 %v2409_v0, %v2408_v45 }
 0x3f1   : > { %v2470_v31 = vrot.slane %v2469_v42, 1 }
 0x3f2   : > { %v2411_v62 = vrot.slane %v2410_v30, 4 }
 0x3f3   : > { %v2471_v4 = vadd.f32 %v2470_v31, %v2469_v42 }
 0x3f4   : > { %v2412_v7 = vadd.f32 %v2411_v62, %v2410_v30 }
 0x3f5   : > { %2472 = vst.msk [vmem:[%s277_s20] sm:$0x1] %vm2417_vm12, %v2471_v4 }
 0x3f6   : > { %v2413_v34 = vrot.slane %v2412_v7, 2 }
 0x3f7   : > { %3236 = shalt.err (!%p3233_p4)
}
 0x3f8   : > { %s3237_s16 = scalar_lea.hbm %s5640_s9, 16  ;;  %s3241_s19 = scalar_lea.hbm %s5707_s5, 32 }
 0x3f9   : > { %p3238_p7 = scmp.ne.s32.totalorder %s5640_s9, %s3237_s16  ;;  %p3242_p10 = scmp.lt.s32.totalorder %s5640_s9, %s5707_s5 }
 0x3fa   : > { %p3243_p11 = scmp.lt.s32.totalorder %s3241_s19, %s3237_s16 }
 0x3fb   : > { %p3239_p8 = pnand %p3238_p7, %p3392_p5 }
 0x3fc   : > { %p3244_p12 = por %p3243_p11, %p3242_p10 }
 0x3fd   : > { %p3240_p9 = pneg %p3239_p8 }
 0x3ff   : > { %p3245_p13 = pnand %p3244_p12, %p3240_p9 }
 0x401   : > { %3248 = shalt.err (!%p3245_p13)
}
 0x402   : > { %2890 = dma.vmem_to_hbm [thread:$0]  (%p3392_p5), %s5642_s26, 16, %s5640_s9, %s2592_s10   ;;  %v2414_v35 = vadd.f32 %v2413_v34, %v2412_v7 }
 0x403   : > { %s271_s29 = scalar_lea.vmem [#allocation2], %s5631_s25  ;;  %s2609_s15 = scalar_lea.hbm %s5706_s4, %s3409_s13 }
 0x404   : > { %s2611_s11 = sshll.u32 %s271_s29, 4  ;;  %v2415_v63 = vrot.slane %v2414_v35, 1  ;;  %s2588_s16 = scalar_lea.sflag [#allocation3], %s5631_s25  ;;  %s2612_s11 = int_to_ptr.vmem [resolvable:$true] %s2611_s11 }
 0x405   : > { %s3249_s17 = scalar_lea.vmem %s2612_s11, 16  ;;  %s3318_s18 = smov [#allocation2]  }
 0x406   : > { %v2416_v46 = vadd.f32 %v2415_v63, %v2414_v35  ;;  %p3250_p0 = scmp.ne.s32.totalorder %s2612_s11, %s3249_s17  ;;  %s3253_s26 = sshll.u32 %s3318_s18, 4  ;;  %s3254_s26 = int_to_ptr.vmem [resolvable:$false] %s3253_s26 }
 0x407   : > { %s3255_s9 = scalar_lea.vmem %s3254_s26, 32  ;;  %p3256_p3 = scmp.lt.s32.totalorder %s2612_s11, %s3254_s26 }
 0x408   : > { %2418 = vst.msk [vmem:[%s271_s29] sm:$0x1] %vm2417_vm12, %v2416_v46  ;;  %p3251_p1 = pnand %p3250_p0, %p3392_p5  ;;  %p3257_p4 = scmp.lt.s32.totalorder %s3255_s9, %s3249_s17 }
 0x40a   : > { %p3252_p2 = pneg %p3251_p1  ;;  %p3258_p7 = por %p3257_p4, %p3256_p3 }
 0x40c   : > { %p3259_p8 = pnand %p3258_p7, %p3252_p2 }
 0x40e   : > { %3262 = shalt.err (!%p3259_p8)
}
 0x40f   : > { %s3263_s10 = scalar_lea.hbm %s2609_s15, 16  ;;  %s3267_s19 = scalar_lea.hbm %s5706_s4, 32 }
 0x410   : > { %p3264_p9 = scmp.ne.s32.totalorder %s2609_s15, %s3263_s10  ;;  %p3268_p12 = scmp.lt.s32.totalorder %s2609_s15, %s5706_s4 }
 0x411   : > { %p3269_p13 = scmp.lt.s32.totalorder %s3267_s19, %s3263_s10 }
 0x412   : > { %p3265_p10 = pnand %p3264_p9, %p3392_p5 }
 0x413   : > { %p3270_p0 = por %p3269_p13, %p3268_p12 }
 0x414   : > { %p3266_p11 = pneg %p3265_p10 }
 0x416   : > { %p3271_p1 = pnand %p3270_p0, %p3266_p11 }
 0x418   : > { %3274 = shalt.err (!%p3271_p1)
}
 0x419   : > { %2889 = dma.vmem_to_hbm [thread:$0]  (%p3392_p5), %s2612_s11, 16, %s2609_s15, %s2588_s16  }
 0x41a PF: > { %p2900_p2 = scmp.ge.s32.totalorder %s3313_s24, 2  ;;  %s2647_s29 = sand.u32 1, %s3301_s21  }
 0x41b   : > { %s2648_s12 = scalar_lea.sflag [#allocation3], %s2647_s29 }
 0x41c   : > { %p2894_p3 = pnand %p2900_p2, %p3396_p6 }
 0x41e   : > { %p2895_p4 = pneg %p2894_p3 }
 0x420   : > { %3292 = dma.done.wait (%p2895_p4), %s2648_s12, 16  }
 0x421   : > { %3294 = vsyncadd (%p2895_p4), %s2648_s12, 4294967280  ;;  %s2656_s14 = scalar_lea.sflag [#allocation5], %s2647_s29 }
 0x422   : > { %3296 = dma.done.wait (%p2895_p4), %s2656_s14, 16  }
 0x423   : > { %3298 = vsyncadd (%p2895_p4), %s2656_s14, 4294967280  ;;  %p20_p5 = scmp.ge.s32.totalorder %s3379_s27, 4   ;;  %s6159_s21 = smov %s3305_s22 }
 0x424   : > { %s6160_s22 = smov %s3309_s23  ;;  %s6161_s23 = smov %s3390_s30 }
 0x425   : > { %s6162_s24 = smov %s3379_s27  ;;  %22 = sbr.rel (!%p20_p5) target bundleno = 5 (0x5), region = 111 }
 0x42a   :  { %2666 = vsyncpa [#allocation3], 1 }
 0x42b   :  { %2668 = vsyncpa [#allocation3 + $0x1], 1 }
 0x42c   :  { %2669 = vsyncpa [#allocation5], 1 }
 0x42d   :  { %2671 = vsyncpa [#allocation5 + $0x1], 1 }

</bundles_post_ra>
